<compile_context>
chip_gen: v5e
topology: v5e:2x2
jax: 0.10.0
libtpu: 0.0.40
codegen_flags: <defaults>
</compile_context>

<pallas_src>
import functools

import jax
import jax.numpy as jnp
from jax.experimental import pallas as pl
from jax.experimental.pallas import tpu as pltpu

C = 336          # channels (fixed by the module)
BN_EPS = 1e-5


def _fused_kernel(x351_ref, x345_ref, w1_ref, gamma_ref, beta_ref, w2_ref,
                  o_ref, *, n_pixels):
    # x351_ref  : (C, P)  bf16   -- x351 (scale already folded into w1)
    # x345_ref  : (C, P)  f32
    # w1_ref    : (Cout, Cin) bf16  -- conv2d113 weight * x356 (folded)
    # gamma_ref : (C, 1)  f32
    # beta_ref  : (C, 1)  f32
    # w2_ref    : (Cout, Cin) bf16  -- conv2d114 weight
    # o_ref     : (C, P)  f32

    # x358 = 1x1 conv == (Cout, Cin) @ (Cin, P); bf16 operands, f32 accumulate.
    y = jax.lax.dot_general(
        w1_ref[...], x351_ref[...],
        dimension_numbers=(((1,), (0,)), ((), ())),
        preferred_element_type=jnp.float32)                      # (C, P) f32

    # x359 = BatchNorm2d (training mode): per-channel batch statistics over all
    # N*H*W pixels, biased variance.  Two-pass: mean, then centered variance
    # (the centered tensor is needed for the normalize anyway).
    inv_n = 1.0 / float(n_pixels)
    mean = jnp.sum(y, axis=-1, keepdims=True) * inv_n            # (C, 1)
    yc = y - mean
    var = jnp.sum(yc * yc, axis=-1, keepdims=True) * inv_n       # (C, 1)
    inv_std = jax.lax.rsqrt(var + BN_EPS)
    y_bn = yc * (inv_std * gamma_ref[...]) + beta_ref[...]

    # x360 = x345 + x359 ; x361 = relu(x360)
    z = jnp.maximum(x345_ref[...] + y_bn, 0.0)

    # x362 = 1x1 conv
    out = jax.lax.dot_general(
        w2_ref[...], z.astype(jnp.bfloat16),
        dimension_numbers=(((1,), (0,)), ((), ())),
        preferred_element_type=jnp.float32)
    o_ref[...] = out.astype(o_ref.dtype)


def fused_forward(x356, x351, x345, w1, gamma, beta, w2):
    """x356: (1,C,1,1); x351,x345: (N,C,H,W) f32; w1,w2: (Cout,Cin,1,1) f32."""
    n, c, h, w = x351.shape
    p = n * h * w

    if n == 1:
        # NCHW with N==1 is already (C, H*W): a free reshape, no transpose.
        to_cp = lambda t: t.reshape(c, p)
    else:
        # General N (not exercised by the spec): (N,C,HW) -> (C, N*HW).
        to_cp = lambda t: jnp.transpose(
            t.reshape(n, c, h * w), (1, 0, 2)).reshape(c, p)

    # bf16 ingestion for the matmul-only operand; residual stays f32.
    x351_cp = to_cp(x351).astype(jnp.bfloat16)
    x345_cp = to_cp(x345).astype(jnp.float32)

    # Fold the per-channel scale x356 into conv1's weight:
    #   y[cout,p] = sum_cin (w1[cout,cin] * scale[cin]) * x351[cin,p]
    w1_m = (w1.reshape(c, c) * x356.reshape(1, c)).astype(jnp.bfloat16)
    w2_m = w2.reshape(c, c).astype(jnp.bfloat16)
    gamma_c = gamma.reshape(c, 1).astype(jnp.float32)
    beta_c = beta.reshape(c, 1).astype(jnp.float32)

    flops = 2 * (2 * c * c * p)               # two MXU matmuls
    bytes_accessed = (x351_cp.size * 2 + x345_cp.size * 4
                      + w1_m.size * 2 + w2_m.size * 2
                      + gamma_c.size * 4 + beta_c.size * 4
                      + c * p * 4)            # f32 output

    vmem = lambda: pl.BlockSpec(memory_space=pltpu.MemorySpace.VMEM)

    out_cp = pl.pallas_call(
        functools.partial(_fused_kernel, n_pixels=p),
        out_shape=jax.ShapeDtypeStruct((c, p), jnp.float32),   # output pinned f32
        in_specs=[vmem() for _ in range(6)],
        out_specs=vmem(),
        cost_estimate=pl.CostEstimate(
            flops=flops, transcendentals=c, bytes_accessed=bytes_accessed),
    )(x351_cp, x345_cp, w1_m, gamma_c, beta_c, w2_m)

    if n == 1:
        return out_cp.reshape(1, c, h, w)
    return jnp.transpose(out_cp.reshape(c, n, h, w), (1, 0, 2, 3))


def reference_forward(x356, x351, x345, w1, gamma, beta, w2):
    """Faithful pure-JAX f32 reference of the PyTorch module (NCHW in/out)."""
    n, c, h, w = x351.shape
    x = x356 * x351                                              # x357
    x_pc = jnp.transpose(x, (0, 2, 3, 1)).reshape(-1, c)
    y = jnp.dot(x_pc, w1.reshape(c, c).T)                        # x358
    mean = jnp.mean(y, axis=0, keepdims=True)
    var = jnp.mean((y - mean) ** 2, axis=0, keepdims=True)       # biased (training)
    y = (y - mean) / jnp.sqrt(var + BN_EPS) * gamma.reshape(1, c) \
        + beta.reshape(1, c)                                     # x359
    x345_pc = jnp.transpose(x345, (0, 2, 3, 1)).reshape(-1, c)
    z = jnp.maximum(x345_pc + y, 0.0)                            # x360, x361
    out = jnp.dot(z, w2.reshape(c, c).T)                         # x362
    return jnp.transpose(out.reshape(n, h, w, c), (0, 3, 1, 2))


if __name__ == "__main__":
    key = jax.random.PRNGKey(0)
    k1, k2, k3, k4, k5 = jax.random.split(key, 5)

    N, H, W = 1, 14, 14
    x356 = jax.random.normal(k1, (1, C, 1, 1), dtype=jnp.float32)
    x351 = jax.random.normal(k2, (N, C, H, W), dtype=jnp.float32)
    x345 = jax.random.normal(k3, (N, C, H, W), dtype=jnp.float32)

    # Conv2d weights (Cout, Cin, 1, 1); deterministic init.
    w1 = jax.random.normal(k4, (C, C, 1, 1), dtype=jnp.float32) * (1.0 / jnp.sqrt(C))
    w2 = jax.random.normal(k5, (C, C, 1, 1), dtype=jnp.float32) * (1.0 / jnp.sqrt(C))
    # BatchNorm2d default affine init: gamma=1, beta=0.
    gamma = jnp.ones((C,), dtype=jnp.float32)
    beta = jnp.zeros((C,), dtype=jnp.float32)

    out = fused_forward(x356, x351, x345, w1, gamma, beta, w2)
    out = jax.block_until_ready(out)

    ref = reference_forward(x356, x351, x345, w1, gamma, beta, w2)
    assert out.shape == (N, C, H, W)
    # bf16-MXU kernel vs f32 reference: allow bf16 matmul accumulation noise.
    assert jnp.allclose(out, ref, atol=2e-2, rtol=2e-2), "mismatch vs reference"

    print("KERNEL_OK")
</pallas_src>

<mosaic_0001>
module attributes {stable_mosaic.version = 11 : i64} {
  func.func @_fused_kernel(%arg0: memref<336x196xbf16, #tpu.memory_space<vmem>>, %arg1: memref<336x196xf32, #tpu.memory_space<vmem>>, %arg2: memref<336x336xbf16, #tpu.memory_space<vmem>>, %arg3: memref<336x1xf32, #tpu.memory_space<vmem>>, %arg4: memref<336x1xf32, #tpu.memory_space<vmem>>, %arg5: memref<336x336xbf16, #tpu.memory_space<vmem>>, %arg6: memref<336x196xf32, #tpu.memory_space<vmem>>) attributes {dimension_semantics = [], scalar_prefetch = 0 : i64, scratch_operands = 0 : i64, tpu.core_type = #tpu.core_type<tc>} {
    %c0 = arith.constant 0 : index
    %c0_0 = arith.constant 0 : index
    %0 = vector.load %arg2[%c0, %c0_0] : memref<336x336xbf16, #tpu.memory_space<vmem>>, vector<336x336xbf16>
    %c0_1 = arith.constant 0 : index
    %c0_2 = arith.constant 0 : index
    %1 = vector.load %arg0[%c0_1, %c0_2] : memref<336x196xbf16, #tpu.memory_space<vmem>>, vector<336x196xbf16>
    %cst = arith.constant dense<0.000000e+00> : vector<336x196xf32>
    %2 = tpu.matmul %0, %1, %cst {dimension_numbers = #tpu.dot_dimension_numbers<[1], [0], [0], [1], [0, 0, 1, 1], [], []>} : vector<336x336xbf16>, vector<336x196xbf16>, vector<336x196xf32> -> vector<336x196xf32>
    %cst_3 = arith.constant dense<0.000000e+00> : vector<336xf32>
    %3 = vector.multi_reduction <add>, %2, %cst_3 [1] : vector<336x196xf32> to vector<336xf32>
    %4 = vector.shape_cast %3 : vector<336xf32> to vector<336x1xf32>
    %cst_4 = arith.constant 0.00510204071 : f32
    %5 = vector.broadcast %cst_4 : f32 to vector<336x1xf32>
    %6 = arith.mulf %4, %5 : vector<336x1xf32>
    %7 = vector.broadcast %6 : vector<336x1xf32> to vector<336x196xf32>
    %8 = arith.subf %2, %7 : vector<336x196xf32>
    %9 = arith.mulf %8, %8 : vector<336x196xf32>
    %cst_5 = arith.constant dense<0.000000e+00> : vector<336xf32>
    %10 = vector.multi_reduction <add>, %9, %cst_5 [1] : vector<336x196xf32> to vector<336xf32>
    %11 = vector.shape_cast %10 : vector<336xf32> to vector<336x1xf32>
    %cst_6 = arith.constant 0.00510204071 : f32
    %12 = vector.broadcast %cst_6 : f32 to vector<336x1xf32>
    %13 = arith.mulf %11, %12 : vector<336x1xf32>
    %cst_7 = arith.constant 9.99999974E-6 : f32
    %14 = vector.broadcast %cst_7 : f32 to vector<336x1xf32>
    %15 = arith.addf %13, %14 : vector<336x1xf32>
    %16 = math.rsqrt %15 : vector<336x1xf32>
    %c0_8 = arith.constant 0 : index
    %c0_9 = arith.constant 0 : index
    %17 = vector.load %arg3[%c0_8, %c0_9] : memref<336x1xf32, #tpu.memory_space<vmem>>, vector<336x1xf32>
    %18 = arith.mulf %16, %17 : vector<336x1xf32>
    %19 = vector.broadcast %18 : vector<336x1xf32> to vector<336x196xf32>
    %20 = arith.mulf %8, %19 : vector<336x196xf32>
    %c0_10 = arith.constant 0 : index
    %c0_11 = arith.constant 0 : index
    %21 = vector.load %arg4[%c0_10, %c0_11] : memref<336x1xf32, #tpu.memory_space<vmem>>, vector<336x1xf32>
    %22 = vector.broadcast %21 : vector<336x1xf32> to vector<336x196xf32>
    %23 = arith.addf %20, %22 : vector<336x196xf32>
    %c0_12 = arith.constant 0 : index
    %c0_13 = arith.constant 0 : index
    %24 = vector.load %arg1[%c0_12, %c0_13] : memref<336x196xf32, #tpu.memory_space<vmem>>, vector<336x196xf32>
    %25 = arith.addf %24, %23 : vector<336x196xf32>
    %cst_14 = arith.constant 0.000000e+00 : f32
    %26 = vector.broadcast %cst_14 : f32 to vector<336x196xf32>
    %27 = arith.maximumf %25, %26 : vector<336x196xf32>
    %c0_15 = arith.constant 0 : index
    %c0_16 = arith.constant 0 : index
    %28 = vector.load %arg5[%c0_15, %c0_16] : memref<336x336xbf16, #tpu.memory_space<vmem>>, vector<336x336xbf16>
    %29 = arith.truncf %27 : vector<336x196xf32> to vector<336x196xbf16>
    %cst_17 = arith.constant dense<0.000000e+00> : vector<336x196xf32>
    %30 = tpu.matmul %28, %29, %cst_17 {dimension_numbers = #tpu.dot_dimension_numbers<[1], [0], [0], [1], [0, 0, 1, 1], [], []>} : vector<336x336xbf16>, vector<336x196xbf16>, vector<336x196xf32> -> vector<336x196xf32>
    %c0_18 = arith.constant 0 : index
    %c0_19 = arith.constant 0 : index
    %31 = vector.load %arg6[%c0_18, %c0_19] : memref<336x196xf32, #tpu.memory_space<vmem>>, vector<336x196xf32>
    tpu.vector_store %arg6[%c0_18, %c0_19], %30 {strides = array<i32>} : memref<336x196xf32, #tpu.memory_space<vmem>>, vector<336x196xf32>,
    return
  }
}

</mosaic_0001>

<bundles_post_ra>
// kernel: tpu_custom_call.1
= control target key start
LH: loop header
LB: loop body
LE: loop exit
PB: predicated region body
PF: predicated region fallthrough
CT: control target
= control target key end

     0   :  { %vm675_vm0 = vcmask 654336   ;;  %vm1423_vm1 = vcmask 556032   ;;  %s9703_s0 = inlined_call_operand.vmem [shape: bf16[336,196], index: 0, kind: input, shape index: {}]   ;;  %s9704_s2 = inlined_call_operand.vmem [shape: bf16[336,336], index: 2, kind: input, shape index: {}]   ;;  %s9705_s4 = inlined_call_operand.vmem [shape: f32[336,1], index: 4, kind: input, shape index: {}]   ;;  %s9706_s3 = inlined_call_operand.vmem [shape: f32[336,1], index: 3, kind: input, shape index: {}]   ;;  %s9707_s1 = inlined_call_operand.vmem [shape: f32[336,196], index: 1, kind: input, shape index: {}]   ;;  %s9708_s5 = inlined_call_operand.vmem [shape: bf16[336,336], index: 5, kind: input, shape index: {}]   ;;  %s9709_s6 = inlined_call_operand.vmem [shape: f32[336,196], index: 6, kind: output, shape index: {}]  }
   0x1   :  { %v5026_v0 = vld [vmem:[%s9703_s0 + $0x70] sm:$0xf]  ;;  %v5550_v1 = vld [vmem:[%s9703_s0 + $0x74] sm:$0xf0]  ;;  %v5130_v5 = vld [vmem:[%s9703_s0 + $0x140] sm:$0xf] }
   0x2   :  { %v5090_v2 = vld [vmem:[%s9703_s0 + $0xf0] sm:$0xf]  ;;  %v5027_v3 = vor.u32 %v5550_v1, %v5026_v0  ;;  %v5566_v4 = vld [vmem:[%s9703_s0 + $0xf4] sm:$0xf0]  ;;  %v5576_v6 = vld [vmem:[%s9703_s0 + $0x144] sm:$0xf0] }
   0x3   :  { %v5091_v7 = vor.u32 %v5566_v4, %v5090_v2  ;;  %v5131_v8 = vor.u32 %v5576_v6, %v5130_v5  ;;  %v5018_v9 = vld [vmem:[%s9703_s0 + $0x60] sm:$0xf]  ;;  %v5548_v10 = vld [vmem:[%s9703_s0 + $0x64] sm:$0xf0]  ;;  %v5122_v14 = vld [vmem:[%s9703_s0 + $0x130] sm:$0xf] }
   0x4   :  { %v5082_v11 = vld [vmem:[%s9703_s0 + $0xe0] sm:$0xf]  ;;  %739 = vmatpush.bf16.msra.mxu0 %v5027_v3  ;;  %v5019_v12 = vor.u32 %v5548_v10, %v5018_v9  ;;  %v5564_v13 = vld [vmem:[%s9703_s0 + $0xe4] sm:$0xf0]  ;;  %v5574_v15 = vld [vmem:[%s9703_s0 + $0x134] sm:$0xf0] }
   0x5   :  { %853 = vmatpush.bf16.msra.mxu1 %v5091_v7  ;;  %970 = vmatpush.bf16.msra.mxu2 %v5131_v8  ;;  %v5083_v16 = vor.u32 %v5564_v13, %v5082_v11  ;;  %v5123_v17 = vor.u32 %v5574_v15, %v5122_v14  ;;  %v5010_v18 = vld [vmem:[%s9703_s0 + $0x50] sm:$0xf]  ;;  %v5546_v19 = vld [vmem:[%s9703_s0 + $0x54] sm:$0xf0]  ;;  %v5114_v22 = vld [vmem:[%s9703_s0 + $0x120] sm:$0xf] }
   0x6   :  { %v5074_v20 = vld [vmem:[%s9703_s0 + $0xd0] sm:$0xf]  ;;  %v5562_v21 = vld [vmem:[%s9703_s0 + $0xd4] sm:$0xf0]  ;;  %v5572_v23 = vld [vmem:[%s9703_s0 + $0x124] sm:$0xf0]  ;;  %v5011_v24 = vor.u32 %v5546_v19, %v5010_v18 }
   0x7   :  { %v5075_v25 = vor.u32 %v5562_v21, %v5074_v20  ;;  %v5115_v26 = vor.u32 %v5572_v23, %v5114_v22  ;;  %v5002_v27 = vld [vmem:[%s9703_s0 + $0x40] sm:$0xf]  ;;  %v5544_v28 = vld [vmem:[%s9703_s0 + $0x44] sm:$0xf0]  ;;  %v5106_v31 = vld [vmem:[%s9703_s0 + $0x110] sm:$0xf] }
   0x8   :  { %740 = vmatpush.bf16.msra.mxu0 %v5019_v12  ;;  %v5066_v29 = vld [vmem:[%s9703_s0 + $0xc0] sm:$0xf]  ;;  %v5560_v30 = vld [vmem:[%s9703_s0 + $0xc4] sm:$0xf0]  ;;  %v5570_v32 = vld [vmem:[%s9703_s0 + $0x114] sm:$0xf0]  ;;  %v5003_v33 = vor.u32 %v5544_v28, %v5002_v27 }
   0x9   :  { %854 = vmatpush.bf16.msra.mxu1 %v5083_v16  ;;  %971 = vmatpush.bf16.msra.mxu2 %v5123_v17  ;;  %v5067_v34 = vor.u32 %v5560_v30, %v5066_v29  ;;  %v5107_v35 = vor.u32 %v5570_v32, %v5106_v31  ;;  %v4994_v36 = vld [vmem:[%s9703_s0 + $0x30] sm:$0xf]  ;;  %v5542_v37 = vld [vmem:[%s9703_s0 + $0x34] sm:$0xf0]  ;;  %v5098_v40 = vld [vmem:[%s9703_s0 + $0x100] sm:$0xf] }
   0xa   :  { %v5058_v38 = vld [vmem:[%s9703_s0 + $0xb0] sm:$0xf]  ;;  %v5558_v39 = vld [vmem:[%s9703_s0 + $0xb4] sm:$0xf0]  ;;  %v5568_v41 = vld [vmem:[%s9703_s0 + $0x104] sm:$0xf0]  ;;  %v4995_v42 = vor.u32 %v5542_v37, %v4994_v36 }
   0xb   :  { %v4726_v43 = vld [vmem:[%s9704_s2 + $0x8] sm:$0xf]  ;;  %v5059_v44 = vor.u32 %v5558_v39, %v5058_v38  ;;  %v5099_v45 = vor.u32 %v5568_v41, %v5098_v40  ;;  %v5474_v46 = vld [vmem:[%s9704_s2 + $0x10] sm:$0xf0]  ;;  %v4986_v47 = vld [vmem:[%s9703_s0 + $0x20] sm:$0xf] }
   0xc   :  { %741 = vmatpush.bf16.msra.mxu0 %v5011_v24  ;;  %v5540_v48 = vld [vmem:[%s9703_s0 + $0x24] sm:$0xf0]  ;;  %v5050_v49 = vld [vmem:[%s9703_s0 + $0xa0] sm:$0xf]  ;;  %v5872_v51 = vor.u32 %v5474_v46, %v4726_v43  ;;  %v4978_v54 = vld [vmem:[%s9703_s0 + $0x10] sm:$0xf] }
   0xd   :  { %855 = vmatpush.bf16.msra.mxu1 %v5075_v25  ;;  %972 = vmatpush.bf16.msra.mxu2 %v5115_v26  ;;  %v5556_v50 = vld [vmem:[%s9703_s0 + $0xa4] sm:$0xf0]  ;;  %v4987_v52 = vor.u32 %v5540_v48, %v4986_v47  ;;  %v5538_v55 = vld [vmem:[%s9703_s0 + $0x14] sm:$0xf0]  ;;  %v5042_v56 = vld [vmem:[%s9703_s0 + $0x90] sm:$0xf] }
   0xe   :  { %v5051_v53 = vor.u32 %v5556_v50, %v5050_v49  ;;  %v5554_v57 = vld [vmem:[%s9703_s0 + $0x94] sm:$0xf0]  ;;  %v4979_v58 = vor.u32 %v5538_v55, %v4978_v54  ;;  %v4970_v60 = vld [vmem:[%s9703_s0] sm:$0xf]  ;;  %v5536_v61 = vld [vmem:[%s9703_s0 + $0x4] sm:$0xf0] }
   0xf   :  { %v5043_v59 = vor.u32 %v5554_v57, %v5042_v56  ;;  %v5034_v62 = vld [vmem:[%s9703_s0 + $0x80] sm:$0xf]  ;;  %v5552_v63 = vld [vmem:[%s9703_s0 + $0x84] sm:$0xf0]  ;;  %v4971_v0 = vor.u32 %v5536_v61, %v4970_v60  ;;  %v5473_v2 = vld [vmem:[%s9704_s2 + $0x8] sm:$0xf0] }
  0x10   :  { %742 = vmatpush.bf16.msra.mxu0 %v5003_v33  ;;  %v4718_v1 = vld [vmem:[%s9704_s2] sm:$0xf]  ;;  %v5035_v3 = vor.u32 %v5552_v63, %v5034_v62  ;;  %v5472_v4 = vld [vmem:[%s9704_s2 + $0x4] sm:$0xf]  ;;  %v4720_v5 = vld [vmem:[%s9704_s2 + $0xc] sm:$0xf0] }
  0x11   :  { %856 = vmatpush.bf16.msra.mxu1 %v5067_v34  ;;  %973 = vmatpush.bf16.msra.mxu2 %v5107_v35  ;;  %v5912_v6 = vor.u32 %v5473_v2, %v4718_v1  ;;  %v5914_v7 = vor.u32 %v5472_v4, %v4720_v5  ;;  %v4738_v8 = vld [vmem:[%s9704_s2 + $0x20] sm:$0xf]  ;;  %v5477_v9 = vld [vmem:[%s9704_s2 + $0x28] sm:$0xf0]  ;;  %v4730_v11 = vld [vmem:[%s9704_s2 + $0x18] sm:$0xf] }
  0x12   :  { %v5924_v10 = vor.u32 %v5477_v9, %v4738_v8  ;;  %v5476_v12 = vld [vmem:[%s9704_s2 + $0x20] sm:$0xf0]  ;;  %v5475_v13 = vld [vmem:[%s9704_s2 + $0x1c] sm:$0xf]  ;;  %v4732_v14 = vld [vmem:[%s9704_s2 + $0x24] sm:$0xf0] }
  0x13   :  { %v5940_v15 = vor.u32 %v5476_v12, %v4730_v11  ;;  %v5942_v16 = vor.u32 %v5475_v13, %v4732_v14  ;;  %v4750_v17 = vld [vmem:[%s9704_s2 + $0x38] sm:$0xf]  ;;  %v5480_v18 = vld [vmem:[%s9704_s2 + $0x40] sm:$0xf0]  ;;  %v4742_v20 = vld [vmem:[%s9704_s2 + $0x30] sm:$0xf] }
  0x14   :  { %743 = vmatpush.bf16.msra.mxu0 %v4995_v42  ;;  %v5952_v19 = vor.u32 %v5480_v18, %v4750_v17  ;;  %v5479_v21 = vld [vmem:[%s9704_s2 + $0x38] sm:$0xf0]  ;;  %v5478_v22 = vld [vmem:[%s9704_s2 + $0x34] sm:$0xf]  ;;  %v4744_v23 = vld [vmem:[%s9704_s2 + $0x3c] sm:$0xf0] }
  0x15   :  { %857 = vmatpush.bf16.msra.mxu1 %v5059_v44  ;;  %974 = vmatpush.bf16.msra.mxu2 %v5099_v45  ;;  %v5968_v24 = vor.u32 %v5479_v21, %v4742_v20  ;;  %v5970_v25 = vor.u32 %v5478_v22, %v4744_v23  ;;  %v4762_v26 = vld [vmem:[%s9704_s2 + $0x50] sm:$0xf]  ;;  %v5483_v27 = vld [vmem:[%s9704_s2 + $0x58] sm:$0xf0]  ;;  %v4754_v29 = vld [vmem:[%s9704_s2 + $0x48] sm:$0xf] }
  0x16   :  { %v5980_v28 = vor.u32 %v5483_v27, %v4762_v26  ;;  %v5482_v30 = vld [vmem:[%s9704_s2 + $0x50] sm:$0xf0]  ;;  %v5481_v31 = vld [vmem:[%s9704_s2 + $0x4c] sm:$0xf]  ;;  %v4756_v32 = vld [vmem:[%s9704_s2 + $0x54] sm:$0xf0] }
  0x17   :  { %v5996_v33 = vor.u32 %v5482_v30, %v4754_v29  ;;  %v5998_v34 = vor.u32 %v5481_v31, %v4756_v32  ;;  %v4774_v35 = vld [vmem:[%s9704_s2 + $0x68] sm:$0xf]  ;;  %v5486_v36 = vld [vmem:[%s9704_s2 + $0x70] sm:$0xf0]  ;;  %v4766_v38 = vld [vmem:[%s9704_s2 + $0x60] sm:$0xf] }
  0x18   :  { %5136 = vmatmul.msk.bf16.vlgmr.msra.gmra.mxu2 %vm675_vm0, %v5872_v51  ;;  %744 = vmatpush.bf16.msra.mxu0 %v4987_v52  ;;  %v6008_v37 = vor.u32 %v5486_v36, %v4774_v35  ;;  %v5485_v39 = vld [vmem:[%s9704_s2 + $0x68] sm:$0xf0]  ;;  %v5484_v40 = vld [vmem:[%s9704_s2 + $0x64] sm:$0xf]  ;;  %v4768_v41 = vld [vmem:[%s9704_s2 + $0x6c] sm:$0xf0] }
  0x19   :  { %858 = vmatpush.bf16.msra.mxu1 %v5051_v53  ;;  %v6024_v42 = vor.u32 %v5485_v39, %v4766_v38  ;;  %v6026_v43 = vor.u32 %v5484_v40, %v4768_v41  ;;  %v4786_v44 = vld [vmem:[%s9704_s2 + $0x80] sm:$0xf]  ;;  %v5489_v45 = vld [vmem:[%s9704_s2 + $0x88] sm:$0xf0]  ;;  %v4778_v47 = vld [vmem:[%s9704_s2 + $0x78] sm:$0xf] }
  0x1a   :  { %v6036_v46 = vor.u32 %v5489_v45, %v4786_v44  ;;  %v5488_v48 = vld [vmem:[%s9704_s2 + $0x80] sm:$0xf0]  ;;  %v5487_v49 = vld [vmem:[%s9704_s2 + $0x7c] sm:$0xf]  ;;  %v4780_v50 = vld [vmem:[%s9704_s2 + $0x84] sm:$0xf0] }
  0x1b   :  { %v6052_v52 = vor.u32 %v5488_v48, %v4778_v47  ;;  %v6054_v53 = vor.u32 %v5487_v49, %v4780_v50  ;;  %v4798_v54 = vld [vmem:[%s9704_s2 + $0x98] sm:$0xf]  ;;  %v5492_v55 = vld [vmem:[%s9704_s2 + $0xa0] sm:$0xf0]  ;;  %v4790_v57 = vld [vmem:[%s9704_s2 + $0x90] sm:$0xf] }
  0x1c   :  { %745 = vmatpush.bf16.msra.mxu0 %v4979_v58  ;;  %v6064_v56 = vor.u32 %v5492_v55, %v4798_v54  ;;  %v5491_v58 = vld [vmem:[%s9704_s2 + $0x98] sm:$0xf0]  ;;  %v4792_v60 = vld [vmem:[%s9704_s2 + $0x9c] sm:$0xf0]  ;;  %v4810_v63 = vld [vmem:[%s9704_s2 + $0xb0] sm:$0xf] }
  0x1d   :  { %859 = vmatpush.bf16.msra.mxu1 %v5043_v59  ;;  %v5490_v59 = vld [vmem:[%s9704_s2 + $0x94] sm:$0xf]  ;;  %v6080_v61 = vor.u32 %v5491_v58, %v4790_v57  ;;  %v4802_v2 = vld [vmem:[%s9704_s2 + $0xa8] sm:$0xf]  ;;  %v5493_v4 = vld [vmem:[%s9704_s2 + $0xac] sm:$0xf] }
  0x1e   :  { %v6082_v62 = vor.u32 %v5490_v59, %v4792_v60  ;;  %v4804_v5 = vld [vmem:[%s9704_s2 + $0xb4] sm:$0xf0]  ;;  %v4822_v11 = vld [vmem:[%s9704_s2 + $0xc8] sm:$0xf]  ;;  %v5498_v12 = vld [vmem:[%s9704_s2 + $0xd0] sm:$0xf0] }
  0x1f   :  { %v6110_v9 = vor.u32 %v5493_v4, %v4804_v5  ;;  %v6120_v13 = vor.u32 %v5498_v12, %v4822_v11  ;;  %v4814_v17 = vld [vmem:[%s9704_s2 + $0xc0] sm:$0xf]  ;;  %v5497_v18 = vld [vmem:[%s9704_s2 + $0xc8] sm:$0xf0]  ;;  %v5496_v20 = vld [vmem:[%s9704_s2 + $0xc4] sm:$0xf] }
  0x20   :  { %746 = vmatpush.bf16.msra.mxu0 %v4971_v0  ;;  %v5495_v0 = vld [vmem:[%s9704_s2 + $0xb8] sm:$0xf0]  ;;  %v4816_v21 = vld [vmem:[%s9704_s2 + $0xcc] sm:$0xf0]  ;;  %v6136_v22 = vor.u32 %v5497_v18, %v4814_v17  ;;  %v4834_v29 = vld [vmem:[%s9704_s2 + $0xe0] sm:$0xf] }
  0x21   :  { %860 = vmatpush.bf16.msra.mxu1 %v5035_v3  ;;  %v6092_v1 = vor.u32 %v5495_v0, %v4810_v63  ;;  %v5494_v3 = vld [vmem:[%s9704_s2 + $0xb0] sm:$0xf0]  ;;  %v6138_v26 = vor.u32 %v5496_v20, %v4816_v21  ;;  %v5501_v30 = vld [vmem:[%s9704_s2 + $0xe8] sm:$0xf0]  ;;  %v4826_v44 = vld [vmem:[%s9704_s2 + $0xd8] sm:$0xf] }
  0x22   :  { %v6108_v8 = vor.u32 %v5494_v3, %v4802_v2  ;;  %v6150_v36 = vor.u32 %v5501_v30, %v4834_v29  ;;  %v5500_v45 = vld [vmem:[%s9704_s2 + $0xe0] sm:$0xf0]  ;;  %v5499_v48 = vld [vmem:[%s9704_s2 + $0xdc] sm:$0xf]  ;;  %v4828_v49 = vld [vmem:[%s9704_s2 + $0xe4] sm:$0xf0] }
  0x23   :  { %747 = vmatmul.bf16.vlgmr.msra.gmra.mxu0 %v5912_v6  ;;  %v6168_v50 = vor.u32 %v5500_v45, %v4826_v44  ;;  %v6170_v55 = vor.u32 %v5499_v48, %v4828_v49  ;;  %v4846_v58 = vld [vmem:[%s9704_s2 + $0xf8] sm:$0xf]  ;;  %v5504_v59 = vld [vmem:[%s9704_s2 + $0x100] sm:$0xf0]  ;;  %v4838_v12 = vld [vmem:[%s9704_s2 + $0xf0] sm:$0xf] }
  0x24   :  { %861 = vmatmul.bf16.vlgmr.msra.gmra.mxu1 %v5914_v7  ;;  %v6182_v2 = vor.u32 %v5504_v59, %v4846_v58  ;;  %v5502_v18 = vld [vmem:[%s9704_s2 + $0xf4] sm:$0xf]  ;;  %v4840_v20 = vld [vmem:[%s9704_s2 + $0xfc] sm:$0xf0]  ;;  %v4858_v30 = vld [vmem:[%s9704_s2 + $0x110] sm:$0xf] }
  0x25   :  { %v4850_v49 = vld [vmem:[%s9704_s2 + $0x108] sm:$0xf]  ;;  %v5505_v58 = vld [vmem:[%s9704_s2 + $0x10c] sm:$0xf]  ;;  %v4852_v59 = vld [vmem:[%s9704_s2 + $0x114] sm:$0xf0] }
  0x28   :  { %5137 = vmatmul.msk.bf16.gmra.mxu2 %vm675_vm0, %v5924_v10 }
  0x33   :  { %752 = vmatmul.bf16.gmra.mxu0 %v5940_v15 }
  0x34   :  { %866 = vmatmul.bf16.gmra.mxu1 %v5942_v16 }
  0x38   :  { %5138 = vmatmul.msk.bf16.gmra.mxu2 %vm675_vm0, %v5952_v19 }
  0x43   :  { %757 = vmatmul.bf16.gmra.mxu0 %v5968_v24 }
  0x44   :  { %871 = vmatmul.bf16.gmra.mxu1 %v5970_v25 }
  0x48   :  { %5139 = vmatmul.msk.bf16.gmra.mxu2 %vm675_vm0, %v5980_v28 }
  0x53   :  { %762 = vmatmul.bf16.gmra.mxu0 %v5996_v33 }
  0x54   :  { %876 = vmatmul.bf16.gmra.mxu1 %v5998_v34 }
  0x58   :  { %5140 = vmatmul.msk.bf16.gmra.mxu2 %vm675_vm0, %v6008_v37 }
  0x63   :  { %767 = vmatmul.bf16.gmra.mxu0 %v6024_v42 }
  0x64   :  { %881 = vmatmul.bf16.gmra.mxu1 %v6026_v43 }
  0x68   :  { %5141 = vmatmul.msk.bf16.gmra.mxu2 %vm675_vm0, %v6036_v46 }
  0x73   :  { %772 = vmatmul.bf16.gmra.mxu0 %v6052_v52 }
  0x74   :  { %886 = vmatmul.bf16.gmra.mxu1 %v6054_v53 }
  0x78   :  { %5142 = vmatmul.msk.bf16.gmra.mxu2 %vm675_vm0, %v6064_v56 }
  0x83   :  { %777 = vmatmul.bf16.gmra.mxu0 %v6080_v61 }
  0x84   :  { %891 = vmatmul.bf16.gmra.mxu1 %v6082_v62 }
  0x88   :  { %5143 = vmatmul.msk.bf16.gmra.mxu2 %vm675_vm0, %v6092_v1 }
  0x93   :  { %782 = vmatmul.bf16.gmra.mxu0 %v6108_v8 }
  0x94   :  { %896 = vmatmul.bf16.gmra.mxu1 %v6110_v9 }
  0x98   :  { %5144 = vmatmul.msk.bf16.gmra.mxu2 %vm675_vm0, %v6120_v13 }
  0x9b   :  { %v976_v14 = vpop.f32.mrf.mxu2 }
  0xa0   :  { %v748_v23 = vpop.f32.mrf.mxu0 }
  0xa1   :  { %v862_v27 = vpop.f32.mrf.mxu1 }
  0xa2   :  { %v863_v31 = vadd.f32 %v862_v27, %v748_v23  ;;  %v6202_v27 = vor.u32 %v5502_v18, %v4840_v20 }
  0xa3   :  { %v978_v32 = vpop.f32.mrf.mxu2  ;;  %787 = vmatmul.bf16.gmra.mxu0 %v6136_v22 }
  0xa4   :  { %v6147_v35 = vadd.f32 %v976_v14, %v863_v31  ;;  %901 = vmatmul.bf16.gmra.mxu1 %v6138_v26  ;;  %v5503_v14 = vld [vmem:[%s9704_s2 + $0xf8] sm:$0xf0] }
  0xa5   :  { %v6200_v21 = vor.u32 %v5503_v14, %v4838_v12  ;;  %v5507_v31 = vld [vmem:[%s9704_s2 + $0x118] sm:$0xf0] }
  0xa8   :  { %5145 = vmatmul.msk.bf16.gmra.mxu2 %vm675_vm0, %v6150_v36  ;;  %v750_v38 = vpop.f32.mrf.mxu0 }
  0xa9   :  { %v864_v39 = vpop.f32.mrf.mxu1 }
  0xaa   :  { %v865_v40 = vadd.f32 %v864_v39, %v750_v38 }
  0xab   :  { %v981_v41 = vpop.f32.mrf.mxu2 }
  0xac   :  { %v6160_v47 = vadd.f32 %v978_v32, %v865_v40  ;;  %v6214_v40 = vor.u32 %v5507_v31, %v4858_v30 }
  0xb0   :  { %v753_v54 = vpop.f32.mrf.mxu0 }
  0xb1   :  { %v867_v57 = vpop.f32.mrf.mxu1 }
  0xb2   :  { %v868_v60 = vadd.f32 %v867_v57, %v753_v54  ;;  %v5506_v54 = vld [vmem:[%s9704_s2 + $0x110] sm:$0xf0] }
  0xb3   :  { %v983_v63 = vpop.f32.mrf.mxu2  ;;  %792 = vmatmul.bf16.gmra.mxu0 %v6168_v50 }
  0xb4   :  { %v6179_v0 = vadd.f32 %v981_v41, %v868_v60  ;;  %906 = vmatmul.bf16.gmra.mxu1 %v6170_v55  ;;  %v6232_v60 = vor.u32 %v5506_v54, %v4850_v49 }
  0xb8   :  { %5146 = vmatmul.msk.bf16.gmra.mxu2 %vm675_vm0, %v6182_v2  ;;  %v755_v3 = vpop.f32.mrf.mxu0 }
  0xb9   :  { %v869_v4 = vpop.f32.mrf.mxu1 }
  0xba   :  { %v870_v5 = vadd.f32 %v869_v4, %v755_v3  ;;  %v6234_v3 = vor.u32 %v5505_v58, %v4852_v59  ;;  %v4882_v59 = vld [vmem:[%s9704_s2 + $0x140] sm:$0xf] }
  0xbb   :  { %v986_v11 = vpop.f32.mrf.mxu2 }
  0xbc   :  { %v6192_v17 = vadd.f32 %v983_v63, %v870_v5  ;;  %v4870_v5 = vld [vmem:[%s9704_s2 + $0x128] sm:$0xf] }
  0xc0   :  { %v758_v23 = vpop.f32.mrf.mxu0 }
  0xc1   :  { %v872_v29 = vpop.f32.mrf.mxu1 }
  0xc2   :  { %v873_v32 = vadd.f32 %v872_v29, %v758_v23 }
  0xc3   :  { %v988_v38 = vpop.f32.mrf.mxu2  ;;  %797 = vmatmul.bf16.gmra.mxu0 %v6200_v21 }
  0xc4   :  { %v6211_v39 = vadd.f32 %v986_v11, %v873_v32  ;;  %911 = vmatmul.bf16.gmra.mxu1 %v6202_v27  ;;  %v5510_v11 = vld [vmem:[%s9704_s2 + $0x130] sm:$0xf0]  ;;  %v4862_v32 = vld [vmem:[%s9704_s2 + $0x120] sm:$0xf] }
  0xc5   :  { %v6246_v20 = vor.u32 %v5510_v11, %v4870_v5 }
  0xc7   :  { %9844 = vst [vmem:[#allocation2_spill] sm:$0xff] %v6246_v20 }
  0xc8   :  { %5147 = vmatmul.msk.bf16.gmra.mxu2 %vm675_vm0, %v6214_v40  ;;  %v760_v41 = vpop.f32.mrf.mxu0 }
  0xc9   :  { %v874_v44 = vpop.f32.mrf.mxu1 }
  0xca   :  { %v875_v45 = vadd.f32 %v874_v44, %v760_v41  ;;  %v5508_v44 = vld [vmem:[%s9704_s2 + $0x124] sm:$0xf] }
  0xcb   :  { %v991_v48 = vpop.f32.mrf.mxu2 }
  0xcc   :  { %v6224_v57 = vadd.f32 %v988_v38, %v875_v45  ;;  %v5509_v38 = vld [vmem:[%s9704_s2 + $0x128] sm:$0xf0]  ;;  %v4864_v45 = vld [vmem:[%s9704_s2 + $0x12c] sm:$0xf0] }
  0xcd   :  { %v6266_v54 = vor.u32 %v5508_v44, %v4864_v45  ;;  %v5511_v44 = vld [vmem:[%s9704_s2 + $0x13c] sm:$0xf]  ;;  %v4876_v45 = vld [vmem:[%s9704_s2 + $0x144] sm:$0xf0] }
  0xd0   :  { %v763_v63 = vpop.f32.mrf.mxu0 }
  0xd1   :  { %v877_v4 = vpop.f32.mrf.mxu1 }
  0xd2   :  { %v878_v12 = vadd.f32 %v877_v4, %v763_v63  ;;  %v5513_v63 = vld [vmem:[%s9704_s2 + $0x148] sm:$0xf0] }
  0xd3   :  { %v993_v14 = vpop.f32.mrf.mxu2  ;;  %802 = vmatmul.bf16.gmra.mxu0 %v6232_v60 }
  0xd4   :  { %v6243_v18 = vadd.f32 %v991_v48, %v878_v12  ;;  %916 = vmatmul.bf16.gmra.mxu1 %v6234_v3  ;;  %v6264_v48 = vor.u32 %v5509_v38, %v4862_v32  ;;  %v6278_v12 = vor.u32 %v5513_v63, %v4882_v59  ;;  %v4874_v32 = vld [vmem:[%s9704_s2 + $0x138] sm:$0xf]  ;;  %v6298_v59 = vor.u32 %v5511_v44, %v4876_v45 }
  0xd6   :  { %9847 = vst [vmem:[#allocation5_spill] sm:$0xff] %v6278_v12 }
  0xd7   :  { %9849 = vst [vmem:[#allocation7_spill] sm:$0xff] %v6298_v59 }
  0xd8   :  { %5148 = vmatmul.msk.bf16.gmra.mxu2 %vm675_vm0, %v6246_v20  ;;  %v765_v23 = vpop.f32.mrf.mxu0  ;;  %v4942_v20 = vld [vmem:[%s9704_s2 + $0x1b8] sm:$0xf] }
  0xd9   :  { %v879_v29 = vpop.f32.mrf.mxu1 }
  0xda   :  { %v880_v30 = vadd.f32 %v879_v29, %v765_v23 }
  0xdb   :  { %v996_v31 = vpop.f32.mrf.mxu2 }
  0xdc   :  { %v6256_v41 = vadd.f32 %v993_v14, %v880_v30 }
  0xde   :  { %9845 = vst [vmem:[#allocation3_spill] sm:$0xff] %v6256_v41  ;;  %v5528_v41 = vld [vmem:[%s9704_s2 + $0x1c0] sm:$0xf0] }
  0xe0   :  { %v768_v49 = vpop.f32.mrf.mxu0 }
  0xe1   :  { %v882_v58 = vpop.f32.mrf.mxu1 }
  0xe2   :  { %v883_v4 = vadd.f32 %v882_v58, %v768_v49 }
  0xe3   :  { %v998_v5 = vpop.f32.mrf.mxu2  ;;  %807 = vmatmul.bf16.gmra.mxu0 %v6264_v48 }
  0xe4   :  { %v6275_v11 = vadd.f32 %v996_v31, %v883_v4  ;;  %921 = vmatmul.bf16.gmra.mxu1 %v6266_v54  ;;  %v5512_v31 = vld [vmem:[%s9704_s2 + $0x140] sm:$0xf0]  ;;  %v4894_v4 = vld [vmem:[%s9704_s2 + $0x158] sm:$0xf] }
  0xe5   :  { %v6296_v49 = vor.u32 %v5512_v31, %v4874_v32 }
  0xe6   :  { %9846 = vst [vmem:[#allocation4_spill] sm:$0xff] %v6275_v11 }
  0xe8   :  { %5149 = vmatmul.msk.bf16.gmra.mxu2 %vm675_vm0, %v6278_v12  ;;  %v770_v14 = vpop.f32.mrf.mxu0 }
  0xe9   :  { %v884_v23 = vpop.f32.mrf.mxu1 }
  0xea   :  { %v885_v29 = vadd.f32 %v884_v23, %v770_v14 }
  0xeb   :  { %v1001_v30 = vpop.f32.mrf.mxu2 }
  0xec   :  { %v6288_v38 = vadd.f32 %v998_v5, %v885_v29  ;;  %v5516_v5 = vld [vmem:[%s9704_s2 + $0x160] sm:$0xf0] }
  0xed   :  { %v6310_v32 = vor.u32 %v5516_v5, %v4894_v4  ;;  %v5514_v4 = vld [vmem:[%s9704_s2 + $0x154] sm:$0xf]  ;;  %v4888_v5 = vld [vmem:[%s9704_s2 + $0x15c] sm:$0xf0] }
  0xee   :  { %9848 = vst [vmem:[#allocation6_spill] sm:$0xff] %v6288_v38 }
  0xef   :  { %9851 = vst [vmem:[#allocation9_spill] sm:$0xff] %v6310_v32 }
  0xf0   :  { %v773_v58 = vpop.f32.mrf.mxu0 }
  0xf1   :  { %v887_v63 = vpop.f32.mrf.mxu1 }
  0xf2   :  { %v888_v14 = vadd.f32 %v887_v63, %v773_v58  ;;  %v4886_v58 = vld [vmem:[%s9704_s2 + $0x150] sm:$0xf] }
  0xf3   :  { %v1003_v23 = vpop.f32.mrf.mxu2  ;;  %812 = vmatmul.bf16.gmra.mxu0 %v6296_v49 }
  0xf4   :  { %v6307_v29 = vadd.f32 %v1001_v30, %v888_v14  ;;  %926 = vmatmul.bf16.gmra.mxu1 %v6298_v59  ;;  %v5515_v30 = vld [vmem:[%s9704_s2 + $0x158] sm:$0xf0] }
  0xf5   :  { %v6328_v14 = vor.u32 %v5515_v30, %v4886_v58 }
  0xf6   :  { %9850 = vst [vmem:[#allocation8_spill] sm:$0xff] %v6307_v29  ;;  %v4906_v29 = vld [vmem:[%s9704_s2 + $0x170] sm:$0xf] }
  0xf8   :  { %5150 = vmatmul.msk.bf16.gmra.mxu2 %vm675_vm0, %v6310_v32  ;;  %v775_v31 = vpop.f32.mrf.mxu0 }
  0xf9   :  { %v889_v44 = vpop.f32.mrf.mxu1 }
  0xfa   :  { %v890_v45 = vadd.f32 %v889_v44, %v775_v31  ;;  %v6330_v44 = vor.u32 %v5514_v4, %v4888_v5 }
  0xfb   :  { %v1006_v12 = vpop.f32.mrf.mxu2 }
  0xfc   :  { %v6320_v63 = vadd.f32 %v1003_v23, %v890_v45  ;;  %9853 = vst [vmem:[#allocation11_spill] sm:$0xff] %v6330_v44  ;;  %v5519_v23 = vld [vmem:[%s9704_s2 + $0x178] sm:$0xf0] }
  0xfd   :  { %v6342_v58 = vor.u32 %v5519_v23, %v4906_v29  ;;  %v5517_v29 = vld [vmem:[%s9704_s2 + $0x16c] sm:$0xf]  ;;  %v4900_v23 = vld [vmem:[%s9704_s2 + $0x174] sm:$0xf0] }
  0xfe   :  { %9852 = vst [vmem:[#allocation10_spill] sm:$0xff] %v6320_v63 }
  0xff   :  { %9855 = vst [vmem:[#allocation13_spill] sm:$0xff] %v6342_v58 }
 0x100   :  { %v778_v31 = vpop.f32.mrf.mxu0 }
 0x101   :  { %v892_v32 = vpop.f32.mrf.mxu1 }
 0x102   :  { %v893_v45 = vadd.f32 %v892_v32, %v778_v31  ;;  %v4898_v32 = vld [vmem:[%s9704_s2 + $0x168] sm:$0xf] }
 0x103   :  { %v1008_v63 = vpop.f32.mrf.mxu2  ;;  %817 = vmatmul.bf16.gmra.mxu0 %v6328_v14 }
 0x104   :  { %v6339_v38 = vadd.f32 %v1006_v12, %v893_v45  ;;  %931 = vmatmul.bf16.gmra.mxu1 %v6330_v44  ;;  %v5518_v12 = vld [vmem:[%s9704_s2 + $0x170] sm:$0xf0] }
 0x105   :  { %v6360_v45 = vor.u32 %v5518_v12, %v4898_v32 }
 0x106   :  { %9854 = vst [vmem:[#allocation12_spill] sm:$0xff] %v6339_v38  ;;  %v4918_v38 = vld [vmem:[%s9704_s2 + $0x188] sm:$0xf] }
 0x107   :  { %9857 = vst [vmem:[#allocation15_spill] sm:$0xff] %v6360_v45 }
 0x108   :  { %5151 = vmatmul.msk.bf16.gmra.mxu2 %vm675_vm0, %v6342_v58  ;;  %v780_v30 = vpop.f32.mrf.mxu0 }
 0x109   :  { %v894_v4 = vpop.f32.mrf.mxu1 }
 0x10a   :  { %v895_v5 = vadd.f32 %v894_v4, %v780_v30  ;;  %v6362_v4 = vor.u32 %v5517_v29, %v4900_v23 }
 0x10b   :  { %v1011_v59 = vpop.f32.mrf.mxu2 }
 0x10c   :  { %v6352_v31 = vadd.f32 %v1008_v63, %v895_v5  ;;  %9858 = vst [vmem:[#allocation16_spill] sm:$0xff] %v6362_v4  ;;  %v5522_v63 = vld [vmem:[%s9704_s2 + $0x190] sm:$0xf0] }
 0x10d   :  { %v6374_v32 = vor.u32 %v5522_v63, %v4918_v38  ;;  %v5520_v38 = vld [vmem:[%s9704_s2 + $0x184] sm:$0xf]  ;;  %v4912_v63 = vld [vmem:[%s9704_s2 + $0x18c] sm:$0xf0] }
 0x10e   :  { %9856 = vst [vmem:[#allocation14_spill] sm:$0xff] %v6352_v31 }
 0x10f   :  { %9860 = vst [vmem:[#allocation18_spill] sm:$0xff] %v6374_v32 }
 0x110   :  { %v783_v30 = vpop.f32.mrf.mxu0 }
 0x111   :  { %v897_v58 = vpop.f32.mrf.mxu1 }
 0x112   :  { %v898_v5 = vadd.f32 %v897_v58, %v783_v30  ;;  %v4910_v58 = vld [vmem:[%s9704_s2 + $0x180] sm:$0xf] }
 0x113   :  { %v1013_v31 = vpop.f32.mrf.mxu2  ;;  %822 = vmatmul.bf16.gmra.mxu0 %v6360_v45 }
 0x114   :  { %v6371_v44 = vadd.f32 %v1011_v59, %v898_v5  ;;  %936 = vmatmul.bf16.gmra.mxu1 %v6362_v4  ;;  %v5521_v59 = vld [vmem:[%s9704_s2 + $0x188] sm:$0xf0] }
 0x115   :  { %v6392_v5 = vor.u32 %v5521_v59, %v4910_v58  ;;  %v5028_v58 = vld [vmem:[%s9703_s0 + $0x78] sm:$0xf0] }
 0x116   :  { %9859 = vst [vmem:[#allocation17_spill] sm:$0xff] %v6371_v44  ;;  %v4930_v44 = vld [vmem:[%s9704_s2 + $0x1a0] sm:$0xf] }
 0x117   :  { %9862 = vst [vmem:[#allocation20_spill] sm:$0xff] %v6392_v5 }
 0x118   :  { %5152 = vmatmul.msk.bf16.gmra.mxu2 %vm675_vm0, %v6374_v32  ;;  %v785_v12 = vpop.f32.mrf.mxu0 }
 0x119   :  { %v899_v29 = vpop.f32.mrf.mxu1 }
 0x11a   :  { %v900_v23 = vadd.f32 %v899_v29, %v785_v12  ;;  %v6394_v29 = vor.u32 %v5520_v38, %v4912_v63 }
 0x11b   :  { %v1016_v11 = vpop.f32.mrf.mxu2 }
 0x11c   :  { %v6384_v30 = vadd.f32 %v1013_v31, %v900_v23  ;;  %9863 = vst [vmem:[#allocation21_spill] sm:$0xff] %v6394_v29  ;;  %v5525_v31 = vld [vmem:[%s9704_s2 + $0x1a8] sm:$0xf0] }
 0x11d   :  { %v6412_v4 = vor.u32 %v5525_v31, %v4930_v44 }
 0x11e   :  { %9861 = vst [vmem:[#allocation19_spill] sm:$0xff] %v6384_v30  ;;  %v5549_v30 = vld [vmem:[%s9703_s0 + $0x74] sm:$0xf] }
 0x11f   :  { %v5031_v38 = vor.u32 %v5549_v30, %v5028_v58  ;;  %9865 = vst [vmem:[#allocation23_spill] sm:$0xff] %v6412_v4 }
 0x120   :  { %v788_v12 = vpop.f32.mrf.mxu0 }
 0x121   :  { %v902_v32 = vpop.f32.mrf.mxu1  ;;  %1081 = vmatpush.bf16.msra.mxu3 %v5031_v38  ;;  %v5545_v38 = vld [vmem:[%s9703_s0 + $0x54] sm:$0xf] }
 0x122   :  { %v903_v23 = vadd.f32 %v902_v32, %v788_v12  ;;  %v5547_v32 = vld [vmem:[%s9703_s0 + $0x64] sm:$0xf]  ;;  %v5020_v12 = vld [vmem:[%s9703_s0 + $0x68] sm:$0xf0] }
 0x123   :  { %v1018_v59 = vpop.f32.mrf.mxu2  ;;  %827 = vmatmul.bf16.gmra.mxu0 %v6392_v5  ;;  %v5565_v5 = vld [vmem:[%s9703_s0 + $0xf4] sm:$0xf]  ;;  %v5023_v30 = vor.u32 %v5547_v32, %v5020_v12  ;;  %v5012_v32 = vld [vmem:[%s9703_s0 + $0x58] sm:$0xf0]  ;;  %v5563_v12 = vld [vmem:[%s9703_s0 + $0xe4] sm:$0xf] }
 0x124   :  { %v6409_v63 = vadd.f32 %v1016_v11, %v903_v23  ;;  %941 = vmatmul.bf16.gmra.mxu1 %v6394_v29  ;;  %v5092_v11 = vld [vmem:[%s9703_s0 + $0xf8] sm:$0xf0] }
 0x125   :  { %v5095_v31 = vor.u32 %v5565_v5, %v5092_v11  ;;  %1082 = vmatpush.bf16.msra.mxu3 %v5023_v30  ;;  %v5084_v5 = vld [vmem:[%s9703_s0 + $0xe8] sm:$0xf0]  ;;  %v4922_v30 = vld [vmem:[%s9704_s2 + $0x198] sm:$0xf]  ;;  %v5524_v11 = vld [vmem:[%s9704_s2 + $0x1a0] sm:$0xf0] }
 0x126   :  { %9864 = vst [vmem:[#allocation22_spill] sm:$0xff] %v6409_v63 }
 0x127   :  { %1195 = vmatpush.bf16.msrb.mxu2 %v5095_v31 }
 0x128   :  { %5153 = vmatmul.msk.bf16.gmra.mxu2 %vm675_vm0, %v6412_v4  ;;  %v790_v44 = vpop.f32.mrf.mxu0  ;;  %v5015_v4 = vor.u32 %v5545_v38, %v5012_v32  ;;  %v4924_v38 = vld [vmem:[%s9704_s2 + $0x1a4] sm:$0xf0]  ;;  %v5543_v32 = vld [vmem:[%s9703_s0 + $0x44] sm:$0xf] }
 0x129   :  { %v904_v23 = vpop.f32.mrf.mxu1 }
 0x12a   :  { %v905_v58 = vadd.f32 %v904_v23, %v790_v44  ;;  %v5087_v44 = vor.u32 %v5563_v12, %v5084_v5  ;;  %v5523_v23 = vld [vmem:[%s9704_s2 + $0x19c] sm:$0xf]  ;;  %1083 = vmatpush.bf16.msra.mxu3 %v5015_v4  ;;  %v5004_v12 = vld [vmem:[%s9703_s0 + $0x48] sm:$0xf0] }
 0x12b   :  { %v1021_v63 = vpop.f32.mrf.mxu2  ;;  %v5007_v5 = vor.u32 %v5543_v32, %v5004_v12  ;;  %v5076_v4 = vld [vmem:[%s9703_s0 + $0xd8] sm:$0xf0]  ;;  %v5559_v12 = vld [vmem:[%s9703_s0 + $0xc4] sm:$0xf] }
 0x12c   :  { %v6446_v31 = vadd.f32 %v1018_v59, %v905_v58  ;;  %1196 = vmatpush.bf16.msrb.mxu2 %v5087_v44  ;;  %v5561_v59 = vld [vmem:[%s9703_s0 + $0xd4] sm:$0xf]  ;;  %v6463_v58 = vor.u32 %v5524_v11, %v4922_v30 }
 0x12d   :  { %v5079_v29 = vor.u32 %v5561_v59, %v5076_v4  ;;  %v5541_v11 = vld [vmem:[%s9703_s0 + $0x34] sm:$0xf]  ;;  %v6492_v59 = vor.u32 %v5528_v41, %v4942_v20  ;;  %v5539_v4 = vld [vmem:[%s9703_s0 + $0x24] sm:$0xf]  ;;  %v5060_v20 = vld [vmem:[%s9703_s0 + $0xb8] sm:$0xf0] }
 0x12e   :  { %9866 = vst [vmem:[#allocation24_spill] sm:$0xff] %v6446_v31  ;;  %v6468_v31 = vor.u32 %v5523_v23, %v4924_v38  ;;  %1084 = vmatpush.bf16.msra.mxu3 %v5007_v5  ;;  %v4996_v23 = vld [vmem:[%s9703_s0 + $0x38] sm:$0xf0] }
 0x12f   :  { %9867 = vst [vmem:[#allocation25_spill] sm:$0xff] %v6463_v58  ;;  %v4999_v32 = vor.u32 %v5541_v11, %v4996_v23 }
 0x130   :  { %v793_v44 = vpop.f32.mrf.mxu0  ;;  %9868 = vst [vmem:[#allocation26_spill] sm:$0xff] %v6468_v31  ;;  %1197 = vmatpush.bf16.msrb.mxu2 %v5079_v29 }
 0x131   :  { %v907_v45 = vpop.f32.mrf.mxu1  ;;  %9870 = vst [vmem:[#allocation28_spill] sm:$0xff] %v6492_v59 }
 0x132   :  { %v908_v30 = vadd.f32 %v907_v45, %v793_v44  ;;  %v5068_v45 = vld [vmem:[%s9703_s0 + $0xc8] sm:$0xf0]  ;;  %1085 = vmatpush.bf16.msra.mxu3 %v4999_v32 }
 0x133   :  { %v1023_v38 = vpop.f32.mrf.mxu2  ;;  %832 = vmatmul.bf16.gmra.mxu0 %v6463_v58  ;;  %v5071_v5 = vor.u32 %v5559_v12, %v5068_v45  ;;  %v4988_v44 = vld [vmem:[%s9703_s0 + $0x28] sm:$0xf0]  ;;  %v5537_v12 = vld [vmem:[%s9703_s0 + $0x14] sm:$0xf]  ;;  %v4980_v45 = vld [vmem:[%s9703_s0 + $0x18] sm:$0xf0] }
 0x134   :  { %v6489_v29 = vadd.f32 %v1021_v63, %v908_v30  ;;  %946 = vmatmul.bf16.gmra.mxu1 %v6468_v31  ;;  %v5557_v63 = vld [vmem:[%s9703_s0 + $0xb4] sm:$0xf]  ;;  %v4991_v30 = vor.u32 %v5539_v4, %v4988_v44  ;;  %v5575_v44 = vld [vmem:[%s9703_s0 + $0x144] sm:$0xf]  ;;  %v5531_v58 = vld [vmem:[%s9704_s2 + $0x1d8] sm:$0xf0] }
 0x135   :  { %1198 = vmatpush.bf16.msrb.mxu2 %v5071_v5  ;;  %v5063_v11 = vor.u32 %v5557_v63, %v5060_v20  ;;  %v5555_v5 = vld [vmem:[%s9703_s0 + $0xa4] sm:$0xf]  ;;  %v5132_v63 = vld [vmem:[%s9703_s0 + $0x148] sm:$0xf0] }
 0x136   :  { %9869 = vst [vmem:[#allocation27_spill] sm:$0xff] %v6489_v29  ;;  %1086 = vmatpush.bf16.msra.mxu3 %v4991_v30  ;;  %v4983_v30 = vor.u32 %v5537_v12, %v4980_v45  ;;  %v5052_v20 = vld [vmem:[%s9703_s0 + $0xa8] sm:$0xf0]  ;;  %v5526_v12 = vld [vmem:[%s9704_s2 + $0x1b4] sm:$0xf] }
 0x137   :  { %v4936_v45 = vld [vmem:[%s9704_s2 + $0x1bc] sm:$0xf0]  ;;  %v5535_v31 = vld [vmem:[%s9703_s0 + $0x4] sm:$0xf] }
 0x138   :  { %5154 = vmatmul.msk.bf16.gmra.mxu2 %vm675_vm0, %v6492_v59  ;;  %v795_v41 = vpop.f32.mrf.mxu0  ;;  %v5055_v59 = vor.u32 %v5555_v5, %v5052_v20 }
 0x139   :  { %v909_v23 = vpop.f32.mrf.mxu1  ;;  %1199 = vmatpush.bf16.msrb.mxu2 %v5063_v11  ;;  %v5527_v11 = vld [vmem:[%s9704_s2 + $0x1b8] sm:$0xf0] }
 0x13a   :  { %v910_v32 = vadd.f32 %v909_v23, %v795_v41  ;;  %v4934_v41 = vld [vmem:[%s9704_s2 + $0x1b0] sm:$0xf]  ;;  %v5135_v23 = vor.u32 %v5575_v44, %v5132_v63  ;;  %1087 = vmatpush.bf16.msra.mxu3 %v4983_v30  ;;  %v5044_v63 = vld [vmem:[%s9703_s0 + $0x98] sm:$0xf0]  ;;  %v6554_v30 = vor.u32 %v5526_v12, %v4936_v45 }
 0x13b   :  { %v1026_v4 = vpop.f32.mrf.mxu2  ;;  %v6549_v5 = vor.u32 %v5527_v11, %v4934_v41  ;;  %v5036_v11 = vld [vmem:[%s9703_s0 + $0x88] sm:$0xf0] }
 0x13c   :  { %v6532_v29 = vadd.f32 %v1023_v38, %v910_v32  ;;  %1312 = vmatpush.bf16.msrb.mxu0 %v5135_v23  ;;  %v4972_v38 = vld [vmem:[%s9703_s0 + $0x8] sm:$0xf0]  ;;  %v5553_v32 = vld [vmem:[%s9703_s0 + $0x94] sm:$0xf]  ;;  %9872 = vst [vmem:[#allocation30_spill] sm:$0xff] %v6554_v30 }
 0x13d   :  { %1200 = vmatpush.bf16.msrb.mxu2 %v5055_v59  ;;  %v4975_v44 = vor.u32 %v5535_v31, %v4972_v38  ;;  %v5047_v20 = vor.u32 %v5553_v32, %v5044_v63  ;;  %v5551_v31 = vld [vmem:[%s9703_s0 + $0x84] sm:$0xf]  ;;  %v5573_v38 = vld [vmem:[%s9703_s0 + $0x134] sm:$0xf]  ;;  %v5124_v32 = vld [vmem:[%s9703_s0 + $0x138] sm:$0xf0] }
 0x13e   :  { %9871 = vst [vmem:[#allocation29_spill] sm:$0xff] %v6532_v29  ;;  %v4954_v29 = vld [vmem:[%s9704_s2 + $0x1d0] sm:$0xf]  ;;  %v5039_v45 = vor.u32 %v5551_v31, %v5036_v11  ;;  %v5569_v11 = vld [vmem:[%s9703_s0 + $0x114] sm:$0xf] }
 0x13f   :  { %1088 = vmatpush.bf16.msra.mxu3 %v4975_v44  ;;  %v6578_v63 = vor.u32 %v5531_v58, %v4954_v29  ;;  %v2883_v58 = vld [vmem:[%s9705_s4 + $0xf8] sm:$0xff] }
 0x140   :  { %v798_v59 = vpop.f32.mrf.mxu0 }
 0x141   :  { %v912_v23 = vpop.f32.mrf.mxu1  ;;  %1201 = vmatpush.bf16.msrb.mxu2 %v5047_v20  ;;  %9874 = vst [vmem:[#allocation32_spill] sm:$0xff] %v6578_v63  ;;  %v5728_v20 = vmov 0  }
 0x142   :  { %v913_v41 = vadd.f32 %v912_v23, %v798_v59  ;;  %1089 = vmatmul.bf16.vlgmr.msra.gmra.mxu3 %v5912_v6  ;;  %v5127_v59 = vor.u32 %v5573_v38, %v5124_v32  ;;  %5642 = vset.pattern.permute.xlu2 %v5728_v20  ;;  %v5571_v23 = vld [vmem:[%s9703_s0 + $0x124] sm:$0xf] }
 0x143   :  { %v1028_v12 = vpop.f32.mrf.mxu2  ;;  %837 = vmatmul.bf16.gmra.mxu0 %v6549_v5  ;;  %5641 = vset.pattern.permute.xlu0 %v5728_v20 }
 0x144   :  { %v6575_v44 = vadd.f32 %v1026_v4, %v913_v41  ;;  %951 = vmatmul.bf16.gmra.mxu1 %v6554_v30  ;;  %1313 = vmatpush.bf16.msrb.mxu0 %v5127_v59  ;;  %v5116_v4 = vld [vmem:[%s9703_s0 + $0x128] sm:$0xf0]  ;;  %v2882_v59 = vld [vmem:[%s9705_s4 + $0xf0] sm:$0xff] }
 0x145   :  { %1202 = vmatpush.bf16.msrb.mxu2 %v5039_v45  ;;  %v5119_v41 = vor.u32 %v5571_v23, %v5116_v4  ;;  %5643 = vset.pattern.permute.xlu1 %v5728_v20  ;;  %v5108_v45 = vld [vmem:[%s9703_s0 + $0x118] sm:$0xf0]  ;;  %v4946_v20 = vld [vmem:[%s9704_s2 + $0x1c8] sm:$0xf]  ;;  %v5530_v23 = vld [vmem:[%s9704_s2 + $0x1d0] sm:$0xf0] }
 0x146   :  { %9873 = vst [vmem:[#allocation31_spill] sm:$0xff] %v6575_v44  ;;  %3051 = vperm.xlu2 %5642, %v2883_v58   ;;  %v5111_v32 = vor.u32 %v5569_v11, %v5108_v45  ;;  %3046 = vperm.xlu0 %5641, %v2882_v59   ;;  %v2880_v58 = vld [vmem:[%s9705_s4 + $0xe0] sm:$0xff] }
 0x148   :  { %5155 = vmatmul.msk.bf16.gmra.mxu2 %vm675_vm0, %v6578_v63  ;;  %v800_v6 = vpop.f32.mrf.mxu0  ;;  %1314 = vmatpush.bf16.msrb.mxu0 %v5119_v41  ;;  %v5529_v41 = vld [vmem:[%s9704_s2 + $0x1cc] sm:$0xf] }
 0x149   :  { %v914_v29 = vpop.f32.mrf.mxu1 }
 0x14a   :  { %v915_v31 = vadd.f32 %v914_v29, %v800_v6  ;;  %v4948_v6 = vld [vmem:[%s9704_s2 + $0x1d4] sm:$0xf0]  ;;  %v5567_v29 = vld [vmem:[%s9703_s0 + $0x104] sm:$0xf] }
 0x14b   :  { %v1031_v38 = vpop.f32.mrf.mxu2  ;;  %v6626_v59 = vor.u32 %v5529_v41, %v4948_v6  ;;  %v2867_v41 = vld [vmem:[%s9705_s4 + $0x78] sm:$0xff] }
 0x14c   :  { %v6607_v4 = vadd.f32 %v1028_v12, %v915_v31  ;;  %1315 = vmatpush.bf16.msrb.mxu0 %v5111_v32  ;;  %v5100_v12 = vld [vmem:[%s9703_s0 + $0x108] sm:$0xf0]  ;;  %v6624_v31 = vor.u32 %v5530_v23, %v4946_v20  ;;  %v4966_v32 = vld [vmem:[%s9704_s2 + $0x1e8] sm:$0xf] }
 0x14d   :  { %v5103_v11 = vor.u32 %v5567_v29, %v5100_v12  ;;  %v5533_v29 = vld [vmem:[%s9704_s2 + $0x1e8] sm:$0xf0] }
 0x14e   :  { %9875 = vst [vmem:[#allocation33_spill] sm:$0xff] %v6607_v4  ;;  %v5534_v4 = vld [vmem:[%s9704_s2 + $0x1f0] sm:$0xf0]  ;;  %3036 = vperm.xlu2 %5642, %v2880_v58   ;;  %2971 = vperm.xlu0 %5641, %v2867_v41   ;;  %v4958_v58 = vld [vmem:[%s9704_s2 + $0x1e0] sm:$0xf] }
 0x14f   :  { %v6638_v23 = vor.u32 %v5534_v4, %v4966_v32  ;;  %v2879_v32 = vld [vmem:[%s9705_s4 + $0xd8] sm:$0xff]  ;;  %v6669_v41 = vor.u32 %v5533_v29, %v4958_v58 }
 0x150   :  { %v803_v45 = vpop.f32.mrf.mxu0  ;;  %1316 = vmatpush.bf16.msrb.mxu0 %v5103_v11  ;;  %v5532_v11 = vld [vmem:[%s9704_s2 + $0x1e4] sm:$0xf]  ;;  %v2863_v29 = vld [vmem:[%s9705_s4 + $0x58] sm:$0xff] }
 0x151   :  { %v917_v63 = vpop.f32.mrf.mxu1  ;;  %9876 = vst [vmem:[#allocation34_spill] sm:$0xff] %v6638_v23 }
 0x152   :  { %v918_v44 = vadd.f32 %v917_v63, %v803_v45  ;;  %1094 = vmatmul.bf16.gmra.mxu3 %v5940_v15  ;;  %v2878_v15 = vld [vmem:[%s9705_s4 + $0xd0] sm:$0xff] }
 0x153   :  { %v1033_v30 = vpop.f32.mrf.mxu2  ;;  %842 = vmatmul.bf16.gmra.mxu0 %v6624_v31  ;;  %v4960_v45 = vld [vmem:[%s9704_s2 + $0x1ec] sm:$0xf0] }
 0x154   :  { %v6635_v20 = vadd.f32 %v1031_v38, %v918_v44  ;;  %956 = vmatmul.bf16.gmra.mxu1 %v6626_v59  ;;  %v2864_v44 = vld [vmem:[%s9705_s4 + $0x60] sm:$0xff] }
 0x156   :  { %2956 = vperm.xlu2 %5642, %v2864_v44   ;;  %3026 = vperm.xlu0 %5641, %v2878_v15   ;;  %v6671_v44 = vor.u32 %v5532_v11, %v4960_v45  ;;  %v2862_v15 = vld [vmem:[%s9705_s4 + $0x50] sm:$0xff] }
 0x158   :  { %5156 = vmatmul.msk.bf16.gmra.mxu2 %vm675_vm0, %v6638_v23  ;;  %v805_v63 = vpop.f32.mrf.mxu0 }
 0x159   :  { %v919_v38 = vpop.f32.mrf.mxu1 }
 0x15a   :  { %v920_v6 = vadd.f32 %v919_v38, %v805_v63 }
 0x15b   :  { %v1036_v4 = vpop.f32.mrf.mxu2 }
 0x15c   :  { %v6658_v12 = vadd.f32 %v1033_v30, %v920_v6 }
 0x15e   :  { %3031 = vperm.xlu2 %5642, %v2879_v32   ;;  %2946 = vperm.xlu0 %5641, %v2862_v15   ;;  %v2866_v32 = vld [vmem:[%s9705_s4 + $0x70] sm:$0xff] }
 0x15f   :  { %2966 = vperm.xlu1 %5643, %v2866_v32   ;;  %v2872_v32 = vld [vmem:[%s9705_s4 + $0xa0] sm:$0xff] }
 0x160   :  { %v808_v63 = vpop.f32.mrf.mxu0 }
 0x161   :  { %v922_v30 = vpop.f32.mrf.mxu1 }
 0x162   :  { %v923_v38 = vadd.f32 %v922_v30, %v808_v63  ;;  %1099 = vmatmul.bf16.gmra.mxu3 %v5968_v24  ;;  %v2877_v24 = vld [vmem:[%s9705_s4 + $0xc8] sm:$0xff] }
 0x163   :  { %v1038_v6 = vpop.f32.mrf.mxu2  ;;  %847 = vmatmul.bf16.gmra.mxu0 %v6669_v41 }
 0x164   :  { %v6674_v23 = vadd.f32 %v1036_v4, %v923_v38  ;;  %961 = vmatmul.bf16.gmra.mxu1 %v6671_v44 }
 0x166   :  { %2951 = vperm.xlu2 %5642, %v2863_v29   ;;  %3021 = vperm.xlu0 %5641, %v2877_v24  }
 0x168   :  { %1203 = vmatmul.bf16.vlgmr.msrb.gmra.mxu2 %v5914_v7  ;;  %v810_v58 = vpop.f32.mrf.mxu0  ;;  %v2874_v7 = vld [vmem:[%s9705_s4 + $0xb0] sm:$0xff] }
 0x169   :  { %v924_v11 = vpop.f32.mrf.mxu1 }
 0x16a   :  { %v925_v4 = vadd.f32 %v924_v11, %v810_v58  ;;  %v2881_v11 = vld [vmem:[%s9705_s4 + $0xe8] sm:$0xff] }
 0x16b   :  { %v1041_v45 = vpop.f32.mrf.mxu2  ;;  %3041 = vperm.xlu1 %5643, %v2881_v11  }
 0x16c   :  { %v6691_v63 = vadd.f32 %v1038_v6, %v925_v4  ;;  %v2861_v6 = vld [vmem:[%s9705_s4 + $0x48] sm:$0xff] }
 0x16e   :  { %3006 = vperm.xlu2 %5642, %v2874_v7   ;;  %2941 = vperm.xlu0 %5641, %v2861_v6   ;;  %v2865_v7 = vld [vmem:[%s9705_s4 + $0x68] sm:$0xff] }
 0x170   :  { %v813_v30 = vpop.f32.mrf.mxu0 }
 0x171   :  { %v927_v38 = vpop.f32.mrf.mxu1 }
 0x172   :  { %v928_v15 = vadd.f32 %v927_v38, %v813_v30  ;;  %1104 = vmatmul.bf16.gmra.mxu3 %v5996_v33 }
 0x173   :  { %v1043_v58 = vpop.f32.mrf.mxu2  ;;  %5157 = vmatmul.msk.bf16.vlgmr.msrb.gmra.mxu0 %vm675_vm0, %v5872_v51  ;;  %v2858_v51 = vld [vmem:[%s9705_s4 + $0x30] sm:$0xff]  ;;  %2961 = vperm.xlu1 %5643, %v2865_v7  }
 0x174   :  { %v6698_v29 = vadd.f32 %v1041_v45, %v928_v15 }
 0x176   :  { %2926 = vperm.xlu2 %5642, %v2858_v51   ;;  %2996 = vperm.xlu0 %5641, %v2872_v32   ;;  %v2876_v51 = vld [vmem:[%s9705_s4 + $0xc0] sm:$0xff] }
 0x177   :  { %v2860_v32 = vld [vmem:[%s9705_s4 + $0x40] sm:$0xff] }
 0x178   :  { %1208 = vmatmul.bf16.gmra.mxu2 %v5942_v16  ;;  %v815_v4 = vpop.f32.mrf.mxu0  ;;  %v2873_v16 = vld [vmem:[%s9705_s4 + $0xa8] sm:$0xff] }
 0x179   :  { %v929_v45 = vpop.f32.mrf.mxu1 }
 0x17a   :  { %v930_v33 = vadd.f32 %v929_v45, %v815_v4 }
 0x17b   :  { %v1046_v24 = vpop.f32.mrf.mxu2  ;;  %3016 = vperm.xlu1 %5643, %v2876_v51  }
 0x17c   :  { %v6717_v30 = vadd.f32 %v1043_v58, %v930_v33  ;;  %v2856_v58 = vld [vmem:[%s9705_s4 + $0x20] sm:$0xff] }
 0x17e   :  { %3001 = vperm.xlu2 %5642, %v2873_v16   ;;  %2916 = vperm.xlu0 %5641, %v2856_v58   ;;  %v2875_v58 = vld [vmem:[%s9705_s4 + $0xb8] sm:$0xff] }
 0x180   :  { %v818_v38 = vpop.f32.mrf.mxu0 }
 0x181   :  { %v932_v15 = vpop.f32.mrf.mxu1 }
 0x182   :  { %v933_v6 = vadd.f32 %v932_v15, %v818_v38  ;;  %1109 = vmatmul.bf16.gmra.mxu3 %v6024_v42 }
 0x183   :  { %v1048_v11 = vpop.f32.mrf.mxu2  ;;  %5158 = vmatmul.msk.bf16.gmra.mxu0 %vm675_vm0, %v5924_v10  ;;  %v2857_v10 = vld [vmem:[%s9705_s4 + $0x28] sm:$0xff]  ;;  %2936 = vperm.xlu1 %5643, %v2860_v32  }
 0x184   :  { %v6724_v4 = vadd.f32 %v1046_v24, %v933_v6 }
 0x186   :  { %2921 = vperm.xlu2 %5642, %v2857_v10  }
 0x188   :  { %1213 = vmatmul.bf16.gmra.mxu2 %v5970_v25  ;;  %v820_v45 = vpop.f32.mrf.mxu0 }
 0x189   :  { %v934_v33 = vpop.f32.mrf.mxu1 }
 0x18a   :  { %v935_v42 = vadd.f32 %v934_v33, %v820_v45  ;;  %v2859_v33 = vld [vmem:[%s9705_s4 + $0x38] sm:$0xff] }
 0x18b   :  { %v1051_v24 = vpop.f32.mrf.mxu2  ;;  %3011 = vperm.xlu1 %5643, %v2875_v58  }
 0x18c   :  { %v6740_v7 = vadd.f32 %v1048_v11, %v935_v42 }
 0x190   :  { %v823_v16 = vpop.f32.mrf.mxu0 }
 0x191   :  { %v937_v38 = vpop.f32.mrf.mxu1 }
 0x192   :  { %v938_v15 = vadd.f32 %v937_v38, %v823_v16  ;;  %1114 = vmatmul.bf16.gmra.mxu3 %v6052_v52 }
 0x193   :  { %v1053_v25 = vpop.f32.mrf.mxu2  ;;  %5159 = vmatmul.msk.bf16.gmra.mxu0 %vm675_vm0, %v5952_v19  ;;  %2931 = vperm.xlu1 %5643, %v2859_v33  }
 0x194   :  { %v6744_v6 = vadd.f32 %v1051_v24, %v938_v15 }
 0x198   :  { %1218 = vmatmul.bf16.gmra.mxu2 %v5998_v34  ;;  %v825_v11 = vpop.f32.mrf.mxu0 }
 0x199   :  { %v939_v51 = vpop.f32.mrf.mxu1 }
 0x19a   :  { %v940_v45 = vadd.f32 %v939_v51, %v825_v11 }
 0x19b   :  { %v1056_v10 = vpop.f32.mrf.mxu2 }
 0x19c   :  { %v6754_v19 = vadd.f32 %v1053_v25, %v940_v45 }
 0x1a0   :  { %v828_v42 = vpop.f32.mrf.mxu0 }
 0x1a1   :  { %v942_v52 = vpop.f32.mrf.mxu1 }
 0x1a2   :  { %v943_v24 = vadd.f32 %v942_v52, %v828_v42  ;;  %1119 = vmatmul.bf16.gmra.mxu3 %v6080_v61 }
 0x1a3   :  { %v1058_v32 = vpop.f32.mrf.mxu2  ;;  %5160 = vmatmul.msk.bf16.gmra.mxu0 %vm675_vm0, %v5980_v28 }
 0x1a4   :  { %v6758_v16 = vadd.f32 %v1056_v10, %v943_v24 }
 0x1a6   :  { %9877 = vst [vmem:[#allocation35_spill] sm:$0xff] %v6758_v16 }
 0x1a8   :  { %1223 = vmatmul.bf16.gmra.mxu2 %v6026_v43  ;;  %v830_v34 = vpop.f32.mrf.mxu0 }
 0x1a9   :  { %v944_v38 = vpop.f32.mrf.mxu1 }
 0x1aa   :  { %v945_v15 = vadd.f32 %v944_v38, %v830_v34 }
 0x1ab   :  { %v1061_v58 = vpop.f32.mrf.mxu2 }
 0x1ac   :  { %v6762_v25 = vadd.f32 %v1058_v32, %v945_v15 }
 0x1ae   :  { %9878 = vst [vmem:[#allocation36_spill] sm:$0xff] %v6762_v25  ;;  %v9911_v25 = vld [vmem:[#allocation10_spill] sm:$0xff] }
 0x1b0   :  { %v833_v11 = vpop.f32.mrf.mxu0 }
 0x1b1   :  { %v947_v51 = vpop.f32.mrf.mxu1 }
 0x1b2   :  { %v948_v45 = vadd.f32 %v947_v51, %v833_v11  ;;  %1124 = vmatmul.bf16.gmra.mxu3 %v6108_v8 }
 0x1b3   :  { %v1063_v33 = vpop.f32.mrf.mxu2  ;;  %5161 = vmatmul.msk.bf16.gmra.mxu0 %vm675_vm0, %v6008_v37 }
 0x1b4   :  { %v6766_v28 = vadd.f32 %v1061_v58, %v948_v45 }
 0x1b6   :  { %9879 = vst [vmem:[#allocation37_spill] sm:$0xff] %v6766_v28 }
 0x1b8   :  { %1228 = vmatmul.bf16.gmra.mxu2 %v6054_v53  ;;  %v835_v43 = vpop.f32.mrf.mxu0 }
 0x1b9   :  { %v949_v61 = vpop.f32.mrf.mxu1 }
 0x1ba   :  { %v950_v10 = vadd.f32 %v949_v61, %v835_v43 }
 0x1bb   :  { %v1066_v42 = vpop.f32.mrf.mxu2 }
 0x1bc   :  { %v6770_v52 = vadd.f32 %v1063_v33, %v950_v10 }
 0x1be   :  { %9880 = vst [vmem:[#allocation38_spill] sm:$0xff] %v6770_v52 }
 0x1c0   :  { %v838_v24 = vpop.f32.mrf.mxu0 }
 0x1c1   :  { %v952_v32 = vpop.f32.mrf.mxu1 }
 0x1c2   :  { %v953_v34 = vadd.f32 %v952_v32, %v838_v24  ;;  %1129 = vmatmul.bf16.gmra.mxu3 %v6136_v22 }
 0x1c3   :  { %v1068_v38 = vpop.f32.mrf.mxu2  ;;  %5162 = vmatmul.msk.bf16.gmra.mxu0 %vm675_vm0, %v6036_v46 }
 0x1c4   :  { %v6774_v37 = vadd.f32 %v1066_v42, %v953_v34 }
 0x1c5   :  { %v1090_v8 = vpop.f32.mrf.mxu3 }
 0x1c6   :  { %9881 = vst [vmem:[#allocation39_spill] sm:$0xff] %v6774_v37 }
 0x1c8   :  { %1233 = vmatmul.bf16.gmra.mxu2 %v6082_v62  ;;  %v840_v53 = vpop.f32.mrf.mxu0 }
 0x1c9   :  { %v954_v15 = vpop.f32.mrf.mxu1 }
 0x1ca   :  { %v955_v58 = vadd.f32 %v954_v15, %v840_v53 }
 0x1cb   :  { %v1071_v11 = vpop.f32.mrf.mxu2 }
 0x1cc   :  { %v6778_v51 = vadd.f32 %v1068_v38, %v955_v58 }
 0x1cd   :  { %v1092_v45 = vpop.f32.mrf.mxu3 }
 0x1ce   :  { %9882 = vst [vmem:[#allocation40_spill] sm:$0xff] %v6778_v51 }
 0x1d0   :  { %v843_v33 = vpop.f32.mrf.mxu0 }
 0x1d1   :  { %v957_v43 = vpop.f32.mrf.mxu1 }
 0x1d2   :  { %v958_v61 = vadd.f32 %v957_v43, %v843_v33  ;;  %1134 = vmatmul.bf16.gmra.mxu3 %v6168_v50 }
 0x1d3   :  { %v1073_v10 = vpop.f32.mrf.mxu2  ;;  %5163 = vmatmul.msk.bf16.gmra.mxu0 %vm675_vm0, %v6064_v56 }
 0x1d4   :  { %v6782_v46 = vadd.f32 %v1071_v11, %v958_v61 }
 0x1d5   :  { %v1095_v22 = vpop.f32.mrf.mxu3 }
 0x1d6   :  { %9883 = vst [vmem:[#allocation41_spill] sm:$0xff] %v6782_v46 }
 0x1d8   :  { %1238 = vmatmul.bf16.gmra.mxu2 %v6110_v9  ;;  %v845_v62 = vpop.f32.mrf.mxu0 }
 0x1d9   :  { %v959_v42 = vpop.f32.mrf.mxu1 }
 0x1da   :  { %v960_v24 = vadd.f32 %v959_v42, %v845_v62 }
 0x1db   :  { %v1076_v32 = vpop.f32.mrf.mxu2 }
 0x1dc   :  { %v6786_v34 = vadd.f32 %v1073_v10, %v960_v24 }
 0x1dd   :  { %v1097_v38 = vpop.f32.mrf.mxu3 }
 0x1de   :  { %9884 = vst [vmem:[#allocation42_spill] sm:$0xff] %v6786_v34 }
 0x1e0   :  { %v848_v53 = vpop.f32.mrf.mxu0 }
 0x1e1   :  { %v962_v15 = vpop.f32.mrf.mxu1 }
 0x1e2   :  { %v963_v58 = vadd.f32 %v962_v15, %v848_v53  ;;  %1139 = vmatmul.bf16.gmra.mxu3 %v6200_v21 }
 0x1e3   :  { %v1078_v33 = vpop.f32.mrf.mxu2  ;;  %5164 = vmatmul.msk.bf16.gmra.mxu0 %vm675_vm0, %v6092_v1 }
 0x1e4   :  { %v6790_v56 = vadd.f32 %v1076_v32, %v963_v58 }
 0x1e5   :  { %v1100_v50 = vpop.f32.mrf.mxu3 }
 0x1e6   :  { %9885 = vst [vmem:[#allocation43_spill] sm:$0xff] %v6790_v56  ;;  %v9908_v56 = vld [vmem:[#allocation11_spill] sm:$0xff] }
 0x1e8   :  { %1243 = vmatmul.bf16.gmra.mxu2 %v6138_v26  ;;  %v850_v9 = vpop.f32.mrf.mxu0 }
 0x1e9   :  { %v964_v11 = vpop.f32.mrf.mxu1 }
 0x1ea   :  { %v965_v43 = vadd.f32 %v964_v11, %v850_v9 }
 0x1eb   :  { %v1204_v61 = vpop.f32.mrf.mxu2 }
 0x1ec   :  { %v6794_v10 = vadd.f32 %v1078_v33, %v965_v43  ;;  %v1205_v62 = vadd.f32 %v1204_v61, %v1090_v8 }
 0x1ed   :  { %v1102_v42 = vpop.f32.mrf.mxu3 }
 0x1ee   :  { %9886 = vst [vmem:[#allocation44_spill] sm:$0xff] %v6794_v10 }
 0x1f0   :  { %v1318_v24 = vpop.f32.mrf.mxu0 }
 0x1f1   :  { %v6796_v53 = vadd.f32 %v1318_v24, %v1205_v62 }
 0x1f2   :  { %1144 = vmatmul.bf16.gmra.mxu3 %v6232_v60 }
 0x1f3   :  { %v1206_v1 = vpop.f32.mrf.mxu2  ;;  %5165 = vmatmul.msk.bf16.gmra.mxu0 %vm675_vm0, %v6120_v13  ;;  %v1424_v21 = vsel %vm1423_vm1, %v6796_v53, 0.0 }
 0x1f4   :  { %v1425_v26 = vadd.f32 %v1424_v21, %v6147_v35  ;;  %v1207_v32 = vadd.f32 %v1206_v1, %v1092_v45 }
 0x1f5   :  { %v1105_v15 = vpop.f32.mrf.mxu3 }
 0x1f6   :  { %1426 = vadd.xlane.f32.xlu0 %v1425_v26 }
 0x1f8   :  { %1248 = vmatmul.bf16.gmra.mxu2 %v6170_v55  ;;  %v1320_v8 = vpop.f32.mrf.mxu0 }
 0x1f9   :  { %v6805_v58 = vadd.f32 %v1320_v8, %v1207_v32 }
 0x1fb   :  { %v1209_v33 = vpop.f32.mrf.mxu2  ;;  %v1428_v9 = vsel %vm1423_vm1, %v6805_v58, 0.0 }
 0x1fc   :  { %v1429_v13 = vadd.f32 %v1428_v9, %v6160_v47  ;;  %v1210_v11 = vadd.f32 %v1209_v33, %v1095_v22 }
 0x1fd   :  { %v1107_v43 = vpop.f32.mrf.mxu3 }
 0x1fe   :  { %1430 = vadd.xlane.f32.xlu1 %v1429_v13 }
 0x200   :  { %v1323_v61 = vpop.f32.mrf.mxu0 }
 0x201   :  { %v6810_v62 = vadd.f32 %v1323_v61, %v1210_v11 }
 0x202   :  { %1149 = vmatmul.bf16.gmra.mxu3 %v6264_v48 }
 0x203   :  { %v1211_v60 = vpop.f32.mrf.mxu2  ;;  %5166 = vmatmul.msk.bf16.gmra.mxu0 %vm675_vm0, %v6150_v36  ;;  %v1432_v55 = vsel %vm1423_vm1, %v6810_v62, 0.0 }
 0x204   :  { %v1433_v45 = vadd.f32 %v1432_v55, %v6179_v0  ;;  %v1212_v24 = vadd.f32 %v1211_v60, %v1097_v38  ;;  %v6835_v55 = vpop.permute.xlu0 %3046 }
 0x205   :  { %v1110_v1 = vpop.f32.mrf.mxu3  ;;  %9887 = vst [vmem:[#allocation45_spill] sm:$0xff] %v6835_v55 }
 0x206   :  { %1434 = vadd.xlane.f32.xlu2 %v1433_v45 }
 0x208   :  { %1253 = vmatmul.bf16.gmra.mxu2 %v6202_v27  ;;  %v1325_v22 = vpop.f32.mrf.mxu0 }
 0x209   :  { %v6819_v21 = vadd.f32 %v1325_v22, %v1212_v24 }
 0x20b   :  { %v1214_v26 = vpop.f32.mrf.mxu2  ;;  %v1436_v32 = vsel %vm1423_vm1, %v6819_v21, 0.0 }
 0x20c   :  { %v1437_v36 = vadd.f32 %v1436_v32, %v6192_v17  ;;  %v1215_v8 = vadd.f32 %v1214_v26, %v1100_v50  ;;  %v6840_v32 = vpop.permute.xlu2 %3051 }
 0x20d   :  { %v1112_v33 = vpop.f32.mrf.mxu3  ;;  %9888 = vst [vmem:[#allocation46_spill] sm:$0xff] %v6840_v32 }
 0x20e   :  { %1438 = vadd.xlane.f32.xlu0 %v1437_v36 }
 0x210   :  { %v1328_v9 = vpop.f32.mrf.mxu0 }
 0x211   :  { %v6824_v13 = vadd.f32 %v1328_v9, %v1215_v8  ;;  %v6850_v9 = vpop.permute.xlu0 %2971 }
 0x212   :  { %1154 = vmatmul.bf16.gmra.mxu3 %v6296_v49  ;;  %9889 = vst [vmem:[#allocation47_spill] sm:$0xff] %v6850_v9 }
 0x213   :  { %v1216_v48 = vpop.f32.mrf.mxu2  ;;  %5167 = vmatmul.msk.bf16.gmra.mxu0 %vm675_vm0, %v6182_v2  ;;  %v1440_v27 = vsel %vm1423_vm1, %v6824_v13, 0.0 }
 0x214   :  { %v1441_v38 = vadd.f32 %v1440_v27, %v6211_v39  ;;  %v1217_v11 = vadd.f32 %v1216_v48, %v1102_v42 }
 0x215   :  { %v1115_v61 = vpop.f32.mrf.mxu3 }
 0x216   :  { %1442 = vadd.xlane.f32.xlu1 %v1441_v38 }
 0x218   :  { %1258 = vmatmul.bf16.gmra.mxu2 %v6234_v3  ;;  %v1330_v50 = vpop.f32.mrf.mxu0 }
 0x219   :  { %v6833_v60 = vadd.f32 %v1330_v50, %v1217_v11  ;;  %v6855_v11 = vpop.permute.xlu2 %3036 }
 0x21a   :  { %9890 = vst [vmem:[#allocation48_spill] sm:$0xff] %v6855_v11  ;;  %v9901_v11 = vld [vmem:[#allocation6_spill] sm:$0xff] }
 0x21b   :  { %v1219_v45 = vpop.f32.mrf.mxu2  ;;  %v1444_v2 = vsel %vm1423_vm1, %v6833_v60, 0.0 }
 0x21c   :  { %v1445_v24 = vadd.f32 %v1444_v2, %v6224_v57  ;;  %v1220_v22 = vadd.f32 %v1219_v45, %v1105_v15  ;;  %v9891_v45 = vld [vmem:[#allocation3_spill] sm:$0xff] }
 0x21d   :  { %v1117_v26 = vpop.f32.mrf.mxu3 }
 0x21e   :  { %1446 = vadd.xlane.f32.xlu2 %v1445_v24  ;;  %v6860_v24 = vpop.permute.xlu1 %2966 }
 0x21f   :  { %9892 = vst [vmem:[#allocation3_spill] sm:$0xff] %v6860_v24 }
 0x220   :  { %v1333_v49 = vpop.f32.mrf.mxu0 }
 0x221   :  { %v6842_v42 = vadd.f32 %v1333_v49, %v1220_v22  ;;  %v6862_v22 = vpop.permute.xlu0 %3026  ;;  %v6872_v16 = vpop.permute.xlu2 %2956 }
 0x222   :  { %1159 = vmatmul.bf16.gmra.mxu3 %v6328_v14  ;;  %9893 = vst [vmem:[#allocation49_spill] sm:$0xff] %v6862_v22 }
 0x223   :  { %v1221_v3 = vpop.f32.mrf.mxu2  ;;  %5168 = vmatmul.msk.bf16.gmra.mxu0 %vm675_vm0, %v6214_v40  ;;  %v1448_v36 = vsel %vm1423_vm1, %v6842_v42, 0.0 }
 0x224   :  { %v1449_v8 = vadd.f32 %v1448_v36, %v6243_v18  ;;  %v1222_v15 = vadd.f32 %v1221_v3, %v1107_v43  ;;  %v9894_v36 = vld [vmem:[#allocation2_spill] sm:$0xff] }
 0x225   :  { %v1120_v48 = vpop.f32.mrf.mxu3  ;;  %9897 = vst [vmem:[#allocation2_spill] sm:$0xff] %v6872_v16 }
 0x226   :  { %1450 = vadd.xlane.f32.xlu0 %v1449_v8 }
 0x228   :  { %v1335_v27 = vpop.f32.mrf.mxu0  ;;  %1263 = vmatmul.bf16.gmra.mxu2 %v6266_v54 }
 0x229   :  { %v6853_v38 = vadd.f32 %v1335_v27, %v1222_v15  ;;  %v9895_v15 = vld [vmem:[#allocation4_spill] sm:$0xff]  ;;  %v6877_v22 = vpop.permute.xlu0 %2946 }
 0x22b   :  { %v1224_v40 = vpop.f32.mrf.mxu2  ;;  %v1452_v50 = vsel %vm1423_vm1, %v6853_v38, 0.0 }
 0x22c   :  { %v1453_v2 = vadd.f32 %v1452_v50, %v9891_v45  ;;  %v1225_v14 = vadd.f32 %v1224_v40, %v1110_v1  ;;  %v9896_v50 = vld [vmem:[#allocation15_spill] sm:$0xff]  ;;  %v6874_v1 = vpop.permute.xlu1 %3041 }
 0x22d   :  { %v1122_v43 = vpop.f32.mrf.mxu3  ;;  %9898 = vst [vmem:[#allocation4_spill] sm:$0xff] %v6874_v1 }
 0x22e   :  { %1454 = vadd.xlane.f32.xlu1 %v1453_v2  ;;  %9900 = vst [vmem:[#allocation15_spill] sm:$0xff] %v6877_v22 }
 0x230   :  { %v1338_v49 = vpop.f32.mrf.mxu0 }
 0x231   :  { %v6864_v3 = vadd.f32 %v1338_v49, %v1225_v14  ;;  %v9899_v49 = vld [vmem:[#allocation7_spill] sm:$0xff] }
 0x232   :  { %1164 = vmatmul.bf16.gmra.mxu3 %v9896_v50 }
 0x233   :  { %v1226_v54 = vpop.f32.mrf.mxu2  ;;  %5169 = vmatmul.msk.bf16.gmra.mxu0 %vm675_vm0, %v9894_v36  ;;  %v1456_v8 = vsel %vm1423_vm1, %v6864_v3, 0.0 }
 0x234   :  { %v1457_v27 = vadd.f32 %v1456_v8, %v9895_v15  ;;  %v1227_v40 = vadd.f32 %v1226_v54, %v1112_v33  ;;  %v6886_v54 = vpop.permute.xlu1 %2961 }
 0x235   :  { %v1125_v2 = vpop.f32.mrf.mxu3  ;;  %9903 = vst [vmem:[#allocation6_spill] sm:$0xff] %v6886_v54 }
 0x236   :  { %1458 = vadd.xlane.f32.xlu2 %v1457_v27  ;;  %v6884_v27 = vpop.permute.xlu2 %3031 }
 0x237   :  { %9902 = vst [vmem:[#allocation7_spill] sm:$0xff] %v6884_v27 }
 0x238   :  { %v1340_v14 = vpop.f32.mrf.mxu0  ;;  %1268 = vmatmul.bf16.gmra.mxu2 %v9899_v49  ;;  %v6890_v49 = vpop.permute.xlu0 %3021 }
 0x239   :  { %v6879_v36 = vadd.f32 %v1340_v14, %v1227_v40  ;;  %9904 = vst [vmem:[#allocation50_spill] sm:$0xff] %v6890_v49  ;;  %v9905_v14 = vld [vmem:[#allocation5_spill] sm:$0xff] }
 0x23b   :  { %v1229_v32 = vpop.f32.mrf.mxu2  ;;  %v1460_v8 = vsel %vm1423_vm1, %v6879_v36, 0.0 }
 0x23c   :  { %v1461_v50 = vadd.f32 %v1460_v8, %v9901_v11  ;;  %v1230_v55 = vadd.f32 %v1229_v32, %v1115_v61  ;;  %v9906_v8 = vld [vmem:[#allocation8_spill] sm:$0xff]  ;;  %v6903_v52 = vpop.permute.xlu1 %3016 }
 0x23d   :  { %v1127_v33 = vpop.f32.mrf.mxu3  ;;  %v9907_v32 = vld [vmem:[#allocation20_spill] sm:$0xff]  ;;  %9910 = vst [vmem:[#allocation8_spill] sm:$0xff] %v6903_v52 }
 0x23e   :  { %1462 = vadd.xlane.f32.xlu0 %v1461_v50  ;;  %v9915_v52 = vld [vmem:[#allocation12_spill] sm:$0xff] }
 0x240   :  { %v1343_v1 = vpop.f32.mrf.mxu0  ;;  %v6908_v10 = vpop.permute.xlu0 %2941 }
 0x241   :  { %v6888_v51 = vadd.f32 %v1343_v1, %v1230_v55  ;;  %v6899_v55 = vpop.permute.xlu2 %2951  ;;  %9912 = vst [vmem:[#allocation20_spill] sm:$0xff] %v6908_v10 }
 0x242   :  { %1169 = vmatmul.bf16.gmra.mxu3 %v9907_v32  ;;  %9909 = vst [vmem:[#allocation5_spill] sm:$0xff] %v6899_v55  ;;  %v9914_v32 = vld [vmem:[#allocation9_spill] sm:$0xff] }
 0x243   :  { %v1231_v40 = vpop.f32.mrf.mxu2  ;;  %5170 = vmatmul.msk.bf16.gmra.mxu0 %vm675_vm0, %v9905_v14  ;;  %v1464_v34 = vsel %vm1423_vm1, %v6888_v51, 0.0 }
 0x244   :  { %v1465_v61 = vadd.f32 %v1464_v34, %v9906_v8  ;;  %v1232_v50 = vadd.f32 %v1231_v40, %v1117_v26 }
 0x245   :  { %v1130_v49 = vpop.f32.mrf.mxu3 }
 0x246   :  { %1466 = vadd.xlane.f32.xlu1 %v1465_v61 }
 0x248   :  { %v1345_v27 = vpop.f32.mrf.mxu0  ;;  %1273 = vmatmul.bf16.gmra.mxu2 %v9908_v56 }
 0x249   :  { %v6901_v1 = vadd.f32 %v1345_v27, %v1232_v50  ;;  %v6912_v56 = vpop.permute.xlu2 %3006 }
 0x24a   :  { %9913 = vst [vmem:[#allocation11_spill] sm:$0xff] %v6912_v56 }
 0x24b   :  { %v1234_v14 = vpop.f32.mrf.mxu2  ;;  %v1468_v37 = vsel %vm1423_vm1, %v6901_v1, 0.0 }
 0x24c   :  { %v1469_v34 = vadd.f32 %v1468_v37, %v9911_v25  ;;  %v1235_v61 = vadd.f32 %v1234_v14, %v1120_v48  ;;  %v9916_v37 = vld [vmem:[#allocation25_spill] sm:$0xff]  ;;  %v6922_v48 = vpop.permute.xlu1 %2936  ;;  %v6924_v14 = vpop.permute.xlu0 %2996 }
 0x24d   :  { %v6919_v46 = vpop.f32.mrf.mxu3  ;;  %9917 = vst [vmem:[#allocation10_spill] sm:$0xff] %v6922_v48 }
 0x24e   :  { %1470 = vadd.xlane.f32.xlu2 %v1469_v34  ;;  %9918 = vst [vmem:[#allocation9_spill] sm:$0xff] %v6924_v14  ;;  %v9925_v14 = vld [vmem:[#allocation17_spill] sm:$0xff] }
 0x250   :  { %v1348_v26 = vpop.f32.mrf.mxu0 }
 0x251   :  { %v6910_v40 = vadd.f32 %v1348_v26, %v1235_v61  ;;  %v9919_v26 = vld [vmem:[#allocation16_spill] sm:$0xff]  ;;  %v6932_v55 = vpop.permute.xlu2 %2926 }
 0x252   :  { %1174 = vmatmul.bf16.gmra.mxu3 %v9916_v37  ;;  %9921 = vst [vmem:[#allocation12_spill] sm:$0xff] %v6932_v55 }
 0x253   :  { %v1236_v27 = vpop.f32.mrf.mxu2  ;;  %5171 = vmatmul.msk.bf16.gmra.mxu0 %vm675_vm0, %v9914_v32  ;;  %v1472_v50 = vsel %vm1423_vm1, %v6910_v40, 0.0 }
 0x254   :  { %v1473_v28 = vadd.f32 %v1472_v50, %v9915_v52  ;;  %v1237_v34 = vadd.f32 %v1236_v27, %v1122_v43  ;;  %v9920_v50 = vld [vmem:[#allocation14_spill] sm:$0xff]  ;;  %v6938_v27 = vpop.permute.xlu0 %2916 }
 0x255   :  { %v6934_v16 = vpop.f32.mrf.mxu3  ;;  %9923 = vst [vmem:[#allocation16_spill] sm:$0xff] %v6938_v27 }
 0x256   :  { %1474 = vadd.xlane.f32.xlu0 %v1473_v28  ;;  %v6936_v28 = vpop.permute.xlu1 %3011 }
 0x257   :  { %9922 = vst [vmem:[#allocation25_spill] sm:$0xff] %v6936_v28  ;;  %v9927_v28 = vld [vmem:[#allocation21_spill] sm:$0xff] }
 0x258   :  { %v1350_v61 = vpop.f32.mrf.mxu0  ;;  %1278 = vmatmul.bf16.gmra.mxu2 %v9919_v26 }
 0x259   :  { %v6927_v56 = vadd.f32 %v1350_v61, %v1237_v34  ;;  %v9924_v61 = vld [vmem:[#allocation13_spill] sm:$0xff] }
 0x25b   :  { %v1239_v32 = vpop.f32.mrf.mxu2  ;;  %v1476_v22 = vsel %vm1423_vm1, %v6927_v56, 0.0 }
 0x25c   :  { %v1477_v24 = vadd.f32 %v1476_v22, %v9920_v50  ;;  %v1240_v37 = vadd.f32 %v1239_v32, %v1125_v2 }
 0x25e   :  { %1478 = vadd.xlane.f32.xlu1 %v1477_v24  ;;  %v6948_v24 = vpop.permute.xlu2 %3001 }
 0x25f   :  { %9926 = vst [vmem:[#allocation14_spill] sm:$0xff] %v6948_v24 }
 0x260   :  { %v1353_v43 = vpop.f32.mrf.mxu0 }
 0x261   :  { %v6940_v26 = vadd.f32 %v1353_v43, %v1240_v37  ;;  %v6951_v37 = vpop.f32.mrf.mxu3  ;;  %v6953_v43 = vpop.permute.xlu1 %2931 }
 0x262   :  { %1179 = vmatmul.bf16.gmra.mxu3 %v6549_v5  ;;  %9928 = vst [vmem:[#allocation13_spill] sm:$0xff] %v6953_v43 }
 0x263   :  { %v1241_v34 = vpop.f32.mrf.mxu2  ;;  %5172 = vmatmul.msk.bf16.gmra.mxu0 %vm675_vm0, %v9924_v61  ;;  %v1480_v22 = vsel %vm1423_vm1, %v6940_v26, 0.0 }
 0x264   :  { %v1481_v54 = vadd.f32 %v1480_v22, %v9925_v14  ;;  %v1242_v2 = vadd.f32 %v1241_v34, %v1127_v33 }
 0x266   :  { %1482 = vadd.xlane.f32.xlu1 %v1481_v54  ;;  %v9931_v54 = vld [vmem:[#allocation19_spill] sm:$0xff]  ;;  %v6971_v55 = vpop.permute.xlu2 %2921 }
 0x267   :  { %9932 = vst [vmem:[#allocation19_spill] sm:$0xff] %v6971_v55 }
 0x268   :  { %v1355_v32 = vpop.f32.mrf.mxu0  ;;  %1283 = vmatmul.bf16.gmra.mxu2 %v9927_v28 }
 0x269   :  { %v6955_v9 = vadd.f32 %v1355_v32, %v1242_v2  ;;  %v1427_v61 = vpop.xlane.xlu0 %1426  ;;  %v6975_v27 = vpop.f32.mrf.mxu3 }
 0x26a   :  { %v1592_v10 = vmul.f32 0.0051020407, %v1427_v61 }
 0x26b   :  { %v1244_v48 = vpop.f32.mrf.mxu2  ;;  %v1484_v22 = vsel %vm1423_vm1, %v6955_v9, 0.0 }
 0x26c   :  { %v6960_v5 = vsub.f32 %v6147_v35, %v1592_v10  ;;  %v6963_v33 = vsub.f32 %v6796_v53, %v1592_v10  ;;  %v1485_v28 = vadd.f32 %v1484_v22, %v9931_v54  ;;  %v1245_v34 = vadd.f32 %v1244_v48, %v1130_v49  ;;  %v9933_v48 = vld [vmem:[#allocation18_spill] sm:$0xff] }
 0x26e   :  { %9929 = vst [vmem:[#allocation17_spill] sm:$0xff] %v6960_v5  ;;  %1486 = vadd.xlane.f32.xlu1 %v1485_v28  ;;  %v1718_v2 = vmul.f32 %v6960_v5, %v6960_v5  ;;  %v1719_v32 = vmul.f32 %v6963_v33, %v6963_v33 }
 0x26f   :  { %9930 = vst [vmem:[#allocation21_spill] sm:$0xff] %v6963_v33 }
 0x270   :  { %v1358_v61 = vpop.f32.mrf.mxu0  ;;  %v1802_v24 = vsel %vm1423_vm1, %v1719_v32, 0.0 }
 0x271   :  { %v6973_v35 = vadd.f32 %v1358_v61, %v1245_v34  ;;  %v1431_v43 = vpop.xlane.xlu1 %1430  ;;  %v1803_v10 = vadd.f32 %v1802_v24, %v1718_v2  ;;  %v9936_v34 = vld [vmem:[#allocation22_spill] sm:$0xff] }
 0x272   :  { %v1593_v53 = vmul.f32 0.0051020407, %v1431_v43  ;;  %1184 = vmatmul.bf16.gmra.mxu3 %v6624_v31 }
 0x273   :  { %v1246_v49 = vpop.f32.mrf.mxu2  ;;  %5173 = vmatmul.msk.bf16.gmra.mxu0 %vm675_vm0, %v9933_v48  ;;  %1804 = vadd.xlane.f32.xlu2 %v1803_v10  ;;  %v1488_v22 = vsel %vm1423_vm1, %v6973_v35, 0.0  ;;  %v9937_v48 = vld [vmem:[#allocation26_spill] sm:$0xff] }
 0x274   :  { %v6982_v28 = vsub.f32 %v6160_v47, %v1593_v53  ;;  %v6985_v32 = vsub.f32 %v6805_v58, %v1593_v53  ;;  %v1489_v61 = vadd.f32 %v1488_v22, %v9936_v34  ;;  %v1247_v2 = vadd.f32 %v1246_v49, %v6919_v46  ;;  %v9940_v49 = vld [vmem:[#allocation24_spill] sm:$0xff] }
 0x276   :  { %9934 = vst [vmem:[#allocation18_spill] sm:$0xff] %v6982_v28  ;;  %1490 = vadd.xlane.f32.xlu1 %v1489_v61  ;;  %v1720_v24 = vmul.f32 %v6982_v28, %v6982_v28  ;;  %v1721_v43 = vmul.f32 %v6985_v32, %v6985_v32 }
 0x277   :  { %9935 = vst [vmem:[#allocation51_spill] sm:$0xff] %v6985_v32  ;;  %v1142_v32 = vpop.f32.mrf.mxu3 }
 0x278   :  { %v1360_v10 = vpop.f32.mrf.mxu0  ;;  %1288 = vmatmul.bf16.gmra.mxu2 %v9937_v48  ;;  %v1806_v47 = vsel %vm1423_vm1, %v1721_v43, 0.0 }
 0x279   :  { %v6996_v58 = vadd.f32 %v1360_v10, %v1247_v2  ;;  %v1435_v53 = vpop.xlane.xlu2 %1434  ;;  %v1807_v22 = vadd.f32 %v1806_v47, %v1720_v24 }
 0x27a   :  { %v1594_v33 = vmul.f32 0.0051020407, %v1435_v53 }
 0x27b   :  { %v1249_v31 = vpop.f32.mrf.mxu2  ;;  %1808 = vadd.xlane.f32.xlu0 %v1807_v22  ;;  %v1492_v61 = vsel %vm1423_vm1, %v6996_v58, 0.0 }
 0x27c   :  { %v7001_v28 = vsub.f32 %v6179_v0, %v1594_v33  ;;  %v7004_v46 = vsub.f32 %v6810_v62, %v1594_v33  ;;  %v1493_v48 = vadd.f32 %v1492_v61, %v9940_v49  ;;  %v1250_v43 = vadd.f32 %v1249_v31, %v6934_v16  ;;  %v9941_v61 = vld [vmem:[#allocation23_spill] sm:$0xff] }
 0x27e   :  { %9938 = vst [vmem:[#allocation22_spill] sm:$0xff] %v7001_v28  ;;  %1494 = vadd.xlane.f32.xlu2 %v1493_v48  ;;  %v1722_v24 = vmul.f32 %v7001_v28, %v7001_v28  ;;  %v1723_v2 = vmul.f32 %v7004_v46, %v7004_v46 }
 0x27f   :  { %9939 = vst [vmem:[#allocation26_spill] sm:$0xff] %v7004_v46 }
 0x280   :  { %v1363_v10 = vpop.f32.mrf.mxu0  ;;  %v1810_v47 = vsel %vm1423_vm1, %v1723_v2, 0.0  ;;  %v9944_v2 = vld [vmem:[#allocation27_spill] sm:$0xff] }
 0x281   :  { %v7013_v0 = vadd.f32 %v1363_v10, %v1250_v43  ;;  %v1439_v53 = vpop.xlane.xlu0 %1438  ;;  %v1811_v62 = vadd.f32 %v1810_v47, %v1722_v24  ;;  %v1145_v47 = vpop.f32.mrf.mxu3 }
 0x282   :  { %v1595_v33 = vmul.f32 0.0051020407, %v1439_v53  ;;  %1189 = vmatmul.bf16.gmra.mxu3 %v6669_v41 }
 0x283   :  { %v1251_v22 = vpop.f32.mrf.mxu2  ;;  %5174 = vmatmul.msk.bf16.gmra.mxu0 %vm675_vm0, %v9941_v61  ;;  %1812 = vadd.xlane.f32.xlu1 %v1811_v62  ;;  %v1496_v16 = vsel %vm1423_vm1, %v7013_v0, 0.0 }
 0x284   :  { %v7020_v31 = vsub.f32 %v6192_v17, %v1595_v33  ;;  %v7023_v48 = vsub.f32 %v6819_v21, %v1595_v33  ;;  %v1497_v43 = vadd.f32 %v1496_v16, %v9944_v2  ;;  %v1252_v53 = vadd.f32 %v1251_v22, %v6951_v37  ;;  %v9945_v17 = vld [vmem:[#allocation30_spill] sm:$0xff]  ;;  %v9946_v22 = vld [vmem:[#allocation29_spill] sm:$0xff] }
 0x286   :  { %9942 = vst [vmem:[#allocation24_spill] sm:$0xff] %v7020_v31  ;;  %1498 = vadd.xlane.f32.xlu0 %v1497_v43  ;;  %v1724_v24 = vmul.f32 %v7020_v31, %v7020_v31  ;;  %v1725_v10 = vmul.f32 %v7023_v48, %v7023_v48 }
 0x287   :  { %9943 = vst [vmem:[#allocation23_spill] sm:$0xff] %v7023_v48 }
 0x288   :  { %v1365_v62 = vpop.f32.mrf.mxu0  ;;  %1293 = vmatmul.bf16.gmra.mxu2 %v9945_v17  ;;  %v1814_v21 = vsel %vm1423_vm1, %v1725_v10, 0.0 }
 0x289   :  { %v7034_v33 = vadd.f32 %v1365_v62, %v1252_v53  ;;  %v1443_v61 = vpop.xlane.xlu1 %1442  ;;  %v1815_v16 = vadd.f32 %v1814_v21, %v1724_v24 }
 0x28a   :  { %v1596_v41 = vmul.f32 0.0051020407, %v1443_v61  ;;  %v1147_v61 = vpop.f32.mrf.mxu3 }
 0x28b   :  { %v1254_v43 = vpop.f32.mrf.mxu2  ;;  %1816 = vadd.xlane.f32.xlu2 %v1815_v16  ;;  %v1500_v5 = vsel %vm1423_vm1, %v7034_v33, 0.0 }
 0x28c   :  { %v7039_v46 = vsub.f32 %v6211_v39, %v1596_v41  ;;  %v7042_v37 = vsub.f32 %v6824_v13, %v1596_v41  ;;  %v1501_v17 = vadd.f32 %v1500_v5, %v9946_v22  ;;  %v1255_v10 = vadd.f32 %v1254_v43, %v6975_v27  ;;  %v9947_v5 = vld [vmem:[#allocation28_spill] sm:$0xff] }
 0x28e   :  { %1502 = vadd.xlane.f32.xlu1 %v1501_v17  ;;  %v1726_v24 = vmul.f32 %v7039_v46, %v7039_v46  ;;  %v1727_v53 = vmul.f32 %v7042_v37, %v7042_v37 }
 0x290   :  { %v1368_v62 = vpop.f32.mrf.mxu0  ;;  %v1818_v21 = vsel %vm1423_vm1, %v1727_v53, 0.0  ;;  %v9949_v53 = vld [vmem:[#allocation31_spill] sm:$0xff] }
 0x291   :  { %v7051_v39 = vadd.f32 %v1368_v62, %v1255_v10  ;;  %v1447_v16 = vpop.xlane.xlu2 %1446  ;;  %v1819_v13 = vadd.f32 %v1818_v21, %v1726_v24 }
 0x292   :  { %v1597_v41 = vmul.f32 0.0051020407, %v1447_v16 }
 0x293   :  { %v1256_v28 = vpop.f32.mrf.mxu2  ;;  %5175 = vmatmul.msk.bf16.gmra.mxu0 %vm675_vm0, %v9947_v5  ;;  %1820 = vadd.xlane.f32.xlu0 %v1819_v13  ;;  %v1504_v27 = vsel %vm1423_vm1, %v7051_v39, 0.0 }
 0x294   :  { %v7058_v43 = vsub.f32 %v6224_v57, %v1597_v41  ;;  %v7061_v17 = vsub.f32 %v6833_v60, %v1597_v41  ;;  %v1505_v10 = vadd.f32 %v1504_v27, %v9949_v53  ;;  %v1257_v21 = vadd.f32 %v1256_v28, %v1142_v32  ;;  %v1150_v57 = vpop.f32.mrf.mxu3 }
 0x296   :  { %9948 = vst [vmem:[#allocation27_spill] sm:$0xff] %v7061_v17  ;;  %1506 = vadd.xlane.f32.xlu2 %v1505_v10  ;;  %v1728_v24 = vmul.f32 %v7058_v43, %v7058_v43  ;;  %v1729_v62 = vmul.f32 %v7061_v17, %v7061_v17  ;;  %v9951_v17 = vld [vmem:[#allocation32_spill] sm:$0xff] }
 0x298   :  { %v1370_v16 = vpop.f32.mrf.mxu0  ;;  %1298 = vmatmul.bf16.gmra.mxu2 %v6626_v59  ;;  %v1822_v13 = vsel %vm1423_vm1, %v1729_v62, 0.0  ;;  %v9950_v59 = vld [vmem:[#allocation33_spill] sm:$0xff] }
 0x299   :  { %v7070_v5 = vadd.f32 %v1370_v16, %v1257_v21  ;;  %v1451_v60 = vpop.xlane.xlu0 %1450  ;;  %v1823_v41 = vadd.f32 %v1822_v13, %v1728_v24 }
 0x29a   :  { %v1598_v48 = vmul.f32 0.0051020407, %v1451_v60 }
 0x29b   :  { %v1259_v27 = vpop.f32.mrf.mxu2  ;;  %1824 = vadd.xlane.f32.xlu1 %v1823_v41  ;;  %v1508_v10 = vsel %vm1423_vm1, %v7070_v5, 0.0 }
 0x29c   :  { %v7075_v31 = vsub.f32 %v6243_v18, %v1598_v48  ;;  %v7078_v28 = vsub.f32 %v6842_v42, %v1598_v48  ;;  %v1509_v32 = vadd.f32 %v1508_v10, %v9950_v59  ;;  %v1260_v62 = vadd.f32 %v1259_v27, %v1145_v47  ;;  %v1152_v42 = vpop.f32.mrf.mxu3 }
 0x29e   :  { %1510 = vadd.xlane.f32.xlu0 %v1509_v32  ;;  %v1730_v21 = vmul.f32 %v7075_v31, %v7075_v31  ;;  %v1731_v24 = vmul.f32 %v7078_v28, %v7078_v28 }
 0x2a0   :  { %v1373_v16 = vpop.f32.mrf.mxu0  ;;  %v1826_v13 = vsel %vm1423_vm1, %v1731_v24, 0.0 }
 0x2a1   :  { %v7086_v60 = vadd.f32 %v1373_v16, %v1260_v62  ;;  %v1455_v18 = vpop.xlane.xlu1 %1454  ;;  %v1827_v41 = vadd.f32 %v1826_v13, %v1730_v21 }
 0x2a2   :  { %v1599_v55 = vmul.f32 0.0051020407, %v1455_v18 }
 0x2a3   :  { %v1261_v48 = vpop.f32.mrf.mxu2  ;;  %5176 = vmatmul.msk.bf16.gmra.mxu0 %vm675_vm0, %v9951_v17  ;;  %1828 = vadd.xlane.f32.xlu2 %v1827_v41  ;;  %v1512_v47 = vsel %vm1423_vm1, %v7086_v60, 0.0 }
 0x2a4   :  { %v7093_v27 = vsub.f32 %v9891_v45, %v1599_v55  ;;  %v7096_v10 = vsub.f32 %v6853_v38, %v1599_v55  ;;  %v1513_v32 = vadd.f32 %v1512_v47, %v6635_v20  ;;  %v1262_v17 = vadd.f32 %v1261_v48, %v1147_v61  ;;  %v1155_v48 = vpop.f32.mrf.mxu3 }
 0x2a6   :  { %1514 = vadd.xlane.f32.xlu1 %v1513_v32  ;;  %v1732_v62 = vmul.f32 %v7093_v27, %v7093_v27  ;;  %v1733_v21 = vmul.f32 %v7096_v10, %v7096_v10 }
 0x2a8   :  { %v1375_v24 = vpop.f32.mrf.mxu0  ;;  %1303 = vmatmul.bf16.gmra.mxu2 %v6671_v44  ;;  %v1830_v16 = vsel %vm1423_vm1, %v1733_v21, 0.0 }
 0x2a9   :  { %v7105_v45 = vadd.f32 %v1375_v24, %v1262_v17  ;;  %v1459_v13 = vpop.xlane.xlu2 %1458  ;;  %v1831_v38 = vadd.f32 %v1830_v16, %v1732_v62 }
 0x2aa   :  { %v1600_v55 = vmul.f32 0.0051020407, %v1459_v13 }
 0x2ab   :  { %1832 = vadd.xlane.f32.xlu0 %v1831_v38  ;;  %v1264_v18 = vpop.f32.mrf.mxu2  ;;  %v1516_v41 = vsel %vm1423_vm1, %v7105_v45, 0.0  ;;  %v9952_v38 = vld [vmem:[#allocation34_spill] sm:$0xff] }
 0x2ac   :  { %v7110_v47 = vsub.f32 %v9895_v15, %v1600_v55  ;;  %v7113_v61 = vsub.f32 %v6864_v3, %v1600_v55  ;;  %v1517_v44 = vadd.f32 %v1516_v41, %v6658_v12  ;;  %v1265_v32 = vadd.f32 %v1264_v18, %v1150_v57 }
 0x2ae   :  { %1518 = vadd.xlane.f32.xlu2 %v1517_v44  ;;  %v1734_v62 = vmul.f32 %v7110_v47, %v7110_v47  ;;  %v1735_v21 = vmul.f32 %v7113_v61, %v7113_v61 }
 0x2b0   :  { %v1378_v17 = vpop.f32.mrf.mxu0  ;;  %v1834_v24 = vsel %vm1423_vm1, %v1735_v21, 0.0 }
 0x2b1   :  { %v7121_v16 = vadd.f32 %v1378_v17, %v1265_v32  ;;  %v1463_v15 = vpop.xlane.xlu0 %1462  ;;  %v1835_v13 = vadd.f32 %v1834_v24, %v1734_v62  ;;  %v1157_v17 = vpop.f32.mrf.mxu3 }
 0x2b2   :  { %v1601_v3 = vmul.f32 0.0051020407, %v1463_v15 }
 0x2b3   :  { %5177 = vmatmul.msk.bf16.gmra.mxu0 %vm675_vm0, %v9952_v38  ;;  %1836 = vadd.xlane.f32.xlu1 %v1835_v13  ;;  %v1266_v57 = vpop.f32.mrf.mxu2  ;;  %v1520_v55 = vsel %vm1423_vm1, %v7121_v16, 0.0 }
 0x2b4   :  { %v7128_v18 = vsub.f32 %v9901_v11, %v1601_v3  ;;  %v7131_v41 = vsub.f32 %v6879_v36, %v1601_v3  ;;  %v1521_v44 = vadd.f32 %v1520_v55, %v6674_v23  ;;  %v1267_v32 = vadd.f32 %v1266_v57, %v1152_v42 }
 0x2b6   :  { %9953 = vst [vmem:[#allocation30_spill] sm:$0xff] %v7131_v41  ;;  %1522 = vadd.xlane.f32.xlu0 %v1521_v44  ;;  %v1736_v62 = vmul.f32 %v7128_v18, %v7128_v18  ;;  %v1737_v21 = vmul.f32 %v7131_v41, %v7131_v41 }
 0x2b8   :  { %v1380_v24 = vpop.f32.mrf.mxu0  ;;  %v1838_v15 = vsel %vm1423_vm1, %v1737_v21, 0.0 }
 0x2b9   :  { %v7139_v13 = vadd.f32 %v1380_v24, %v1267_v32  ;;  %v1467_v11 = vpop.xlane.xlu1 %1466  ;;  %v1839_v38 = vadd.f32 %v1838_v15, %v1736_v62  ;;  %v1160_v15 = vpop.f32.mrf.mxu3 }
 0x2ba   :  { %v1602_v36 = vmul.f32 0.0051020407, %v1467_v11 }
 0x2bb   :  { %1840 = vadd.xlane.f32.xlu2 %v1839_v38  ;;  %v1269_v3 = vpop.f32.mrf.mxu2  ;;  %v1524_v42 = vsel %vm1423_vm1, %v7139_v13, 0.0 }
 0x2bc   :  { %v7144_v57 = vsub.f32 %v9906_v8, %v1602_v36  ;;  %v7147_v55 = vsub.f32 %v6888_v51, %v1602_v36  ;;  %v1525_v44 = vadd.f32 %v1524_v42, %v6691_v63  ;;  %v1270_v41 = vadd.f32 %v1269_v3, %v1155_v48 }
 0x2be   :  { %9954 = vst [vmem:[#allocation29_spill] sm:$0xff] %v7144_v57  ;;  %1526 = vadd.xlane.f32.xlu1 %v1525_v44  ;;  %v1738_v32 = vmul.f32 %v7144_v57, %v7144_v57  ;;  %v1739_v62 = vmul.f32 %v7147_v55, %v7147_v55 }
 0x2bf   :  { %9955 = vst [vmem:[#allocation28_spill] sm:$0xff] %v7147_v55 }
 0x2c0   :  { %v1383_v21 = vpop.f32.mrf.mxu0  ;;  %v1842_v24 = vsel %vm1423_vm1, %v1739_v62, 0.0 }
 0x2c1   :  { %v7155_v11 = vadd.f32 %v1383_v21, %v1270_v41  ;;  %v1471_v8 = vpop.xlane.xlu2 %1470  ;;  %v1843_v38 = vadd.f32 %v1842_v24, %v1738_v32 }
 0x2c2   :  { %v1603_v51 = vmul.f32 0.0051020407, %v1471_v8 }
 0x2c3   :  { %1844 = vadd.xlane.f32.xlu0 %v1843_v38  ;;  %v1271_v36 = vpop.f32.mrf.mxu2  ;;  %v1528_v48 = vsel %vm1423_vm1, %v7155_v11, 0.0 }
 0x2c4   :  { %v7160_v3 = vsub.f32 %v9911_v25, %v1603_v51  ;;  %v7163_v42 = vsub.f32 %v6901_v1, %v1603_v51  ;;  %v1529_v44 = vadd.f32 %v1528_v48, %v6698_v29  ;;  %v1272_v62 = vadd.f32 %v1271_v36, %v1157_v17  ;;  %v1162_v1 = vpop.f32.mrf.mxu3 }
 0x2c6   :  { %9956 = vst [vmem:[#allocation31_spill] sm:$0xff] %v7163_v42  ;;  %1530 = vadd.xlane.f32.xlu2 %v1529_v44  ;;  %v1740_v41 = vmul.f32 %v7160_v3, %v7160_v3  ;;  %v1741_v32 = vmul.f32 %v7163_v42, %v7163_v42 }
 0x2c8   :  { %v1385_v21 = vpop.f32.mrf.mxu0  ;;  %v1846_v24 = vsel %vm1423_vm1, %v1741_v32, 0.0 }
 0x2c9   :  { %v7171_v8 = vadd.f32 %v1385_v21, %v1272_v62  ;;  %v1475_v25 = vpop.xlane.xlu0 %1474  ;;  %v1847_v38 = vadd.f32 %v1846_v24, %v1740_v41 }
 0x2ca   :  { %v1604_v55 = vmul.f32 0.0051020407, %v1475_v25 }
 0x2cb   :  { %1848 = vadd.xlane.f32.xlu1 %v1847_v38  ;;  %v1274_v51 = vpop.f32.mrf.mxu2  ;;  %v1532_v17 = vsel %vm1423_vm1, %v7171_v8, 0.0 }
 0x2cc   :  { %v7176_v36 = vsub.f32 %v9915_v52, %v1604_v55  ;;  %v7179_v48 = vsub.f32 %v6910_v40, %v1604_v55  ;;  %v1533_v44 = vadd.f32 %v1532_v17, %v6717_v30  ;;  %v1275_v62 = vadd.f32 %v1274_v51, %v1160_v15  ;;  %v1165_v51 = vpop.f32.mrf.mxu3 }
 0x2ce   :  { %1534 = vadd.xlane.f32.xlu0 %v1533_v44  ;;  %v1742_v41 = vmul.f32 %v7176_v36, %v7176_v36  ;;  %v1743_v32 = vmul.f32 %v7179_v48, %v7179_v48 }
 0x2d0   :  { %v1388_v21 = vpop.f32.mrf.mxu0  ;;  %v1850_v24 = vsel %vm1423_vm1, %v1743_v32, 0.0 }
 0x2d1   :  { %v1479_v25 = vpop.xlane.xlu1 %1478  ;;  %v1851_v38 = vadd.f32 %v1850_v24, %v1742_v41  ;;  %v7187_v52 = vadd.f32 %v1388_v21, %v1275_v62 }
 0x2d2   :  { %v1605_v57 = vmul.f32 0.0051020407, %v1479_v25 }
 0x2d3   :  { %1852 = vadd.xlane.f32.xlu2 %v1851_v38  ;;  %v1276_v40 = vpop.f32.mrf.mxu2  ;;  %v1536_v62 = vsel %vm1423_vm1, %v7187_v52, 0.0 }
 0x2d4   :  { %v7190_v55 = vsub.f32 %v9920_v50, %v1605_v57  ;;  %v7193_v15 = vsub.f32 %v6927_v56, %v1605_v57  ;;  %v1277_v17 = vadd.f32 %v1276_v40, %v1162_v1  ;;  %v1537_v25 = vadd.f32 %v1536_v62, %v6724_v4  ;;  %v1167_v62 = vpop.f32.mrf.mxu3 }
 0x2d6   :  { %v1744_v44 = vmul.f32 %v7190_v55, %v7190_v55  ;;  %v1745_v32 = vmul.f32 %v7193_v15, %v7193_v15 }
 0x2d8   :  { %v1390_v41 = vpop.f32.mrf.mxu0  ;;  %v1854_v21 = vsel %vm1423_vm1, %v1745_v32, 0.0 }
 0x2d9   :  { %v1483_v24 = vpop.xlane.xlu1 %1482  ;;  %v1855_v50 = vadd.f32 %v1854_v21, %v1744_v44  ;;  %v7203_v56 = vadd.f32 %v1390_v41, %v1277_v17 }
 0x2da   :  { %v1606_v57 = vmul.f32 0.0051020407, %v1483_v24 }
 0x2db   :  { %1856 = vadd.xlane.f32.xlu0 %v1855_v50  ;;  %1538 = vadd.xlane.f32.xlu2 %v1537_v25  ;;  %v1279_v1 = vpop.f32.mrf.mxu2  ;;  %v1540_v17 = vsel %vm1423_vm1, %v7203_v56, 0.0 }
 0x2dc   :  { %v7206_v38 = vsub.f32 %v9925_v14, %v1606_v57  ;;  %v7209_v40 = vsub.f32 %v6940_v26, %v1606_v57  ;;  %v1280_v42 = vadd.f32 %v1279_v1, %v1165_v51  ;;  %v1541_v26 = vadd.f32 %v1540_v17, %v6740_v7 }
 0x2de   :  { %9957 = vst [vmem:[#allocation33_spill] sm:$0xff] %v7206_v38  ;;  %v1746_v32 = vmul.f32 %v7206_v38, %v7206_v38  ;;  %v1747_v44 = vmul.f32 %v7209_v40, %v7209_v40 }
 0x2df   :  { %9958 = vst [vmem:[#allocation32_spill] sm:$0xff] %v7209_v40 }
 0x2e0   :  { %v1393_v41 = vpop.f32.mrf.mxu0  ;;  %v1858_v21 = vsel %vm1423_vm1, %v1747_v44, 0.0 }
 0x2e1   :  { %v7218_v24 = vadd.f32 %v1393_v41, %v1280_v42  ;;  %v1487_v14 = vpop.xlane.xlu1 %1486  ;;  %v1859_v50 = vadd.f32 %v1858_v21, %v1746_v32 }
 0x2e2   :  { %v1607_v51 = vmul.f32 0.0051020407, %v1487_v14  ;;  %v1170_v14 = vpop.f32.mrf.mxu3 }
 0x2e3   :  { %1860 = vadd.xlane.f32.xlu1 %v1859_v50  ;;  %1542 = vadd.xlane.f32.xlu2 %v1541_v26  ;;  %v1281_v25 = vpop.f32.mrf.mxu2  ;;  %v1544_v57 = vsel %vm1423_vm1, %v7218_v24, 0.0 }
 0x2e4   :  { %v7224_v1 = vsub.f32 %v9931_v54, %v1607_v51  ;;  %v7227_v40 = vsub.f32 %v6955_v9, %v1607_v51  ;;  %v1545_v42 = vadd.f32 %v1544_v57, %v6744_v6  ;;  %v1282_v44 = vadd.f32 %v1281_v25, %v1167_v62 }
 0x2e6   :  { %1546 = vadd.xlane.f32.xlu0 %v1545_v42  ;;  %v1748_v32 = vmul.f32 %v7224_v1, %v7224_v1  ;;  %v1749_v17 = vmul.f32 %v7227_v40, %v7227_v40  ;;  %v7235_v50 = vpop.xlane.xlu2 %1804 }
 0x2e8   :  { %v1395_v41 = vpop.f32.mrf.mxu0  ;;  %v1862_v21 = vsel %vm1423_vm1, %v1749_v17, 0.0 }
 0x2e9   :  { %v7237_v54 = vadd.f32 %v1395_v41, %v1282_v44  ;;  %v1491_v9 = vpop.xlane.xlu1 %1490  ;;  %v1863_v26 = vadd.f32 %v1862_v21, %v1748_v32 }
 0x2ea   :  { %v1608_v51 = vmul.f32 0.0051020407, %v1491_v9 }
 0x2eb   :  { %1864 = vadd.xlane.f32.xlu2 %v1863_v26  ;;  %v1284_v62 = vpop.f32.mrf.mxu2  ;;  %v1548_v25 = vsel %vm1423_vm1, %v7237_v54, 0.0 }
 0x2ec   :  { %v7242_v57 = vsub.f32 %v9936_v34, %v1608_v51  ;;  %v7245_v42 = vsub.f32 %v6973_v35, %v1608_v51  ;;  %v1549_v17 = vadd.f32 %v1548_v25, %v6754_v19  ;;  %v1285_v38 = vadd.f32 %v1284_v62, %v1170_v14 }
 0x2ee   :  { %9959 = vst [vmem:[#allocation34_spill] sm:$0xff] %v7242_v57  ;;  %1550 = vadd.xlane.f32.xlu0 %v1549_v17  ;;  %v1751_v44 = vmul.f32 %v7245_v42, %v7245_v42  ;;  %v1750_v41 = vmul.f32 %v7242_v57, %v7242_v57  ;;  %v7252_v21 = vpop.xlane.xlu0 %1808 }
 0x2ef   :  { %9960 = vst [vmem:[#allocation52_spill] sm:$0xff] %v7245_v42 }
 0x2f0   :  { %v1398_v32 = vpop.f32.mrf.mxu0  ;;  %v1866_v26 = vsel %vm1423_vm1, %v1751_v44, 0.0 }
 0x2f1   :  { %v7254_v9 = vadd.f32 %v1398_v32, %v1285_v38  ;;  %v1495_v34 = vpop.xlane.xlu2 %1494  ;;  %v1867_v62 = vadd.f32 %v1866_v26, %v1750_v41 }
 0x2f2   :  { %v1609_v35 = vmul.f32 0.0051020407, %v1495_v34 }
 0x2f3   :  { %9961 = vst [vmem:[#allocation53_spill] sm:$0xff] %v7254_v9 }
 0x2f4   :  { %v7258_v51 = vsub.f32 %v9940_v49, %v1609_v35  ;;  %v7261_v14 = vsub.f32 %v6996_v58, %v1609_v35 }
 0x2f6   :  { %9962 = vst [vmem:[#allocation54_spill] sm:$0xff] %v7258_v51  ;;  %1868 = vadd.xlane.f32.xlu0 %v1867_v62  ;;  %v1752_v25 = vmul.f32 %v7258_v51, %v7258_v51  ;;  %v1753_v17 = vmul.f32 %v7261_v14, %v7261_v14  ;;  %v7268_v32 = vpop.xlane.xlu1 %1812 }
 0x2f7   :  { %9963 = vst [vmem:[#allocation55_spill] sm:$0xff] %v7261_v14 }
 0x2f8   :  { %v1870_v38 = vsel %vm1423_vm1, %v1753_v17, 0.0 }
 0x2f9   :  { %v1499_v44 = vpop.xlane.xlu0 %1498  ;;  %v1871_v34 = vadd.f32 %v1870_v38, %v1752_v25 }
 0x2fa   :  { %v1610_v42 = vmul.f32 0.0051020407, %v1499_v44 }
 0x2fb   :  { %1872 = vadd.xlane.f32.xlu1 %v1871_v34 }
 0x2fc   :  { %v7271_v49 = vsub.f32 %v9944_v2, %v1610_v42  ;;  %v7274_v58 = vsub.f32 %v7013_v0, %v1610_v42 }
 0x2fe   :  { %9964 = vst [vmem:[#allocation56_spill] sm:$0xff] %v7271_v49  ;;  %v1754_v41 = vmul.f32 %v7271_v49, %v7271_v49  ;;  %v1755_v26 = vmul.f32 %v7274_v58, %v7274_v58  ;;  %v7281_v62 = vpop.xlane.xlu2 %1816 }
 0x2ff   :  { %9965 = vst [vmem:[#allocation57_spill] sm:$0xff] %v7274_v58 }
 0x300   :  { %v1874_v35 = vsel %vm1423_vm1, %v1755_v26, 0.0 }
 0x301   :  { %v1503_v17 = vpop.xlane.xlu1 %1502  ;;  %v1875_v25 = vadd.f32 %v1874_v35, %v1754_v41 }
 0x302   :  { %v1611_v38 = vmul.f32 0.0051020407, %v1503_v17 }
 0x303   :  { %1876 = vadd.xlane.f32.xlu2 %v1875_v25 }
 0x304   :  { %v7284_v2 = vsub.f32 %v9946_v22, %v1611_v38  ;;  %v7287_v0 = vsub.f32 %v7034_v33, %v1611_v38 }
 0x306   :  { %9966 = vst [vmem:[#allocation58_spill] sm:$0xff] %v7284_v2  ;;  %v1821_v42 = vpop.xlane.xlu0 %1820  ;;  %v1756_v44 = vmul.f32 %v7284_v2, %v7284_v2  ;;  %v1757_v34 = vmul.f32 %v7287_v0, %v7287_v0 }
 0x307   :  { %9967 = vst [vmem:[#allocation59_spill] sm:$0xff] %v7287_v0  ;;  %v1974_v26 = vmul.f32 0.0051020407, %v1821_v42 }
 0x308   :  { %v1878_v14 = vsel %vm1423_vm1, %v1757_v34, 0.0 }
 0x309   :  { %v2016_v51 = vadd.f32 1e-05, %v1974_v26  ;;  %v1507_v41 = vpop.xlane.xlu2 %1506  ;;  %v1879_v35 = vadd.f32 %v1878_v14, %v1756_v44 }
 0x30a   :  { %v1612_v17 = vmul.f32 0.0051020407, %v1507_v41 }
 0x30b   :  { %5644 = vrsqrt.f32 %v2016_v51  ;;  %1880 = vadd.xlane.f32.xlu0 %v1879_v35  ;;  %vm2100_vm3 = vweird.f32 %v2016_v51 }
 0x30c   :  { %v7295_v22 = vsub.f32 %v9949_v53, %v1612_v17  ;;  %v7298_v33 = vsub.f32 %v7051_v39, %v1612_v17 }
 0x30e   :  { %9968 = vst [vmem:[#allocation60_spill] sm:$0xff] %v7295_v22  ;;  %v1825_v25 = vpop.xlane.xlu1 %1824  ;;  %v1758_v38 = vmul.f32 %v7295_v22, %v7295_v22  ;;  %v1759_v42 = vmul.f32 %v7298_v33, %v7298_v33 }
 0x30f   :  { %v1975_v34 = vmul.f32 0.0051020407, %v1825_v25 }
 0x310   :  { %v1882_v26 = vsel %vm1423_vm1, %v1759_v42, 0.0 }
 0x311   :  { %v5645_v14 = vpop.eup %5644  ;;  %v7305_v44 = vadd.f32 1e-05, %v1975_v34  ;;  %v1511_v41 = vpop.xlane.xlu0 %1510  ;;  %v1883_v35 = vadd.f32 %v1882_v26, %v1758_v38 }
 0x312   :  { %v1613_v53 = vmul.f32 0.0051020407, %v1511_v41  ;;  %v2095_v57 = vmul.f32 %v5645_v14, %v2016_v51  ;;  %vm2101_vm2 = vweird.f32 %v5645_v14 }
 0x313   :  { %1884 = vadd.xlane.f32.xlu1 %v1883_v35  ;;  %5646 = vrsqrt.f32 %v7305_v44  ;;  %vm2102_vm4 = vmor %vm2100_vm3, %vm2101_vm2  ;;  %vm2110_vm6 = vweird.f32 %v7305_v44 }
 0x314   :  { %v7308_v39 = vsub.f32 %v9950_v59, %v1613_v53  ;;  %v7311_v17 = vsub.f32 %v7070_v5, %v1613_v53  ;;  %v2096_v34 = vmul.f32 %v5645_v14, %v2095_v57 }
 0x316   :  { %9969 = vst [vmem:[#allocation61_spill] sm:$0xff] %v7308_v39  ;;  %v1829_v2 = vpop.xlane.xlu2 %1828  ;;  %v1760_v25 = vmul.f32 %v7308_v39, %v7308_v39  ;;  %v1761_v42 = vmul.f32 %v7311_v17, %v7311_v17  ;;  %v2097_v53 = vmul.f32 0.5, %v2096_v34 }
 0x317   :  { %v1976_v38 = vmul.f32 0.0051020407, %v1829_v2 }
 0x318   :  { %v1886_v26 = vsel %vm1423_vm1, %v1761_v42, 0.0 }
 0x319   :  { %v7319_v41 = vadd.f32 1e-05, %v1976_v38  ;;  %v1515_v59 = vpop.xlane.xlu1 %1514  ;;  %v1887_v35 = vadd.f32 %v1886_v26, %v1760_v25  ;;  %v5647_v5 = vpop.eup %5646  ;;  %v2098_v38 = vsub.f32 1.5, %v2097_v53  ;;  %v2478_v53 = vld [vmem:[%s9706_s3 + $0x20] sm:$0xff] }
 0x31a   :  { %v1614_v49 = vmul.f32 0.0051020407, %v1515_v59  ;;  %v2105_v57 = vmul.f32 %v5647_v5, %v7305_v44  ;;  %vm2111_vm5 = vweird.f32 %v5647_v5 }
 0x31b   :  { %1888 = vadd.xlane.f32.xlu2 %v1887_v35  ;;  %5648 = vrsqrt.f32 %v7319_v41  ;;  %vm2112_vm7 = vmor %vm2110_vm6, %vm2111_vm5  ;;  %vm2120_vm9 = vweird.f32 %v7319_v41 }
 0x31c   :  { %v7322_v22 = vsub.f32 %v6635_v20, %v1614_v49  ;;  %v7325_v39 = vsub.f32 %v7086_v60, %v1614_v49  ;;  %v2106_v59 = vmul.f32 %v5647_v5, %v2105_v57  ;;  %v2099_v60 = vmul.f32 %v5645_v14, %v2098_v38 }
 0x31e   :  { %9970 = vst [vmem:[#allocation62_spill] sm:$0xff] %v7322_v22  ;;  %v1833_v2 = vpop.xlane.xlu0 %1832  ;;  %v1762_v42 = vmul.f32 %v7322_v22, %v7322_v22  ;;  %v1763_v25 = vmul.f32 %v7325_v39, %v7325_v39  ;;  %v2107_v9 = vmul.f32 0.5, %v2106_v59  ;;  %v2103_v0 = vsel %vm2102_vm4, %v5645_v14, %v2099_v60 }
 0x31f   :  { %v1977_v26 = vmul.f32 0.0051020407, %v1833_v2 }
 0x320   :  { %v1890_v34 = vsel %vm1423_vm1, %v1763_v25, 0.0  ;;  %v2108_v57 = vsub.f32 1.5, %v2107_v9 }
 0x321   :  { %v1891_v20 = vadd.f32 %v1890_v34, %v1762_v42  ;;  %v5649_v35 = vpop.eup %5648  ;;  %v2019_v49 = vadd.f32 1e-05, %v1977_v26 }
 0x322   :  { %v2115_v58 = vmul.f32 %v5649_v35, %v7319_v41  ;;  %v2109_v9 = vmul.f32 %v5647_v5, %v2108_v57  ;;  %vm2121_vm8 = vweird.f32 %v5649_v35 }
 0x323   :  { %1892 = vadd.xlane.f32.xlu0 %v1891_v20  ;;  %5650 = vrsqrt.f32 %v2019_v49  ;;  %v2520_v20 = vmul.f32 %v2478_v53, %v2103_v0  ;;  %vm2122_vm10 = vmor %vm2120_vm9, %vm2121_vm8  ;;  %vm2130_vm12 = vweird.f32 %v2019_v49 }
 0x324   :  { %v2116_v25 = vmul.f32 %v5649_v35, %v2115_v58  ;;  %v2113_v53 = vsel %vm2112_vm7, %v5647_v5, %v2109_v9  ;;  %v2480_v5 = vld [vmem:[%s9706_s3 + $0x30] sm:$0xff] }
 0x326   :  { %v1837_v22 = vpop.xlane.xlu1 %1836  ;;  %v2117_v26 = vmul.f32 0.5, %v2116_v25 }
 0x327   :  { %v1978_v2 = vmul.f32 0.0051020407, %v1837_v22 }
 0x328   :  { %v2118_v0 = vsub.f32 1.5, %v2117_v26 }
 0x329   :  { %v1523_v42 = vpop.xlane.xlu0 %1522  ;;  %v2020_v14 = vadd.f32 1e-05, %v1978_v2  ;;  %v5651_v58 = vpop.eup %5650  ;;  %v2479_v2 = vld [vmem:[%s9706_s3 + $0x28] sm:$0xff] }
 0x32a   :  { %v1616_v34 = vmul.f32 0.0051020407, %v1523_v42  ;;  %v2125_v60 = vmul.f32 %v5651_v58, %v2019_v49  ;;  %v2521_v42 = vmul.f32 %v2479_v2, %v2113_v53  ;;  %v2119_v57 = vmul.f32 %v5649_v35, %v2118_v0 }
 0x32b   :  { %5652 = vrsqrt.f32 %v2020_v14  ;;  %vm2131_vm11 = vweird.f32 %v5651_v58  ;;  %vm2140_vm15 = vweird.f32 %v2020_v14 }
 0x32c   :  { %v7339_v51 = vsub.f32 %v6674_v23, %v1616_v34  ;;  %v7342_v38 = vsub.f32 %v7121_v16, %v1616_v34  ;;  %2580 = vperm.xlu1 %5643, %v2520_v20   ;;  %v2126_v25 = vmul.f32 %v5651_v58, %v2125_v60  ;;  %v1519_v20 = vpop.xlane.xlu2 %1518  ;;  %v2123_v26 = vsel %vm2122_vm10, %v5649_v35, %v2119_v57  ;;  %vm2132_vm13 = vmor %vm2130_vm12, %vm2131_vm11  ;;  %v2481_v35 = vld [vmem:[%s9706_s3 + $0x38] sm:$0xff] }
 0x32d   :  { %v1615_v41 = vmul.f32 0.0051020407, %v1519_v20 }
 0x32e   :  { %9971 = vst [vmem:[#allocation63_spill] sm:$0xff] %v7339_v51  ;;  %v1766_v59 = vmul.f32 %v7339_v51, %v7339_v51  ;;  %v1767_v22 = vmul.f32 %v7342_v38, %v7342_v38  ;;  %v2127_v44 = vmul.f32 0.5, %v2126_v25 }
 0x32f   :  { %9972 = vst [vmem:[#allocation64_spill] sm:$0xff] %v7342_v38 }
 0x330   :  { %v1898_v23 = vsel %vm1423_vm1, %v1767_v22, 0.0  ;;  %v2522_v22 = vmul.f32 %v2480_v5, %v2123_v26  ;;  %v2128_v9 = vsub.f32 1.5, %v2127_v44 }
 0x331   :  { %v1899_v16 = vadd.f32 %v1898_v23, %v1766_v59  ;;  %v5653_v34 = vpop.eup %5652  ;;  %v1527_v5 = vpop.xlane.xlu1 %1526 }
 0x332   :  { %v2135_v59 = vmul.f32 %v5653_v34, %v2020_v14  ;;  %v2129_v60 = vmul.f32 %v5651_v58, %v2128_v9  ;;  %vm2141_vm14 = vweird.f32 %v5653_v34 }
 0x333   :  { %1900 = vadd.xlane.f32.xlu2 %v1899_v16  ;;  %vm2142_vm2 = vmor %vm2140_vm15, %vm2141_vm14 }
 0x334   :  { %v2136_v23 = vmul.f32 %v5653_v34, %v2135_v59  ;;  %v1841_v0 = vpop.xlane.xlu2 %1840  ;;  %v2133_v2 = vsel %vm2132_vm13, %v5651_v58, %v2129_v60  ;;  %v7364_v59 = vsub.f32 %v6658_v12, %v1615_v41 }
 0x335   :  { %v2523_v25 = vmul.f32 %v2481_v35, %v2133_v2  ;;  %v1979_v49 = vmul.f32 0.0051020407, %v1841_v0  ;;  %v1617_v2 = vmul.f32 0.0051020407, %v1527_v5 }
 0x336   :  { %v2137_v16 = vmul.f32 0.5, %v2136_v23  ;;  %9973 = vst [vmem:[#allocation65_spill] sm:$0xff] %v7364_v59 }
 0x337   :  { %2585 = vperm.xlu0 %5641, %v2521_v42   ;;  %v7361_v42 = vsub.f32 %v7105_v45, %v1615_v41  ;;  %v2482_v45 = vld [vmem:[%s9706_s3 + $0x40] sm:$0xff]  ;;  %v7373_v9 = vadd.f32 1e-05, %v1979_v49  ;;  %v7391_v49 = vsub.f32 %v7139_v13, %v1617_v2 }
 0x338   :  { %v2138_v53 = vsub.f32 1.5, %v2137_v16  ;;  %v1845_v16 = vpop.xlane.xlu0 %1844 }
 0x339   :  { %v1765_v58 = vmul.f32 %v7361_v42, %v7361_v42  ;;  %5654 = vrsqrt.f32 %v7373_v9  ;;  %v1980_v41 = vmul.f32 0.0051020407, %v1845_v16  ;;  %9976 = vst [vmem:[#allocation68_spill] sm:$0xff] %v7391_v49  ;;  %vm2150_vm4 = vweird.f32 %v7373_v9 }
 0x33a   :  { %v2139_v44 = vmul.f32 %v5653_v34, %v2138_v53 }
 0x33b   :  { %v1894_v23 = vsel %vm1423_vm1, %v1765_v58, 0.0 }
 0x33c   :  { %v1531_v57 = vpop.xlane.xlu2 %1530  ;;  %v2143_v26 = vsel %vm2142_vm2, %v5653_v34, %v2139_v44 }
 0x33d   :  { %v1618_v20 = vmul.f32 0.0051020407, %v1531_v57  ;;  %v2524_v14 = vmul.f32 %v2482_v45, %v2143_v26  ;;  %v7396_v45 = vsub.f32 %v6691_v63, %v1617_v2 }
 0x33f   :  { %2590 = vperm.xlu0 %5641, %v2522_v22   ;;  %v1764_v22 = vmul.f32 %v7364_v59, %v7364_v59  ;;  %v7376_v12 = vsub.f32 %v7155_v11, %v1618_v20  ;;  %v7380_v34 = vsub.f32 %v6698_v29, %v1618_v20  ;;  %v1849_v11 = vpop.xlane.xlu1 %1848  ;;  %v5655_v44 = vpop.eup %5654  ;;  %9977 = vst [vmem:[#allocation69_spill] sm:$0xff] %v7396_v45 }
 0x340   :  { %v1981_v29 = vmul.f32 0.0051020407, %v1849_v11  ;;  %v2145_v26 = vmul.f32 %v5655_v44, %v7373_v9  ;;  %vm2151_vm3 = vweird.f32 %v5655_v44 }
 0x341   :  { %9974 = vst [vmem:[#allocation66_spill] sm:$0xff] %v7376_v12  ;;  %v1895_v60 = vadd.f32 %v1894_v23, %v1764_v22  ;;  %v1771_v53 = vmul.f32 %v7376_v12, %v7376_v12  ;;  %v1770_v35 = vmul.f32 %v7380_v34, %v7380_v34  ;;  %v1535_v22 = vpop.xlane.xlu0 %1534  ;;  %v1769_v23 = vmul.f32 %v7391_v49, %v7391_v49  ;;  %vm2152_vm5 = vmor %vm2150_vm4, %vm2151_vm3 }
 0x342   :  { %9975 = vst [vmem:[#allocation67_spill] sm:$0xff] %v7380_v34  ;;  %v7398_v5 = vadd.f32 1e-05, %v1981_v29  ;;  %v2146_v16 = vmul.f32 %v5655_v44, %v2145_v26 }
 0x343   :  { %v1906_v57 = vsel %vm1423_vm1, %v1771_v53, 0.0  ;;  %v1902_v63 = vsel %vm1423_vm1, %v1769_v23, 0.0  ;;  %v1619_v23 = vmul.f32 0.0051020407, %v1535_v22 }
 0x344   :  { %v1907_v20 = vadd.f32 %v1906_v57, %v1770_v35  ;;  %v2147_v2 = vmul.f32 0.5, %v2146_v16  ;;  %vm2170_vm10 = vweird.f32 %v7398_v5 }
 0x345   :  { %v7439_v49 = vsub.f32 %v6717_v30, %v1619_v23 }
 0x346   :  { %v1853_v0 = vpop.xlane.xlu2 %1852 }
 0x347   :  { %9981 = vst [vmem:[#allocation73_spill] sm:$0xff] %v7439_v49  ;;  %v1772_v30 = vmul.f32 %v7439_v49, %v7439_v49 }
 0x34b   :  { %2595 = vperm.xlu2 %5642, %v2523_v25   ;;  %v7387_v25 = vadd.f32 1e-05, %v1980_v41  ;;  %v1768_v41 = vmul.f32 %v7396_v45, %v7396_v45 }
 0x34d   :  { %5656 = vrsqrt.f32 %v7387_v25  ;;  %v1903_v29 = vadd.f32 %v1902_v63, %v1768_v41  ;;  %v7432_v63 = vsub.f32 %v7171_v8, %v1619_v23  ;;  %v2483_v8 = vld [vmem:[%s9706_s3 + $0x48] sm:$0xff]  ;;  %vm2160_vm7 = vweird.f32 %v7387_v25 }
 0x34e   :  { %v1539_v58 = vpop.xlane.xlu2 %1538  ;;  %5658 = vrsqrt.f32 %v7398_v5 }
 0x34f   :  { %9980 = vst [vmem:[#allocation72_spill] sm:$0xff] %v7432_v63  ;;  %v1773_v9 = vmul.f32 %v7432_v63, %v7432_v63 }
 0x353   :  { %2600 = vperm.xlu2 %5642, %v2524_v14   ;;  %v1620_v14 = vmul.f32 0.0051020407, %v1539_v58  ;;  %v7402_v13 = vpop.eup %5656 }
 0x354   :  { %v2155_v11 = vmul.f32 %v7402_v13, %v7387_v25  ;;  %v7420_v58 = vpop.eup %5658  ;;  %vm2161_vm6 = vweird.f32 %v7402_v13 }
 0x355   :  { %v7408_v53 = vsub.f32 %v7187_v52, %v1620_v14  ;;  %v7416_v57 = vsub.f32 %v6724_v4, %v1620_v14  ;;  %v2148_v52 = vsub.f32 1.5, %v2147_v2  ;;  %v2165_v4 = vmul.f32 %v7420_v58, %v7398_v5  ;;  %vm2162_vm8 = vmor %vm2160_vm7, %vm2161_vm6 }
 0x356   :  { %1896 = vadd.xlane.f32.xlu1 %v1895_v60  ;;  %v1982_v60 = vmul.f32 0.0051020407, %v1853_v0  ;;  %v2156_v26 = vmul.f32 %v7402_v13, %v2155_v11  ;;  %vm2171_vm9 = vweird.f32 %v7420_v58 }
 0x357   :  { %9978 = vst [vmem:[#allocation70_spill] sm:$0xff] %v7408_v53  ;;  %v1775_v0 = vmul.f32 %v7408_v53, %v7408_v53  ;;  %v1774_v16 = vmul.f32 %v7416_v57, %v7416_v57  ;;  %v2149_v2 = vmul.f32 %v5655_v44, %v2148_v52  ;;  %v2166_v22 = vmul.f32 %v7420_v58, %v2165_v4  ;;  %vm2172_vm11 = vmor %vm2170_vm10, %vm2171_vm9 }
 0x358   :  { %v7413_v35 = vadd.f32 1e-05, %v1982_v60  ;;  %9979 = vst [vmem:[#allocation71_spill] sm:$0xff] %v7416_v57  ;;  %v7429_v60 = vpop.xlane.xlu2 %1542  ;;  %v2157_v41 = vmul.f32 0.5, %v2156_v26 }
 0x359   :  { %v1914_v14 = vsel %vm1423_vm1, %v1775_v0, 0.0  ;;  %v2153_v26 = vsel %vm2152_vm5, %v5655_v44, %v2149_v2  ;;  %v1910_v44 = vsel %vm1423_vm1, %v1773_v9, 0.0 }
 0x35a   :  { %5660 = vrsqrt.f32 %v7413_v35  ;;  %v1915_v11 = vadd.f32 %v1914_v14, %v1774_v16  ;;  %v2158_v0 = vsub.f32 1.5, %v2157_v41  ;;  %v2167_v16 = vmul.f32 0.5, %v2166_v22 }
 0x35b   :  { %v2525_v14 = vmul.f32 %v2483_v8, %v2153_v26  ;;  %vm2180_vm13 = vweird.f32 %v7413_v35 }
 0x35c   :  { %v2159_v23 = vmul.f32 %v7402_v13, %v2158_v0 }
 0x35e   :  { %1908 = vadd.xlane.f32.xlu1 %v1907_v20  ;;  %v1857_v20 = vpop.xlane.xlu0 %1856  ;;  %v2163_v0 = vsel %vm2162_vm8, %v7402_v13, %v2159_v23  ;;  %v2485_v23 = vld [vmem:[%s9706_s3 + $0x58] sm:$0xff] }
 0x35f   :  { %v1983_v12 = vmul.f32 0.0051020407, %v1857_v20 }
 0x360   :  { %v7436_v38 = vpop.eup %5660  ;;  %v1865_v2 = vpop.xlane.xlu2 %1864 }
 0x361   :  { %v2175_v4 = vmul.f32 %v7436_v38, %v7413_v35  ;;  %v7451_v20 = vadd.f32 1e-05, %v1983_v12  ;;  %v1985_v26 = vmul.f32 0.0051020407, %v1865_v2  ;;  %vm2181_vm12 = vweird.f32 %v7436_v38 }
 0x362   :  { %vm2182_vm14 = vmor %vm2180_vm13, %vm2181_vm12 }
 0x363   :  { %v2176_v22 = vmul.f32 %v7436_v38, %v2175_v4  ;;  %5662 = vrsqrt.f32 %v7451_v20  ;;  %vm2190_vm2 = vweird.f32 %v7451_v20 }
 0x365   :  { %v2177_v8 = vmul.f32 0.5, %v2176_v22 }
 0x369   :  { %1904 = vadd.xlane.f32.xlu0 %v1903_v29  ;;  %v1547_v29 = vpop.xlane.xlu0 %1546 }
 0x36a   :  { %v1622_v52 = vmul.f32 0.0051020407, %v1547_v29  ;;  %v1911_v29 = vadd.f32 %v1910_v44, %v1772_v30  ;;  %v2178_v30 = vsub.f32 1.5, %v2177_v8  ;;  %v2486_v8 = vld [vmem:[%s9706_s3 + $0x60] sm:$0xff] }
 0x36c   :  { %v7456_v41 = vsub.f32 %v7218_v24, %v1622_v52  ;;  %v7462_v12 = vsub.f32 %v6744_v6, %v1622_v52  ;;  %v2484_v24 = vld [vmem:[%s9706_s3 + $0x50] sm:$0xff]  ;;  %v2027_v6 = vadd.f32 1e-05, %v1985_v26 }
 0x36e   :  { %9982 = vst [vmem:[#allocation74_spill] sm:$0xff] %v7456_v41  ;;  %v1779_v25 = vmul.f32 %v7456_v41, %v7456_v41  ;;  %v1778_v13 = vmul.f32 %v7462_v12, %v7462_v12  ;;  %5664 = vrsqrt.f32 %v2027_v6  ;;  %vm2210_vm5 = vweird.f32 %v2027_v6 }
 0x36f   :  { %9983 = vst [vmem:[#allocation75_spill] sm:$0xff] %v7462_v12  ;;  %v2852_v12 = vld [vmem:[%s9705_s4] sm:$0xff] }
 0x370   :  { %v1922_v4 = vsel %vm1423_vm1, %v1779_v25, 0.0 }
 0x371   :  { %1916 = vadd.xlane.f32.xlu0 %v1915_v11  ;;  %v2168_v11 = vsub.f32 1.5, %v2167_v16  ;;  %v2526_v16 = vmul.f32 %v2484_v24, %v2163_v0  ;;  %v1923_v5 = vadd.f32 %v1922_v4, %v1778_v13  ;;  %v1551_v0 = vpop.xlane.xlu0 %1550 }
 0x373   :  { %v2169_v9 = vmul.f32 %v7420_v58, %v2168_v11 }
 0x375   :  { %v2173_v44 = vsel %vm2172_vm11, %v7420_v58, %v2169_v9  ;;  %v1861_v9 = vpop.xlane.xlu1 %1860 }
 0x376   :  { %v1877_v52 = vpop.xlane.xlu2 %1876  ;;  %v2527_v22 = vmul.f32 %v2485_v23, %v2173_v44  ;;  %v1984_v23 = vmul.f32 0.0051020407, %v1861_v9  ;;  %v1621_v9 = vmul.f32 0.0051020407, %v7429_v60 }
 0x377   :  { %2605 = vperm.xlu1 %5643, %v2525_v14   ;;  %v5663_v14 = vpop.eup %5662  ;;  %v1988_v2 = vmul.f32 0.0051020407, %v1877_v52 }
 0x378   :  { %v2185_v11 = vmul.f32 %v5663_v14, %v7451_v20  ;;  %v5665_v24 = vpop.eup %5664  ;;  %vm2191_vm15 = vweird.f32 %v5663_v14 }
 0x379   :  { %v7484_v26 = vadd.f32 1e-05, %v1988_v2  ;;  %v2205_v13 = vmul.f32 %v5665_v24, %v2027_v6  ;;  %v7493_v44 = vpop.xlane.xlu0 %1868  ;;  %vm2192_vm3 = vmor %vm2190_vm2, %vm2191_vm15  ;;  %vm2211_vm4 = vweird.f32 %v5665_v24 }
 0x37a   :  { %v2186_v58 = vmul.f32 %v5663_v14, %v2185_v11  ;;  %vm2212_vm6 = vmor %vm2210_vm5, %vm2211_vm4 }
 0x37b   :  { %5666 = vrsqrt.f32 %v7484_v26  ;;  %v2206_v4 = vmul.f32 %v5665_v24, %v2205_v13  ;;  %vm2240_vm8 = vweird.f32 %v7484_v26 }
 0x37c   :  { %1912 = vadd.xlane.f32.xlu2 %v1911_v29  ;;  %v2179_v29 = vmul.f32 %v7436_v38, %v2178_v30 }
 0x37d   :  { %v7495_v2 = vpop.xlane.xlu1 %1872 }
 0x37e   :  { %v2183_v25 = vsel %vm2182_vm14, %v7436_v38, %v2179_v29  ;;  %v2207_v38 = vmul.f32 0.5, %v2206_v4  ;;  %v7509_v4 = vsub.f32 %v7203_v56, %v1621_v9 }
 0x37f   :  { %2610 = vperm.xlu1 %5643, %v2526_v16   ;;  %v2187_v16 = vmul.f32 0.5, %v2186_v58  ;;  %v2528_v52 = vmul.f32 %v2486_v8, %v2183_v25  ;;  %v2487_v8 = vld [vmem:[%s9706_s3 + $0x68] sm:$0xff] }
 0x380   :  { %v2208_v29 = vsub.f32 1.5, %v2207_v38  ;;  %9984 = vst [vmem:[#allocation76_spill] sm:$0xff] %v7509_v4 }
 0x381   :  { %v2188_v35 = vsub.f32 1.5, %v2187_v16  ;;  %v7491_v30 = vpop.eup %5666  ;;  %v1881_v16 = vpop.xlane.xlu0 %1880 }
 0x382   :  { %v1989_v60 = vmul.f32 0.0051020407, %v1881_v16  ;;  %vm2241_vm7 = vweird.f32 %v7491_v30 }
 0x383   :  { %v2189_v11 = vmul.f32 %v5663_v14, %v2188_v35  ;;  %v2209_v35 = vmul.f32 %v5665_v24, %v2208_v29  ;;  %v1777_v29 = vmul.f32 %v7509_v4, %v7509_v4  ;;  %vm7535_vm9 = vmor %vm2240_vm8, %vm2241_vm7 }
 0x384   :  { %1924 = vadd.xlane.f32.xlu2 %v1923_v5  ;;  %v2235_v5 = vmul.f32 %v7491_v30, %v7484_v26 }
 0x385   :  { %2615 = vperm.xlu0 %5641, %v2527_v22   ;;  %v7500_v22 = vadd.f32 1e-05, %v1984_v23  ;;  %v2193_v25 = vsel %vm2192_vm3, %v5663_v14, %v2189_v11  ;;  %v7512_v23 = vsub.f32 %v6740_v7, %v1621_v9  ;;  %v2489_v11 = vld [vmem:[%s9706_s3 + $0x78] sm:$0xff]  ;;  %v7522_v7 = vadd.f32 1e-05, %v1989_v60 }
 0x386   :  { %v2236_v58 = vmul.f32 %v7491_v30, %v2235_v5  ;;  %v1885_v13 = vpop.xlane.xlu1 %1884  ;;  %v2213_v5 = vsel %vm2212_vm6, %v5665_v24, %v2209_v35  ;;  %v1623_v60 = vmul.f32 0.0051020407, %v1551_v0 }
 0x387   :  { %5668 = vrsqrt.f32 %v7500_v22  ;;  %9985 = vst [vmem:[#allocation77_spill] sm:$0xff] %v7512_v23  ;;  %v1776_v24 = vmul.f32 %v7512_v23, %v7512_v23  ;;  %vm2200_vm11 = vweird.f32 %v7500_v22  ;;  %vm2250_vm15 = vweird.f32 %v7522_v7 }
 0x388   :  { %v2237_v20 = vmul.f32 0.5, %v2236_v58  ;;  %5670 = vrsqrt.f32 %v7522_v7 }
 0x38a   :  { %v2238_v38 = vsub.f32 1.5, %v2237_v20 }
 0x38c   :  { %v2239_v9 = vmul.f32 %v7491_v30, %v2238_v38 }
 0x38d   :  { %2620 = vperm.xlu0 %5641, %v2528_v52   ;;  %v2529_v52 = vmul.f32 %v2487_v8, %v2193_v25  ;;  %v7519_v58 = vpop.eup %5668  ;;  %v2531_v8 = vmul.f32 %v2489_v11, %v2213_v5  ;;  %v1990_v11 = vmul.f32 0.0051020407, %v1885_v13 }
 0x38e   :  { %v1889_v14 = vpop.xlane.xlu2 %1888  ;;  %v2195_v16 = vmul.f32 %v7519_v58, %v7500_v22  ;;  %v2243_v26 = vsel %vm7535_vm9, %v7491_v30, %v2239_v9  ;;  %v3197_v30 = vld [vmem:[%s9707_s1 + $0x48] sm:$0xff]  ;;  %vm2201_vm10 = vweird.f32 %v7519_v58 }
 0x38f   :  { %v1991_v56 = vmul.f32 0.0051020407, %v1889_v14  ;;  %v7566_v5 = vadd.f32 1e-05, %v1990_v11  ;;  %vm2202_vm12 = vmor %vm2200_vm11, %vm2201_vm10 }
 0x390   :  { %v2196_v0 = vmul.f32 %v7519_v58, %v2195_v16 }
 0x391   :  { %v7531_v20 = vadd.f32 1e-05, %v1991_v56  ;;  %vm2260_vm7 = vweird.f32 %v7566_v5 }
 0x392   :  { %v2197_v11 = vmul.f32 0.5, %v2196_v0 }
 0x393   :  { %5672 = vrsqrt.f32 %v7531_v20  ;;  %vm2270_vm3 = vweird.f32 %v7531_v20 }
 0x394   :  { %5674 = vrsqrt.f32 %v7566_v5 }
 0x396   :  { %v1893_v25 = vpop.xlane.xlu0 %1892 }
 0x39c   :  { %2625 = vperm.xlu2 %5642, %v2529_v52   ;;  %v1918_v52 = vsel %vm1423_vm1, %v1777_v29, 0.0  ;;  %v9988_v29 = vld [vmem:[#allocation16_spill] sm:$0xff] }
 0x39e   :  { %v2581_v6 = vpop.permute.xlu1 %2580 }
 0x39f   :  { %v2776_v35 = vmul.f32 %v2581_v6, %v7039_v46  ;;  %v2777_v14 = vmul.f32 %v2581_v6, %v7042_v37  ;;  %v2492_v46 = vld [vmem:[%s9706_s3 + $0x90] sm:$0xff]  ;;  %v1992_v37 = vmul.f32 0.0051020407, %v1893_v25  ;;  %v9990_v25 = vld [vmem:[#allocation27_spill] sm:$0xff] }
 0x3a0   :  { %v2534_v16 = vmul.f32 %v2492_v46, %v2243_v26  ;;  %v9992_v26 = vld [vmem:[#allocation19_spill] sm:$0xff] }
 0x3a1   :  { %v3112_v56 = vadd.f32 %v9988_v29, %v2776_v35  ;;  %v3113_v6 = vadd.f32 %v9988_v29, %v2777_v14  ;;  %v3196_v35 = vld [vmem:[%s9707_s1 + $0x40] sm:$0xff]  ;;  %v7564_v14 = vsub.f32 %v6754_v19, %v1623_v60 }
 0x3a3   :  { %9991 = vst [vmem:[#allocation27_spill] sm:$0xff] %v7564_v14  ;;  %v3281_v19 = vadd.f32 %v3197_v30, %v3113_v6  ;;  %v3203_v30 = vld [vmem:[%s9707_s1 + $0x78] sm:$0xff] }
 0x3a4   :  { %2635 = vperm.xlu2 %5642, %v2531_v8   ;;  %v1919_v8 = vadd.f32 %v1918_v52, %v1776_v24  ;;  %v7553_v24 = vsub.f32 %v7237_v54, %v1623_v60  ;;  %v3199_v54 = vld [vmem:[%s9707_s1 + $0x58] sm:$0xff]  ;;  %v3280_v60 = vadd.f32 %v3196_v35, %v3112_v56 }
 0x3a6   :  { %v7539_v38 = vpop.xlane.xlu2 %1900  ;;  %9989 = vst [vmem:[#allocation16_spill] sm:$0xff] %v7553_v24  ;;  %v1781_v53 = vmul.f32 %v7553_v24, %v7553_v24 }
 0x3a9   :  { %1920 = vadd.xlane.f32.xlu1 %v1919_v8  ;;  %v2586_v13 = vpop.permute.xlu0 %2585  ;;  %v7574_v8 = vadd.f32 1e-05, %v1992_v37 }
 0x3aa   :  { %v2778_v9 = vmul.f32 %v2586_v13, %v7058_v43  ;;  %v2779_v52 = vmul.f32 %v2586_v13, %v9990_v25  ;;  %v3198_v43 = vld [vmem:[%s9707_s1 + $0x50] sm:$0xff]  ;;  %v7578_v13 = vpop.eup %5670 }
 0x3ab   :  { %v7582_v41 = vpop.eup %5672  ;;  %v2245_v0 = vmul.f32 %v7578_v13, %v7522_v7  ;;  %5676 = vrsqrt.f32 %v7574_v8  ;;  %vm2251_vm13 = vweird.f32 %v7578_v13  ;;  %v2495_v7 = vld [vmem:[%s9706_s3 + $0xa8] sm:$0xff]  ;;  %vm2280_vm9 = vweird.f32 %v7574_v8 }
 0x3ac   :  { %v3114_v46 = vadd.f32 %v9992_v26, %v2778_v9  ;;  %v3115_v29 = vadd.f32 %v9992_v26, %v2779_v52  ;;  %2650 = vperm.xlu2 %5642, %v2534_v16   ;;  %v1780_v52 = vmul.f32 %v7564_v14, %v7564_v14  ;;  %v9993_v16 = vld [vmem:[#allocation13_spill] sm:$0xff]  ;;  %v2265_v26 = vmul.f32 %v7582_v41, %v7531_v20  ;;  %vm2252_vm2 = vmor %vm2250_vm15, %vm2251_vm13 }
 0x3ad   :  { %v2246_v59 = vmul.f32 %v7578_v13, %v2245_v0  ;;  %vm2271_vm14 = vweird.f32 %v7582_v41 }
 0x3ae   :  { %v3283_v25 = vadd.f32 %v3199_v54, %v3115_v29  ;;  %v2596_v63 = vpop.permute.xlu2 %2595  ;;  %v3282_v4 = vadd.f32 %v3198_v43, %v3114_v46  ;;  %v3365_v43 = vmax.f32 %v3281_v19, 0.0  ;;  %v1926_v29 = vsel %vm1423_vm1, %v1781_v53, 0.0  ;;  %vm2272_vm4 = vmor %vm2270_vm3, %vm2271_vm14 }
 0x3af   :  { %v2782_v37 = vmul.f32 %v2596_v63, %v7093_v27  ;;  %v2783_v9 = vmul.f32 %v2596_v63, %v7096_v10  ;;  %v3202_v10 = vld [vmem:[%s9707_s1 + $0x70] sm:$0xff]  ;;  %v3364_v63 = vmax.f32 %v3280_v60, 0.0  ;;  %v2198_v53 = vsub.f32 1.5, %v2197_v11 }
 0x3b0   :  { %v3366_v56 = vmax.f32 %v3282_v4, 0.0  ;;  %v3367_v6 = vmax.f32 %v3283_v25, 0.0  ;;  %v3201_v25 = vld [vmem:[%s9707_s1 + $0x68] sm:$0xff]  ;;  %v1927_v51 = vadd.f32 %v1926_v29, %v1780_v52  ;;  %v2266_v34 = vmul.f32 %v7582_v41, %v2265_v26 }
 0x3b1   :  { %v3118_v35 = vadd.f32 %v9993_v16, %v2782_v37  ;;  %v3119_v27 = vadd.f32 %v9993_v16, %v2783_v9  ;;  %v2591_v54 = vpop.permute.xlu0 %2590  ;;  %v3200_v37 = vld [vmem:[%s9707_s1 + $0x60] sm:$0xff]  ;;  %v9994_v16 = vld [vmem:[#allocation12_spill] sm:$0xff]  ;;  %v2199_v0 = vmul.f32 %v7519_v58, %v2198_v53  ;;  %v2493_v53 = vld [vmem:[%s9706_s3 + $0x98] sm:$0xff] }
 0x3b2   :  { %v2780_v4 = vmul.f32 %v2591_v54, %v7075_v31  ;;  %v2781_v46 = vmul.f32 %v2591_v54, %v7078_v28  ;;  %v7611_v9 = vpack.c.bf16 %v3366_v56, %v3364_v63  ;;  %v7613_v19 = vpack.c.bf16 %v3367_v6, %v3365_v43  ;;  %v7617_v54 = vpop.eup %5674 }
 0x3b3   :  { %v3287_v60 = vadd.f32 %v3203_v30, %v3119_v27  ;;  %v3286_v28 = vadd.f32 %v3202_v10, %v3118_v35  ;;  %v7620_v45 = vpop.eup %5676  ;;  %v2247_v35 = vmul.f32 0.5, %v2246_v59  ;;  %v2255_v11 = vmul.f32 %v7617_v54, %v7566_v5  ;;  %v2496_v5 = vld [vmem:[%s9706_s3 + $0xb0] sm:$0xff] }
 0x3b4   :  { %v3116_v24 = vadd.f32 %v9994_v16, %v2780_v4  ;;  %v3117_v31 = vadd.f32 %v9994_v16, %v2781_v46  ;;  %v2267_v52 = vmul.f32 0.5, %v2266_v34  ;;  %v2275_v10 = vmul.f32 %v7620_v45, %v7574_v8  ;;  %v2488_v46 = vld [vmem:[%s9706_s3 + $0x70] sm:$0xff] }
 0x3b5   :  { %v3370_v30 = vmax.f32 %v3286_v28, 0.0  ;;  %v3371_v43 = vmax.f32 %v3287_v60, 0.0  ;;  %v2256_v4 = vmul.f32 %v7617_v54, %v2255_v11  ;;  %v2203_v59 = vsel %vm2202_vm12, %v7519_v58, %v2199_v0  ;;  %v2494_v0 = vld [vmem:[%s9706_s3 + $0xa0] sm:$0xff] }
 0x3b6   :  { %v3285_v56 = vadd.f32 %v3201_v25, %v3117_v31  ;;  %v3284_v63 = vadd.f32 %v3200_v37, %v3116_v24  ;;  %v2268_v34 = vsub.f32 1.5, %v2267_v52  ;;  %v2276_v29 = vmul.f32 %v7620_v45, %v2275_v10 }
 0x3b7   :  { %1928 = vadd.xlane.f32.xlu0 %v1927_v51  ;;  %v2248_v51 = vsub.f32 1.5, %v2247_v35  ;;  %v1994_v25 = vmul.f32 0.0051020407, %v7539_v38  ;;  %v2530_v37 = vmul.f32 %v2488_v46, %v2203_v59  ;;  %v2257_v60 = vmul.f32 0.5, %v2256_v4 }
 0x3b8   :  { %v3368_v6 = vmax.f32 %v3284_v63, 0.0  ;;  %v3369_v27 = vmax.f32 %v3285_v56, 0.0  ;;  %v2277_v16 = vmul.f32 0.5, %v2276_v29  ;;  %v2269_v58 = vmul.f32 %v7582_v41, %v2268_v34 }
 0x3b9   :  { %v2249_v22 = vmul.f32 %v7578_v13, %v2248_v51  ;;  %v7646_v31 = vadd.f32 1e-05, %v1994_v25  ;;  %v2258_v38 = vsub.f32 1.5, %v2257_v60  ;;  %vm2261_vm5 = vweird.f32 %v7617_v54 }
 0x3ba   :  { %v7629_v26 = vpack.c.bf16 %v3370_v30, %v3368_v6  ;;  %v7631_v24 = vpack.c.bf16 %v3371_v43, %v3369_v27  ;;  %v2278_v56 = vsub.f32 1.5, %v2277_v16  ;;  %v2273_v63 = vsel %vm2272_vm4, %v7582_v41, %v2269_v58  ;;  %vm2262_vm8 = vmor %vm2260_vm7, %vm2261_vm5 }
 0x3bb   :  { %v2253_v28 = vsel %vm2252_vm2, %v7578_v13, %v2249_v22  ;;  %5678 = vrsqrt.f32 %v7646_v31  ;;  %v2537_v30 = vmul.f32 %v2495_v7, %v2273_v63  ;;  %v2259_v13 = vmul.f32 %v7617_v54, %v2258_v38 }
 0x3bc   :  { %v2535_v6 = vmul.f32 %v2493_v53, %v2253_v28  ;;  %vm2281_vm6 = vweird.f32 %v7620_v45  ;;  %v2279_v43 = vmul.f32 %v7620_v45, %v2278_v56  ;;  %v2497_v28 = vld [vmem:[%s9706_s3 + $0xb8] sm:$0xff]  ;;  %vm2300_vm15 = vweird.f32 %v7646_v31 }
 0x3bd   :  { %vm2282_vm10 = vmor %vm2280_vm9, %vm2281_vm6  ;;  %v2263_v11 = vsel %vm2262_vm8, %v7617_v54, %v2259_v13 }
 0x3be   :  { %v2283_v52 = vsel %vm2282_vm10, %v7620_v45, %v2279_v43  ;;  %v2536_v51 = vmul.f32 %v2494_v0, %v2263_v11  ;;  %v7684_v11 = vpop.permute.xlu2 %2600 }
 0x3bf   :  { %v2538_v8 = vmul.f32 %v2496_v5, %v2283_v52 }
 0x3c1   :  { %v5679_v35 = vpop.eup %5678 }
 0x3c2   :  { %2630 = vperm.xlu1 %5643, %v2530_v37   ;;  %v2295_v10 = vmul.f32 %v5679_v35, %v7646_v31  ;;  %vm2301_vm14 = vweird.f32 %v5679_v35 }
 0x3c3   :  { %vm2302_vm2 = vmor %vm2300_vm15, %vm2301_vm14 }
 0x3c4   :  { %v2296_v54 = vmul.f32 %v5679_v35, %v2295_v10 }
 0x3c6   :  { %v2297_v25 = vmul.f32 0.5, %v2296_v54 }
 0x3c8   :  { %v2298_v22 = vsub.f32 1.5, %v2297_v25 }
 0x3c9   :  { %v1897_v20 = vpop.xlane.xlu1 %1896 }
 0x3ca   :  { %v1993_v27 = vmul.f32 0.0051020407, %v1897_v20  ;;  %2655 = vperm.xlu1 %5643, %v2535_v6   ;;  %v2299_v7 = vmul.f32 %v5679_v35, %v2298_v22 }
 0x3cb   :  { %2665 = vperm.xlu0 %5641, %v2537_v30  }
 0x3cc   :  { %v2035_v41 = vadd.f32 1e-05, %v1993_v27  ;;  %v2303_v13 = vsel %vm2302_vm2, %v5679_v35, %v2299_v7  ;;  %v2498_v27 = vld [vmem:[%s9706_s3 + $0xc0] sm:$0xff] }
 0x3cd   :  { %v2540_v5 = vmul.f32 %v2498_v27, %v2303_v13 }
 0x3ce   :  { %5680 = vrsqrt.f32 %v2035_v41  ;;  %vm2290_vm12 = vweird.f32 %v2035_v41 }
 0x3d1   :  { %v1909_v4 = vpop.xlane.xlu1 %1908 }
 0x3d2   :  { %2660 = vperm.xlu1 %5643, %v2536_v51   ;;  %v1996_v34 = vmul.f32 0.0051020407, %v1909_v4 }
 0x3d3   :  { %2670 = vperm.xlu0 %5641, %v2538_v8   ;;  %v1986_v8 = vmul.f32 0.0051020407, %v7493_v44  ;;  %v2499_v44 = vld [vmem:[%s9706_s3 + $0xc8] sm:$0xff] }
 0x3d4   :  { %v5681_v59 = vpop.eup %5680  ;;  %v7673_v60 = vadd.f32 1e-05, %v1996_v34 }
 0x3d5   :  { %v2285_v46 = vmul.f32 %v5681_v59, %v2035_v41  ;;  %vm2291_vm11 = vweird.f32 %v5681_v59  ;;  %v7690_v25 = vadd.f32 1e-05, %v1986_v8 }
 0x3d6   :  { %5682 = vrsqrt.f32 %v7673_v60  ;;  %vm2292_vm13 = vmor %vm2290_vm12, %vm2291_vm11  ;;  %vm2320_vm7 = vweird.f32 %v7673_v60 }
 0x3d7   :  { %v2286_v29 = vmul.f32 %v5681_v59, %v2285_v46 }
 0x3d9   :  { %v2287_v37 = vmul.f32 0.5, %v2286_v29 }
 0x3db   :  { %v2288_v45 = vsub.f32 1.5, %v2287_v37 }
 0x3dc   :  { %v1905_v16 = vpop.xlane.xlu0 %1904  ;;  %v5683_v6 = vpop.eup %5682 }
 0x3dd   :  { %v1995_v58 = vmul.f32 0.0051020407, %v1905_v16  ;;  %v2289_v38 = vmul.f32 %v5681_v59, %v2288_v45  ;;  %v2315_v43 = vmul.f32 %v5683_v6, %v7673_v60  ;;  %vm2321_vm6 = vweird.f32 %v5683_v6 }
 0x3de   :  { %vm2322_vm8 = vmor %vm2320_vm7, %vm2321_vm6  ;;  %v1970_v60 = vmul.f32 0.0051020407, %v7235_v50 }
 0x3df   :  { %v2037_v53 = vadd.f32 1e-05, %v1995_v58  ;;  %v2293_v56 = vsel %vm2292_vm13, %v5681_v59, %v2289_v38  ;;  %v2316_v10 = vmul.f32 %v5683_v6, %v2315_v43  ;;  %v1973_v58 = vmul.f32 0.0051020407, %v7281_v62  ;;  %v2500_v62 = vld [vmem:[%s9706_s3 + $0xd0] sm:$0xff] }
 0x3e0   :  { %v2539_v63 = vmul.f32 %v2497_v28, %v2293_v56 }
 0x3e1   :  { %5684 = vrsqrt.f32 %v2037_v53  ;;  %v2317_v35 = vmul.f32 0.5, %v2316_v10  ;;  %vm2310_vm4 = vweird.f32 %v2037_v53 }
 0x3e2   :  { %2675 = vperm.xlu2 %5642, %v2539_v63  }
 0x3e3   :  { %v2318_v37 = vsub.f32 1.5, %v2317_v35 }
 0x3e4   :  { %v1917_v20 = vpop.xlane.xlu0 %1916 }
 0x3e5   :  { %v1998_v30 = vmul.f32 0.0051020407, %v1917_v20  ;;  %v7699_v20 = vadd.f32 1e-05, %v1973_v58 }
 0x3e7   :  { %v5685_v41 = vpop.eup %5684  ;;  %v2040_v0 = vadd.f32 1e-05, %v1998_v30 }
 0x3e8   :  { %v2305_v52 = vmul.f32 %v5685_v41, %v2037_v53  ;;  %vm2311_vm3 = vweird.f32 %v5685_v41  ;;  %v2319_v53 = vmul.f32 %v5683_v6, %v2318_v37 }
 0x3e9   :  { %5686 = vrsqrt.f32 %v2040_v0  ;;  %vm2312_vm5 = vmor %vm2310_vm4, %vm2311_vm3  ;;  %vm2340_vm10 = vweird.f32 %v2040_v0 }
 0x3ea   :  { %v2306_v51 = vmul.f32 %v5685_v41, %v2305_v52  ;;  %2680 = vperm.xlu2 %5642, %v2540_v5   ;;  %v2323_v27 = vsel %vm2322_vm8, %v5683_v6, %v2319_v53  ;;  %vm2090_vm8 = vweird.f32 %v7699_v20 }
 0x3eb   :  { %v2542_v5 = vmul.f32 %v2500_v62, %v2323_v27 }
 0x3ec   :  { %v2307_v31 = vmul.f32 0.5, %v2306_v51 }
 0x3ee   :  { %v2308_v4 = vsub.f32 1.5, %v2307_v31  ;;  %v7712_v31 = vpop.f32.mrf.mxu3 }
 0x3ef   :  { %v7687_v59 = vpop.eup %5686  ;;  %v1913_v54 = vpop.xlane.xlu2 %1912  ;;  %9995 = vst [vmem:[#allocation19_spill] sm:$0xff] %v7712_v31 }
 0x3f0   :  { %v2335_v46 = vmul.f32 %v7687_v59, %v2040_v0  ;;  %v1997_v34 = vmul.f32 0.0051020407, %v1913_v54  ;;  %v2309_v29 = vmul.f32 %v5685_v41, %v2308_v4  ;;  %vm2341_vm9 = vweird.f32 %v7687_v59  ;;  %v7720_v54 = vpop.f32.mrf.mxu2  ;;  %v2502_v0 = vld [vmem:[%s9706_s3 + $0xe0] sm:$0xff] }
 0x3f1   :  { %vm7714_vm11 = vmor %vm2340_vm10, %vm2341_vm9  ;;  %v7718_v4 = vadd.f32 1e-05, %v1970_v60  ;;  %9998 = vst [vmem:[#allocation13_spill] sm:$0xff] %v7720_v54 }
 0x3f2   :  { %v2336_v45 = vmul.f32 %v7687_v59, %v2335_v46  ;;  %v2039_v22 = vadd.f32 1e-05, %v1997_v34  ;;  %v2313_v16 = vsel %vm2312_vm5, %v5685_v41, %v2309_v29  ;;  %vm2220_vm5 = vweird.f32 %v7690_v25 }
 0x3f3   :  { %v2541_v38 = vmul.f32 %v2499_v44, %v2313_v16 }
 0x3f4   :  { %5688 = vrsqrt.f32 %v2039_v22  ;;  %v2337_v28 = vmul.f32 0.5, %v2336_v45  ;;  %vm2330_vm13 = vweird.f32 %v2039_v22  ;;  %v2501_v45 = vld [vmem:[%s9706_s3 + $0xd8] sm:$0xff] }
 0x3f5   :  { %5690 = vrsqrt.f32 %v7690_v25  ;;  %2685 = vperm.xlu1 %5643, %v2541_v38  }
 0x3f6   :  { %v2338_v30 = vsub.f32 1.5, %v2337_v28  ;;  %v7742_v62 = vpop.f32.mrf.mxu3 }
 0x3f7   :  { %v1925_v56 = vpop.xlane.xlu2 %1924 }
 0x3f8   :  { %v2000_v63 = vmul.f32 0.0051020407, %v1925_v56  ;;  %v2339_v10 = vmul.f32 %v7687_v59, %v2338_v30  ;;  %v7739_v30 = vpop.permute.xlu1 %2605  ;;  %v7749_v60 = vpop.f32.mrf.mxu2 }
 0x3f9   :  { %10000 = vst [vmem:[#allocation78_spill] sm:$0xff] %v7749_v60 }
 0x3fa   :  { %v5689_v7 = vpop.eup %5688  ;;  %v2042_v13 = vadd.f32 1e-05, %v2000_v63  ;;  %v2343_v46 = vsel %vm7714_vm11, %v7687_v59, %v2339_v10  ;;  %v7735_v59 = vpop.f32.mrf.mxu0  ;;  %v2871_v10 = vld [vmem:[%s9705_s4 + $0x98] sm:$0xff]  ;;  %vm2060_vm11 = vweird.f32 %v7718_v4 }
 0x3fb   :  { %v2325_v43 = vmul.f32 %v5689_v7, %v2039_v22  ;;  %v7704_v41 = vpop.eup %5690  ;;  %vm2331_vm12 = vweird.f32 %v5689_v7  ;;  %v2544_v58 = vmul.f32 %v2502_v0, %v2343_v46  ;;  %9999 = vst [vmem:[#allocation12_spill] sm:$0xff] %v7735_v59 }
 0x3fc   :  { %5692 = vrsqrt.f32 %v2042_v13  ;;  %v2215_v6 = vmul.f32 %v7704_v41, %v7690_v25  ;;  %vm2332_vm14 = vmor %vm2330_vm13, %vm2331_vm12  ;;  %vm2360_vm2 = vweird.f32 %v2042_v13  ;;  %vm2221_vm4 = vweird.f32 %v7704_v41  ;;  %v2870_v25 = vld [vmem:[%s9705_s4 + $0x90] sm:$0xff] }
 0x3fd   :  { %v2326_v52 = vmul.f32 %v5689_v7, %v2325_v43  ;;  %5694 = vrsqrt.f32 %v7699_v20  ;;  %2690 = vperm.xlu1 %5643, %v2542_v5   ;;  %vm2222_vm6 = vmor %vm2220_vm5, %vm2221_vm4 }
 0x3fe   :  { %v2216_v34 = vmul.f32 %v7704_v41, %v2215_v6  ;;  %5696 = vrsqrt.f32 %v7718_v4 }
 0x3ff   :  { %v2327_v51 = vmul.f32 0.5, %v2326_v52  ;;  %v2504_v52 = vld [vmem:[%s9706_s3 + $0xf0] sm:$0xff] }
 0x400   :  { %v2217_v53 = vmul.f32 0.5, %v2216_v34 }
 0x401   :  { %v2328_v35 = vsub.f32 1.5, %v2327_v51 }
 0x402   :  { %v5693_v50 = vpop.eup %5692  ;;  %v7758_v46 = vpop.f32.mrf.mxu0 }
 0x403   :  { %v2355_v29 = vmul.f32 %v5693_v50, %v2042_v13  ;;  %v2329_v37 = vmul.f32 %v5689_v7, %v2328_v35  ;;  %v7732_v44 = vpop.eup %5694  ;;  %vm2361_vm15 = vweird.f32 %v5693_v50  ;;  %10001 = vst [vmem:[#allocation79_spill] sm:$0xff] %v7758_v46 }
 0x404   :  { %v2085_v22 = vmul.f32 %v7732_v44, %v7699_v20  ;;  %v7747_v5 = vpop.eup %5696  ;;  %vm2362_vm3 = vmor %vm2360_vm2, %vm2361_vm15  ;;  %vm2091_vm7 = vweird.f32 %v7732_v44  ;;  %v2855_v20 = vld [vmem:[%s9705_s4 + $0x18] sm:$0xff] }
 0x405   :  { %v2356_v16 = vmul.f32 %v5693_v50, %v2355_v29  ;;  %v2333_v38 = vsel %vm2332_vm14, %v5689_v7, %v2329_v37  ;;  %2700 = vperm.xlu1 %5643, %v2544_v58   ;;  %v2218_v7 = vsub.f32 1.5, %v2217_v53  ;;  %v2055_v8 = vmul.f32 %v7747_v5, %v7718_v4  ;;  %v2490_v29 = vld [vmem:[%s9706_s3 + $0x80] sm:$0xff]  ;;  %v7774_v58 = vpop.f32.mrf.mxu2  ;;  %v7780_v53 = vpop.permute.xlu0 %2615  ;;  %vm2092_vm9 = vmor %vm2090_vm8, %vm2091_vm7  ;;  %v2854_v4 = vld [vmem:[%s9705_s4 + $0x10] sm:$0xff] }
 0x406   :  { %v2543_v28 = vmul.f32 %v2501_v45, %v2333_v38  ;;  %v2086_v27 = vmul.f32 %v7732_v44, %v2085_v22  ;;  %v1972_v37 = vmul.f32 0.0051020407, %v7268_v32  ;;  %v7767_v45 = vpop.permute.xlu1 %2610  ;;  %10003 = vst [vmem:[#allocation81_spill] sm:$0xff] %v7774_v58  ;;  %vm2061_vm10 = vweird.f32 %v7747_v5 }
 0x407   :  { %v2357_v56 = vmul.f32 0.5, %v2356_v16  ;;  %v2219_v35 = vmul.f32 %v7704_v41, %v2218_v7  ;;  %v2056_v0 = vmul.f32 %v7747_v5, %v2055_v8  ;;  %v7769_v16 = vpop.f32.mrf.mxu3  ;;  %v1987_v7 = vmul.f32 0.0051020407, %v7495_v2  ;;  %v2626_v2 = vpop.permute.xlu2 %2625  ;;  %vm2062_vm12 = vmor %vm2060_vm11, %vm2061_vm10 }
 0x408   :  { %2695 = vperm.xlu0 %5641, %v2543_v28   ;;  %v2087_v13 = vmul.f32 0.5, %v2086_v27  ;;  %10002 = vst [vmem:[#allocation80_spill] sm:$0xff] %v7769_v16  ;;  %v7778_v22 = vadd.f32 1e-05, %v1972_v37  ;;  %v2477_v27 = vld [vmem:[%s9706_s3 + $0x18] sm:$0xff] }
 0x409   :  { %v2358_v63 = vsub.f32 1.5, %v2357_v56  ;;  %v2057_v28 = vmul.f32 0.5, %v2056_v0 }
 0x40a   :  { %v2088_v34 = vsub.f32 1.5, %v2087_v13  ;;  %v7783_v32 = vpop.f32.mrf.mxu0  ;;  %5698 = vrsqrt.f32 %v7778_v22  ;;  %v7800_v13 = vadd.f32 1e-05, %v1987_v7 }
 0x40b   :  { %v2359_v43 = vmul.f32 %v5693_v50, %v2358_v63  ;;  %10004 = vst [vmem:[#allocation82_spill] sm:$0xff] %v7783_v32  ;;  %v2058_v56 = vsub.f32 1.5, %v2057_v28  ;;  %v10024_v32 = vld [vmem:[#allocation3_spill] sm:$0xff] }
 0x40d   :  { %v2363_v6 = vsel %vm2362_vm3, %v5693_v50, %v2359_v43  ;;  %v2223_v50 = vsel %vm2222_vm6, %v7704_v41, %v2219_v35  ;;  %v2089_v41 = vmul.f32 %v7732_v44, %v2088_v34  ;;  %v7798_v8 = vpop.f32.mrf.mxu2  ;;  %v2621_v0 = vpop.permute.xlu0 %2620  ;;  %vm2080_vm6 = vweird.f32 %v7778_v22 }
 0x40e   :  { %v2546_v51 = vmul.f32 %v2504_v52, %v2363_v6  ;;  %v2532_v38 = vmul.f32 %v2490_v29, %v2223_v50  ;;  %10006 = vst [vmem:[#allocation84_spill] sm:$0xff] %v7798_v8  ;;  %v2474_v50 = vld [vmem:[%s9706_s3] sm:$0xff]  ;;  %v2792_v49 = vmul.f32 %v2621_v0, %v7176_v36  ;;  %v2790_v36 = vmul.f32 %v7780_v53, %v7160_v3 }
 0x40f   :  { %v2093_v63 = vsel %vm2092_vm9, %v7732_v44, %v2089_v41  ;;  %v7795_v6 = vpop.f32.mrf.mxu3  ;;  %v3212_v3 = vld [vmem:[%s9707_s1 + $0xc0] sm:$0xff]  ;;  %vm2230_vm9 = vweird.f32 %v7800_v13 }
 0x410   :  { %2991 = vperm.xlu0 %5641, %v2871_v10   ;;  %2710 = vperm.xlu1 %5643, %v2546_v51   ;;  %v2519_v10 = vmul.f32 %v2477_v27, %v2093_v63  ;;  %10005 = vst [vmem:[#allocation83_spill] sm:$0xff] %v7795_v6  ;;  %v2059_v51 = vmul.f32 %v7747_v5, %v2058_v56  ;;  %v7803_v35 = vpop.eup %5698 }
 0x411   :  { %v2075_v37 = vmul.f32 %v7803_v35, %v7778_v22  ;;  %vm2081_vm4 = vweird.f32 %v7803_v35  ;;  %v3229_v22 = vld [vmem:[%s9707_s1 + $0x148] sm:$0xff] }
 0x412   :  { %v2063_v34 = vsel %vm2062_vm12, %v7747_v5, %v2059_v51  ;;  %v7809_v29 = vpop.f32.mrf.mxu0  ;;  %vm8016_vm7 = vmor %vm2080_vm6, %vm2081_vm4 }
 0x413   :  { %10007 = vst [vmem:[#allocation85_spill] sm:$0xff] %v7809_v29  ;;  %v2076_v41 = vmul.f32 %v7803_v35, %v2075_v37  ;;  %v2853_v37 = vld [vmem:[%s9705_s4 + $0x8] sm:$0xff] }
 0x415   :  { %v7825_v7 = vpop.f32.mrf.mxu2  ;;  %v7827_v51 = vmul.f32 0.5, %v2076_v41  ;;  %v2786_v41 = vmul.f32 %v7739_v30, %v7128_v18  ;;  %v2794_v18 = vmul.f32 %v2626_v2, %v7190_v55 }
 0x416   :  { %10009 = vst [vmem:[#allocation87_spill] sm:$0xff] %v7825_v7 }
 0x417   :  { %v7819_v56 = vpop.f32.mrf.mxu3 }
 0x418   :  { %2640 = vperm.xlu0 %5641, %v2532_v38   ;;  %2986 = vperm.xlu1 %5643, %v2870_v25   ;;  %v1971_v25 = vmul.f32 0.0051020407, %v7252_v21  ;;  %v2516_v38 = vmul.f32 %v2474_v50, %v2063_v34  ;;  %10008 = vst [vmem:[#allocation86_spill] sm:$0xff] %v7819_v56 }
 0x41a   :  { %v7823_v27 = vadd.f32 1e-05, %v1971_v25  ;;  %v7840_v25 = vpop.f32.mrf.mxu0 }
 0x41b   :  { %10010 = vst [vmem:[#allocation88_spill] sm:$0xff] %v7840_v25 }
 0x41c   :  { %v1921_v43 = vpop.xlane.xlu1 %1920  ;;  %vm2070_vm12 = vweird.f32 %v7823_v27 }
 0x41d   :  { %v1999_v52 = vmul.f32 0.0051020407, %v1921_v43 }
 0x41f   :  { %v2041_v44 = vadd.f32 1e-05, %v1999_v52 }
 0x420   :  { %2911 = vperm.xlu0 %5641, %v2855_v20   ;;  %2575 = vperm.xlu1 %5643, %v2519_v10   ;;  %v2636_v20 = vpop.permute.xlu2 %2635 }
 0x421   :  { %5700 = vrsqrt.f32 %v2041_v44  ;;  %vm2350_vm14 = vweird.f32 %v2041_v44 }
 0x422   :  { %5702 = vrsqrt.f32 %v7800_v13  ;;  %v7931_v29 = vpop.f32.mrf.mxu0 }
 0x423   :  { %5704 = vrsqrt.f32 %v7823_v27 }
 0x427   :  { %v5701_v28 = vpop.eup %5700 }
 0x428   :  { %v2345_v5 = vmul.f32 %v5701_v28, %v2041_v44  ;;  %2560 = vperm.xlu0 %5641, %v2516_v38   ;;  %2906 = vperm.xlu1 %5643, %v2854_v4   ;;  %v7821_v63 = vpop.eup %5702  ;;  %v2869_v4 = vld [vmem:[%s9705_s4 + $0x88] sm:$0xff]  ;;  %vm2351_vm13 = vweird.f32 %v5701_v28  ;;  %v2793_v44 = vmul.f32 %v2621_v0, %v7179_v48 }
 0x429   :  { %v2225_v34 = vmul.f32 %v7821_v63, %v7800_v13  ;;  %vm2352_vm15 = vmor %vm2350_vm14, %vm2351_vm13  ;;  %v7874_v57 = vpop.eup %5704  ;;  %v10014_v48 = vld [vmem:[#allocation31_spill] sm:$0xff]  ;;  %vm2231_vm8 = vweird.f32 %v7821_v63 }
 0x42a   :  { %v2346_v43 = vmul.f32 %v5701_v28, %v2345_v5  ;;  %v1929_v52 = vpop.xlane.xlu0 %1928  ;;  %v2784_v5 = vmul.f32 %v7684_v11, %v7110_v47  ;;  %v10015_v0 = vld [vmem:[#allocation47_spill] sm:$0xff]  ;;  %vm2232_vm10 = vmor %vm2230_vm9, %vm2231_vm8  ;;  %vm2071_vm11 = vweird.f32 %v7874_v57 }
 0x42b   :  { %v2001_v10 = vmul.f32 0.0051020407, %v1929_v52  ;;  %v2799_v52 = vmul.f32 %v2636_v20, %v7227_v40  ;;  %v7854_v47 = vmul.f32 %v7821_v63, %v2225_v34  ;;  %v7861_v40 = vmul.f32 %v7684_v11, %v7113_v61  ;;  %v7876_v61 = vpop.f32.mrf.mxu2  ;;  %vm2072_vm13 = vmor %vm2070_vm12, %vm2071_vm11 }
 0x42c   :  { %v2347_v21 = vmul.f32 0.5, %v2346_v43  ;;  %v2798_v43 = vmul.f32 %v2636_v20, %v7224_v1  ;;  %v2795_v1 = vmul.f32 %v2626_v2, %v7193_v15  ;;  %v10013_v15 = vld [vmem:[#allocation20_spill] sm:$0xff]  ;;  %v2791_v2 = vmul.f32 %v7780_v53, %v10014_v48  ;;  %v7895_v53 = vpop.permute.xlu2 %2650 }
 0x42d   :  { %v7831_v50 = vadd.f32 1e-05, %v2001_v10  ;;  %v7879_v11 = vadd.f32 %v10013_v15, %v2786_v41  ;;  %v3219_v41 = vld [vmem:[%s9707_s1 + $0xf8] sm:$0xff] }
 0x42e   :  { %v2348_v38 = vsub.f32 1.5, %v2347_v21  ;;  %v2503_v21 = vld [vmem:[%s9706_s3 + $0xe8] sm:$0xff] }
 0x42f   :  { %5706 = vrsqrt.f32 %v7831_v50  ;;  %vm2370_vm3 = vweird.f32 %v7831_v50 }
 0x430   :  { %2901 = vperm.xlu0 %5641, %v2853_v37   ;;  %2981 = vperm.xlu1 %5643, %v2869_v4   ;;  %v2349_v10 = vmul.f32 %v5701_v28, %v2348_v38  ;;  %v7865_v37 = vpop.f32.mrf.mxu3  ;;  %v10011_v4 = vld [vmem:[#allocation10_spill] sm:$0xff] }
 0x431   :  { %v7868_v34 = vadd.f32 %v10011_v4, %v2784_v5  ;;  %v10012_v38 = vld [vmem:[#allocation30_spill] sm:$0xff]  ;;  %v3135_v5 = vadd.f32 %v10015_v0, %v2799_v52  ;;  %10018 = vst [vmem:[#allocation10_spill] sm:$0xff] %v7895_v53  ;;  %v10020_v52 = vld [vmem:[#allocation32_spill] sm:$0xff]  ;;  %v3213_v53 = vld [vmem:[%s9707_s1 + $0xc8] sm:$0xff] }
 0x432   :  { %v2353_v20 = vsel %vm2352_vm15, %v5701_v28, %v2349_v10  ;;  %v2787_v55 = vmul.f32 %v7739_v30, %v10012_v38  ;;  %v3134_v28 = vadd.f32 %v10015_v0, %v2798_v43  ;;  %v10017_v38 = vld [vmem:[#allocation2_spill] sm:$0xff]  ;;  %v10019_v43 = vld [vmem:[#allocation33_spill] sm:$0xff] }
 0x433   :  { %v2545_v14 = vmul.f32 %v2503_v21, %v2353_v20  ;;  %v10016_v21 = vld [vmem:[#allocation6_spill] sm:$0xff]  ;;  %v3128_v23 = vadd.f32 %v10017_v38, %v2792_v49  ;;  %v10021_v49 = vld [vmem:[#allocation29_spill] sm:$0xff]  ;;  %v3129_v56 = vadd.f32 %v10017_v38, %v2793_v44  ;;  %v3303_v8 = vadd.f32 %v3219_v41, %v3135_v5  ;;  %v10025_v5 = vld [vmem:[#allocation15_spill] sm:$0xff] }
 0x434   :  { %v2631_v10 = vpop.permute.xlu1 %2630  ;;  %v3130_v20 = vadd.f32 %v10016_v21, %v2794_v18  ;;  %v3218_v18 = vld [vmem:[%s9707_s1 + $0xf0] sm:$0xff]  ;;  %v2788_v25 = vmul.f32 %v7767_v45, %v10021_v49  ;;  %v3131_v7 = vadd.f32 %v10016_v21, %v2795_v1  ;;  %v10023_v21 = vld [vmem:[#allocation5_spill] sm:$0xff] }
 0x435   :  { %v7888_v30 = vpop.eup %5706  ;;  %v2796_v48 = vmul.f32 %v2631_v10, %v10019_v43  ;;  %v2797_v0 = vmul.f32 %v2631_v10, %v10020_v52  ;;  %2705 = vperm.xlu2 %5642, %v2545_v14   ;;  %v3217_v14 = vld [vmem:[%s9707_s1 + $0xe8] sm:$0xff]  ;;  %v3216_v10 = vld [vmem:[%s9707_s1 + $0xe0] sm:$0xff]  ;;  %v3214_v52 = vld [vmem:[%s9707_s1 + $0xd0] sm:$0xff]  ;;  %v3126_v44 = vadd.f32 %v10023_v21, %v2790_v36  ;;  %v3127_v59 = vadd.f32 %v10023_v21, %v2791_v2 }
 0x436   :  { %v2365_v43 = vmul.f32 %v7888_v30, %v7831_v50  ;;  %v10022_v49 = vld [vmem:[#allocation28_spill] sm:$0xff]  ;;  %v3215_v38 = vld [vmem:[%s9707_s1 + $0xd8] sm:$0xff]  ;;  %v3302_v36 = vadd.f32 %v3218_v18, %v3134_v28  ;;  %v3296_v31 = vadd.f32 %v3212_v3, %v3128_v23  ;;  %v3298_v46 = vadd.f32 %v3214_v52, %v3130_v20 }
 0x437   :  { %v2789_v1 = vmul.f32 %v7767_v45, %v10022_v49  ;;  %v3132_v58 = vadd.f32 %v10024_v32, %v2796_v48  ;;  %v3133_v16 = vadd.f32 %v10024_v32, %v2797_v0  ;;  %v3211_v49 = vld [vmem:[%s9707_s1 + $0xb8] sm:$0xff]  ;;  %v3123_v48 = vadd.f32 %v10013_v15, %v2787_v55  ;;  %v3210_v2 = vld [vmem:[%s9707_s1 + $0xb0] sm:$0xff] }
 0x438   :  { %v2366_v45 = vmul.f32 %v7888_v30, %v2365_v43  ;;  %2896 = vperm.xlu1 %5643, %v2852_v12   ;;  %v3299_v32 = vadd.f32 %v3215_v38, %v3131_v7  ;;  %v3297_v0 = vadd.f32 %v3213_v53, %v3129_v56  ;;  %v3124_v12 = vadd.f32 %v10025_v5, %v2788_v25  ;;  %v3209_v56 = vld [vmem:[%s9707_s1 + $0xa8] sm:$0xff]  ;;  %v3207_v3 = vld [vmem:[%s9707_s1 + $0x98] sm:$0xff] }
 0x439   :  { %v3301_v6 = vadd.f32 %v3217_v14, %v3133_v16  ;;  %v3300_v54 = vadd.f32 %v3216_v10, %v3132_v58  ;;  %v3125_v28 = vadd.f32 %v10025_v5, %v2789_v1  ;;  %v7944_v43 = vadd.f32 %v3211_v49, %v3127_v59  ;;  %v2505_v21 = vld [vmem:[%s9706_s3 + $0xf8] sm:$0xff] }
 0x43a   :  { %v2367_v60 = vmul.f32 0.5, %v2366_v45  ;;  %v3387_v16 = vmax.f32 %v3303_v8, 0.0  ;;  %v3386_v55 = vmax.f32 %v3302_v36, 0.0  ;;  %vm2371_vm2 = vweird.f32 %v7888_v30  ;;  %v7961_v8 = vpop.f32.mrf.mxu3  ;;  %v3204_v36 = vld [vmem:[%s9707_s1 + $0x80] sm:$0xff] }
 0x43b   :  { %v3385_v41 = vmax.f32 %v3301_v6, 0.0  ;;  %v3384_v18 = vmax.f32 %v3300_v54, 0.0  ;;  %v3380_v15 = vmax.f32 %v3296_v31, 0.0  ;;  %v3382_v6 = vmax.f32 %v3298_v46, 0.0  ;;  %v3208_v54 = vld [vmem:[%s9707_s1 + $0xa0] sm:$0xff]  ;;  %v3206_v31 = vld [vmem:[%s9707_s1 + $0x90] sm:$0xff]  ;;  %vm2372_vm5 = vmor %vm2370_vm3, %vm2371_vm2 }
 0x43c   :  { %v2368_v23 = vsub.f32 1.5, %v2367_v60  ;;  %v7946_v58 = vpop.permute.xlu1 %2655  ;;  %v7952_v7 = vpop.permute.xlu2 %2675  ;;  %v3294_v59 = vadd.f32 %v3210_v2, %v3126_v44  ;;  %v3381_v14 = vmax.f32 %v3297_v0, 0.0  ;;  %v3383_v10 = vmax.f32 %v3299_v32, 0.0  ;;  %v3205_v44 = vld [vmem:[%s9707_s1 + $0x88] sm:$0xff] }
 0x43d   :  { %v7954_v25 = vpop.permute.xlu0 %2665  ;;  %v7959_v60 = vpop.f32.mrf.mxu2  ;;  %v3538_v20 = vpack.c.bf16 %v3386_v55, %v3384_v18  ;;  %v3539_v53 = vpack.c.bf16 %v3387_v16, %v3385_v41  ;;  %v3121_v46 = vadd.f32 %v10011_v4, %v7861_v40  ;;  %v3293_v38 = vadd.f32 %v3209_v56, %v3125_v28  ;;  %v10028_v16 = vld [vmem:[#allocation25_spill] sm:$0xff] }
 0x43e   :  { %v2811_v52 = vmul.f32 %v7954_v25, %v7311_v17  ;;  %v2369_v1 = vmul.f32 %v7888_v30, %v2368_v23  ;;  %v2815_v50 = vmul.f32 %v7952_v7, %v7361_v42  ;;  %v3292_v17 = vadd.f32 %v3208_v54, %v3124_v12  ;;  %v7991_v32 = vpop.f32.mrf.mxu0 }
 0x43f   :  { %3944 = vmatpush.bf16.msrb.mxu1 %v3538_v20  ;;  %4286 = vmatpush.bf16.msra.mxu0 %v3539_v53  ;;  %v3291_v40 = vadd.f32 %v3207_v3, %v3123_v48  ;;  %v3378_v45 = vmax.f32 %v3294_v59, 0.0  ;;  %v3290_v49 = vadd.f32 %v3206_v31, %v7879_v11  ;;  %v3536_v0 = vpack.c.bf16 %v3382_v6, %v3380_v15  ;;  %v10026_v48 = vld [vmem:[#allocation14_spill] sm:$0xff]  ;;  %v3231_v11 = vld [vmem:[%s9707_s1 + $0x158] sm:$0xff] }
 0x440   :  { %v2373_v4 = vsel %vm2372_vm5, %v7888_v30, %v2369_v1  ;;  %v3537_v2 = vpack.c.bf16 %v3383_v10, %v3381_v14  ;;  %v3379_v42 = vmax.f32 %v7944_v43, 0.0  ;;  %v2227_v28 = vmul.f32 0.5, %v7854_v47  ;;  %v10031_v10 = vld [vmem:[#allocation9_spill] sm:$0xff] }
 0x441   :  { %v2547_v5 = vmul.f32 %v2505_v21, %v2373_v4  ;;  %v3289_v12 = vadd.f32 %v3205_v44, %v3121_v46  ;;  %v3147_v41 = vadd.f32 %v10026_v48, %v2811_v52  ;;  %v10027_v30 = vsub.f32 1.5, %v7827_v51  ;;  %v3235_v51 = vld [vmem:[%s9707_s1 + $0x178] sm:$0xff]  ;;  %v3233_v46 = vld [vmem:[%s9707_s1 + $0x168] sm:$0xff] }
 0x442   :  { %v3151_v23 = vadd.f32 %v10028_v16, %v2815_v50  ;;  %v3376_v43 = vmax.f32 %v3292_v17, 0.0  ;;  %v3377_v56 = vmax.f32 %v3293_v38, 0.0  ;;  %v3288_v47 = vadd.f32 %v3204_v36, %v7868_v34  ;;  %v8034_v21 = vpop.f32.mrf.mxu3  ;;  %v10032_v44 = vld [vmem:[#allocation11_spill] sm:$0xff] }
 0x443   :  { %v2079_v18 = vmul.f32 %v7803_v35, %v10027_v30  ;;  %3945 = vmatpush.bf16.msrb.mxu1 %v3536_v0  ;;  %4287 = vmatpush.bf16.msra.mxu0 %v3537_v2  ;;  %v3374_v54 = vmax.f32 %v3290_v49, 0.0  ;;  %v3375_v53 = vmax.f32 %v3291_v40, 0.0  ;;  %v3315_v14 = vadd.f32 %v3231_v11, %v3147_v41  ;;  %v2476_v40 = vld [vmem:[%s9706_s3 + $0x10] sm:$0xff] }
 0x444   :  { %v8003_v55 = vpop.permute.xlu1 %2660  ;;  %2715 = vperm.xlu2 %5642, %v2547_v5   ;;  %v3534_v3 = vpack.c.bf16 %v3378_v45, %v3376_v43  ;;  %v3535_v20 = vpack.c.bf16 %v3379_v42, %v3377_v56  ;;  %v3372_v50 = vmax.f32 %v3288_v47, 0.0  ;;  %v3373_v17 = vmax.f32 %v3289_v12, 0.0 }
 0x445   :  { %v2809_v15 = vmul.f32 %v8003_v55, %v7298_v33  ;;  %v8012_v6 = vpop.permute.xlu0 %2670  ;;  %v2228_v33 = vsub.f32 1.5, %v2227_v28  ;;  %v2083_v52 = vsel %vm8016_vm7, %v7803_v35, %v2079_v18  ;;  %v8032_v1 = vpop.f32.mrf.mxu2  ;;  %v2065_v35 = vmul.f32 %v7874_v57, %v7823_v27 }
 0x446   :  { %v2813_v34 = vmul.f32 %v8012_v6, %v7325_v39  ;;  %v3319_v39 = vadd.f32 %v3235_v51, %v3151_v23  ;;  %v3532_v36 = vpack.c.bf16 %v3374_v54, %v3372_v50  ;;  %v3533_v49 = vpack.c.bf16 %v3375_v53, %v3373_v17  ;;  %v8042_v42 = vpop.f32.mrf.mxu0  ;;  %v10041_v53 = vld [vmem:[#allocation13_spill] sm:$0xff]  ;;  %v10045_v17 = vld [vmem:[#allocation44_spill] sm:$0xff] }
 0x447   :  { %v3145_v31 = vadd.f32 %v10031_v10, %v2809_v15  ;;  %3946 = vmatpush.bf16.msrb.mxu1 %v3534_v3  ;;  %4288 = vmatpush.bf16.msra.mxu0 %v3535_v20  ;;  %v2518_v0 = vmul.f32 %v2476_v40, %v2083_v52  ;;  %v3399_v5 = vmax.f32 %v3315_v14, 0.0  ;;  %v2229_v28 = vmul.f32 %v7821_v63, %v2228_v33  ;;  %v10042_v14 = vld [vmem:[#allocation83_spill] sm:$0xff] }
 0x448   :  { %v3149_v38 = vadd.f32 %v10032_v44, %v2813_v34  ;;  %v3403_v41 = vmax.f32 %v3319_v39, 0.0  ;;  %v1300_v30 = vadd.f32 %v7876_v61, %v7865_v37  ;;  %v2066_v11 = vmul.f32 %v7874_v57, %v2065_v35  ;;  %v2491_v37 = vld [vmem:[%s9706_s3 + $0x88] sm:$0xff]  ;;  %v10048_v35 = vld [vmem:[#allocation85_spill] sm:$0xff] }
 0x449   :  { %v3313_v4 = vadd.f32 %v3229_v22, %v3145_v31  ;;  %v2233_v43 = vsel %vm2232_vm10, %v7821_v63, %v2229_v28  ;;  %v10037_v34 = vld [vmem:[#allocation79_spill] sm:$0xff]  ;;  %v10043_v31 = vld [vmem:[#allocation84_spill] sm:$0xff] }
 0x44a   :  { %v3317_v45 = vadd.f32 %v3233_v46, %v3149_v38  ;;  %v8061_v61 = vadd.f32 %v7931_v29, %v1300_v30  ;;  %v1192_v13 = vpop.f32.mrf.mxu3  ;;  %v2533_v47 = vmul.f32 %v2491_v37, %v2233_v43  ;;  %v2067_v51 = vmul.f32 0.5, %v2066_v11  ;;  %v10036_v29 = vld [vmem:[#allocation41_spill] sm:$0xff]  ;;  %v10053_v11 = vld [vmem:[#allocation39_spill] sm:$0xff]  ;;  %v10054_v37 = vld [vmem:[#allocation82_spill] sm:$0xff] }
 0x44b   :  { %v3397_v2 = vmax.f32 %v3313_v4, 0.0  ;;  %3947 = vmatpush.bf16.msrb.mxu1 %v3532_v36  ;;  %4289 = vmatpush.bf16.msra.mxu0 %v3533_v49  ;;  %v1295_v46 = vadd.f32 %v10043_v31, %v10042_v14  ;;  %v10044_v38 = vld [vmem:[#allocation37_spill] sm:$0xff]  ;;  %v10046_v36 = vld [vmem:[#allocation12_spill] sm:$0xff] }
 0x44c   :  { %v3401_v12 = vmax.f32 %v3317_v45, 0.0  ;;  %2570 = vperm.xlu2 %5642, %v2518_v0   ;;  %v1576_v63 = vsel %vm1423_vm1, %v8061_v61, 0.0  ;;  %v2068_v59 = vsub.f32 1.5, %v2067_v51  ;;  %v2475_v45 = vld [vmem:[%s9706_s3 + $0x8] sm:$0xff]  ;;  %v10056_v51 = vld [vmem:[#allocation38_spill] sm:$0xff] }
 0x44d   :  { %v8048_v18 = vpack.c.bf16 %v3399_v5, %v3397_v2  ;;  %v1306_v56 = vpop.f32.mrf.mxu2  ;;  %v1577_v22 = vadd.f32 %v1576_v63, %v10036_v29  ;;  %v8099_v0 = vadd.f32 %v10048_v35, %v1295_v46  ;;  %v10050_v2 = vld [vmem:[#allocation80_spill] sm:$0xff]  ;;  %v10051_v5 = vld [vmem:[#allocation81_spill] sm:$0xff]  ;;  %v3225_v46 = vld [vmem:[%s9707_s1 + $0x128] sm:$0xff] }
 0x44e   :  { %v8051_v23 = vpack.c.bf16 %v3403_v41, %v3401_v12  ;;  %v1307_v15 = vadd.f32 %v1306_v56, %v1192_v13  ;;  %v1420_v54 = vpop.f32.mrf.mxu0  ;;  %v1292_v28 = vadd.f32 %v10051_v5, %v10050_v2  ;;  %v10052_v41 = vld [vmem:[#allocation36_spill] sm:$0xff]  ;;  %v10063_v35 = vld [vmem:[#allocation86_spill] sm:$0xff] }
 0x44f   :  { %10033 = vst [vmem:[#allocation30_spill] sm:$0xff] %v8048_v18  ;;  %3948 = vmatpush.bf16.msrb.mxu1 %v7629_v26  ;;  %4290 = vmatpush.bf16.msra.mxu0 %v7631_v24  ;;  %v10035_v26 = vld [vmem:[#allocation78_spill] sm:$0xff]  ;;  %v1568_v12 = vsel %vm1423_vm1, %v8099_v0, 0.0 }
 0x450   :  { %10034 = vst [vmem:[#allocation20_spill] sm:$0xff] %v8051_v23  ;;  %v1290_v24 = vadd.f32 %v10035_v26, %v7742_v62  ;;  %v8073_v20 = vadd.f32 %v1420_v54, %v1307_v15  ;;  %v10040_v62 = vld [vmem:[#allocation19_spill] sm:$0xff]  ;;  %v1569_v43 = vadd.f32 %v1568_v12, %v10053_v11  ;;  %v8110_v56 = vadd.f32 %v10054_v37, %v1292_v28 }
 0x451   :  { %v1287_v33 = vadd.f32 %v10041_v53, %v10040_v62  ;;  %10049 = vst [vmem:[#allocation2_spill] sm:$0xff] %v8099_v0  ;;  %v1305_v54 = vadd.f32 %v8032_v1, %v8034_v21  ;;  %v3227_v53 = vld [vmem:[%s9707_s1 + $0x138] sm:$0xff]  ;;  %v10060_v21 = vld [vmem:[#allocation10_spill] sm:$0xff]  ;;  %v3193_v0 = vld [vmem:[%s9707_s1 + $0x28] sm:$0xff] }
 0x452   :  { %v8071_v3 = vadd.f32 %v10037_v34, %v1290_v24  ;;  %10039 = vst [vmem:[#allocation47_spill] sm:$0xff] %v8073_v20  ;;  %v1588_v39 = vsel %vm1423_vm1, %v8073_v20, 0.0  ;;  %v10059_v1 = vld [vmem:[#allocation57_spill] sm:$0xff] }
 0x453   :  { %3949 = vmatpush.bf16.msrb.mxu1 %v7611_v9  ;;  %4291 = vmatpush.bf16.msra.mxu0 %v7613_v19  ;;  %v2868_v9 = vld [vmem:[%s9705_s4 + $0x80] sm:$0xff]  ;;  %v2069_v19 = vmul.f32 %v7874_v57, %v2068_v59  ;;  %v1589_v40 = vadd.f32 %v1588_v39, %v10045_v17  ;;  %v8096_v49 = vadd.f32 %v10046_v36, %v1287_v33  ;;  %v10057_v59 = vld [vmem:[#allocation59_spill] sm:$0xff] }
 0x454   :  { %2645 = vperm.xlu2 %5642, %v2533_v47   ;;  %10038 = vst [vmem:[#allocation31_spill] sm:$0xff] %v8071_v3  ;;  %v1560_v52 = vsel %vm1423_vm1, %v8071_v3, 0.0  ;;  %v1564_v47 = vsel %vm1423_vm1, %v8110_v56, 0.0  ;;  %v8133_v62 = vadd.f32 %v8042_v42, %v1305_v54  ;;  %v1302_v33 = vadd.f32 %v7959_v60, %v7961_v8  ;;  %v8154_v8 = vpop.permute.xlu2 %2680 }
 0x455   :  { %v1561_v50 = vadd.f32 %v1560_v52, %v10044_v38  ;;  %v2073_v4 = vsel %vm2072_vm13, %v7874_v57, %v2069_v19  ;;  %10047 = vst [vmem:[#allocation6_spill] sm:$0xff] %v8096_v49  ;;  %v1556_v57 = vsel %vm1423_vm1, %v8096_v49, 0.0  ;;  %v1565_v26 = vadd.f32 %v1564_v47, %v10056_v51  ;;  %v10069_v47 = vld [vmem:[#allocation75_spill] sm:$0xff] }
 0x456   :  { %v2517_v27 = vmul.f32 %v2475_v45, %v2073_v4  ;;  %v1557_v30 = vadd.f32 %v1556_v57, %v10052_v41  ;;  %10055 = vst [vmem:[#allocation33_spill] sm:$0xff] %v8110_v56  ;;  %v2805_v14 = vmul.f32 %v10060_v21, %v10059_v1  ;;  %v1584_v31 = vsel %vm1423_vm1, %v8133_v62, 0.0  ;;  %v10066_v57 = vld [vmem:[#allocation42_spill] sm:$0xff]  ;;  %v10072_v1 = vld [vmem:[#allocation71_spill] sm:$0xff] }
 0x457   :  { %10058 = vst [vmem:[#allocation32_spill] sm:$0xff] %v8133_v62  ;;  %v8152_v4 = vadd.f32 %v7991_v32, %v1302_v33  ;;  %v10085_v38 = vld [vmem:[#allocation35_spill] sm:$0xff] }
 0x459   :  { %10062 = vst [vmem:[#allocation29_spill] sm:$0xff] %v8152_v4  ;;  %v1580_v5 = vsel %vm1423_vm1, %v8152_v4, 0.0 }
 0x45a   :  { %1578 = vadd.xlane.f32.xlu0 %v1577_v22  ;;  %v2807_v22 = vmul.f32 %v7946_v58, %v10057_v59  ;;  %v1581_v12 = vadd.f32 %v1580_v5, %v10066_v57  ;;  %v10070_v59 = vld [vmem:[#allocation77_spill] sm:$0xff] }
 0x45c   :  { %2976 = vperm.xlu2 %5642, %v2868_v9  }
 0x462   :  { %1562 = vadd.xlane.f32.xlu0 %v1561_v50  ;;  %1590 = vadd.xlane.f32.xlu1 %v1589_v40  ;;  %v10061_v50 = vld [vmem:[#allocation43_spill] sm:$0xff] }
 0x463   :  { %v1585_v40 = vadd.f32 %v1584_v31, %v10061_v50  ;;  %v10073_v31 = vld [vmem:[#allocation45_spill] sm:$0xff] }
 0x464   :  { %2565 = vperm.xlu2 %5642, %v2517_v27   ;;  %v10064_v27 = vld [vmem:[#allocation87_spill] sm:$0xff] }
 0x465   :  { %v1297_v2 = vadd.f32 %v10064_v27, %v10063_v35  ;;  %v10076_v35 = vld [vmem:[#allocation27_spill] sm:$0xff] }
 0x467   :  { %v8112_v13 = vpop.permute.xlu1 %2685 }
 0x46a   :  { %1558 = vadd.xlane.f32.xlu0 %v1557_v30  ;;  %1570 = vadd.xlane.f32.xlu1 %v1569_v43  ;;  %v10067_v30 = vld [vmem:[#allocation88_spill] sm:$0xff] }
 0x46b   :  { %v8164_v43 = vadd.f32 %v10067_v30, %v1297_v2  ;;  %v10077_v2 = vld [vmem:[#allocation67_spill] sm:$0xff] }
 0x46d   :  { %10068 = vst [vmem:[#allocation5_spill] sm:$0xff] %v8164_v43  ;;  %v1572_v37 = vsel %vm1423_vm1, %v8164_v43, 0.0  ;;  %v10084_v43 = vld [vmem:[#allocation7_spill] sm:$0xff] }
 0x46f   :  { %v8117_v24 = vpop.permute.xlu1 %2690 }
 0x470   :  { %v2820_v5 = vmul.f32 %v8117_v24, %v10077_v2 }
 0x472   :  { %1566 = vadd.xlane.f32.xlu1 %v1565_v26 }
 0x477   :  { %v8119_v15 = vpop.permute.xlu1 %2700 }
 0x47a   :  { %v8121_v63 = vpop.permute.xlu0 %2695 }
 0x482   :  { %v8127_v34 = vpop.permute.xlu1 %2710  ;;  %v8129_v9 = vpop.permute.xlu0 %2991 }
 0x483   :  { %v3143_v19 = vadd.f32 %v8129_v9, %v2807_v22  ;;  %v2828_v26 = vmul.f32 %v8127_v34, %v10069_v47 }
 0x485   :  { %v3311_v42 = vadd.f32 %v3227_v53, %v3143_v19  ;;  %v10071_v53 = vld [vmem:[#allocation40_spill] sm:$0xff] }
 0x486   :  { %v1573_v33 = vadd.f32 %v1572_v37, %v10071_v53  ;;  %v10079_v37 = vld [vmem:[#allocation53_spill] sm:$0xff] }
 0x487   :  { %v3395_v45 = vmax.f32 %v3311_v42, 0.0  ;;  %v10074_v42 = vld [vmem:[#allocation73_spill] sm:$0xff]  ;;  %v1552_v47 = vsel %vm1423_vm1, %v10079_v37, 0.0 }
 0x488   :  { %v10083_v37 = vld [vmem:[#allocation69_spill] sm:$0xff]  ;;  %v1553_v3 = vadd.f32 %v1552_v47, %v10085_v38  ;;  %v10093_v38 = vld [vmem:[#allocation8_spill] sm:$0xff] }
 0x489   :  { %v2818_v49 = vmul.f32 %v8112_v13, %v10083_v37 }
 0x48a   :  { %v8147_v52 = vpop.permute.xlu1 %2986  ;;  %v8172_v54 = vpop.permute.xlu0 %2640 }
 0x48b   :  { %v3141_v39 = vadd.f32 %v8147_v52, %v2805_v14  ;;  %v2824_v14 = vmul.f32 %v8119_v15, %v10072_v1  ;;  %v10081_v1 = vld [vmem:[#allocation23_spill] sm:$0xff] }
 0x48d   :  { %v3309_v60 = vadd.f32 %v3225_v46, %v3141_v39  ;;  %1586 = vadd.xlane.f32.xlu2 %v1585_v40  ;;  %v3164_v46 = vadd.f32 %v10073_v31, %v2828_v26  ;;  %v2822_v39 = vmul.f32 %v8121_v63, %v10074_v42  ;;  %v3250_v26 = vld [vmem:[%s9707_s1 + $0x1f0] sm:$0xff] }
 0x48f   :  { %v3393_v36 = vmax.f32 %v3309_v60, 0.0  ;;  %v8166_v32 = vpop.permute.xlu2 %2705  ;;  %v3248_v60 = vld [vmem:[%s9707_s1 + $0x1e0] sm:$0xff]  ;;  %v3158_v53 = vadd.f32 %v10084_v43, %v2822_v39 }
 0x490   :  { %v2826_v22 = vmul.f32 %v8166_v32, %v10070_v59  ;;  %v3246_v59 = vld [vmem:[%s9707_s1 + $0x1d0] sm:$0xff]  ;;  %v3332_v2 = vadd.f32 %v3248_v60, %v3164_v46  ;;  %v10087_v60 = vld [vmem:[#allocation49_spill] sm:$0xff] }
 0x491   :  { %v8160_v28 = vpack.c.bf16 %v3395_v45, %v3393_v36  ;;  %v10075_v45 = vld [vmem:[#allocation4_spill] sm:$0xff] }
 0x492   :  { %v2576_v19 = vpop.permute.xlu1 %2575  ;;  %v3162_v36 = vadd.f32 %v10075_v45, %v2826_v22  ;;  %v10080_v22 = vld [vmem:[#allocation24_spill] sm:$0xff]  ;;  %v3416_v39 = vmax.f32 %v3332_v2, 0.0  ;;  %v10091_v2 = vld [vmem:[#allocation26_spill] sm:$0xff] }
 0x493   :  { %10065 = vst [vmem:[#allocation28_spill] sm:$0xff] %v8160_v28  ;;  %v2775_v42 = vmul.f32 %v2576_v19, %v10081_v1  ;;  %v2912_v1 = vpop.permute.xlu0 %2911 }
 0x494   :  { %v3330_v57 = vadd.f32 %v3246_v59, %v3162_v36  ;;  %v10088_v36 = vld [vmem:[#allocation62_spill] sm:$0xff] }
 0x495   :  { %1582 = vadd.xlane.f32.xlu2 %v1581_v12  ;;  %v10078_v12 = vld [vmem:[#allocation48_spill] sm:$0xff]  ;;  %v3111_v56 = vadd.f32 %v2912_v1, %v2775_v42  ;;  %v2812_v47 = vmul.f32 %v8012_v6, %v10088_v36 }
 0x496   :  { %v3160_v30 = vadd.f32 %v10078_v12, %v2824_v14  ;;  %v3244_v14 = vld [vmem:[%s9707_s1 + $0x1c0] sm:$0xff]  ;;  %v3238_v6 = vld [vmem:[%s9707_s1 + $0x190] sm:$0xff] }
 0x498   :  { %v3328_v62 = vadd.f32 %v3244_v14, %v3160_v30  ;;  %v3195_v30 = vld [vmem:[%s9707_s1 + $0x38] sm:$0xff] }
 0x49a   :  { %v2907_v37 = vpop.permute.xlu1 %2906 }
 0x49d   :  { %1574 = vadd.xlane.f32.xlu2 %v1573_v33  ;;  %v2774_v33 = vmul.f32 %v2576_v19, %v10080_v22  ;;  %v3242_v19 = vld [vmem:[%s9707_s1 + $0x1b0] sm:$0xff]  ;;  %v10086_v22 = vld [vmem:[#allocation63_spill] sm:$0xff] }
 0x49e   :  { %v8182_v40 = vpop.permute.xlu2 %2715  ;;  %v2816_v46 = vmul.f32 %v8154_v8, %v10086_v22 }
 0x49f   :  { %v2830_v27 = vmul.f32 %v8182_v40, %v10076_v35  ;;  %v10082_v35 = vld [vmem:[#allocation46_spill] sm:$0xff]  ;;  %v3110_v50 = vadd.f32 %v2912_v1, %v2774_v33  ;;  %v3326_v33 = vadd.f32 %v3242_v19, %v3158_v53  ;;  %v3414_v1 = vmax.f32 %v3330_v57, 0.0 }
 0x4a0   :  { %v3152_v28 = vadd.f32 %v10093_v38, %v2816_v46  ;;  %v3412_v53 = vmax.f32 %v3328_v62, 0.0  ;;  %v3192_v19 = vld [vmem:[%s9707_s1 + $0x20] sm:$0xff]  ;;  %v10094_v46 = vld [vmem:[#allocation60_spill] sm:$0xff] }
 0x4a1   :  { %v3166_v41 = vadd.f32 %v10082_v35, %v2830_v27  ;;  %v3156_v27 = vadd.f32 %v10087_v60, %v2820_v5  ;;  %v3194_v5 = vld [vmem:[%s9707_s1 + $0x30] sm:$0xff]  ;;  %v3410_v20 = vmax.f32 %v3326_v33, 0.0 }
 0x4a2   :  { %v3278_v57 = vadd.f32 %v3194_v5, %v3110_v50  ;;  %v3552_v18 = vpack.c.bf16 %v3414_v1, %v3412_v53  ;;  %v3234_v33 = vld [vmem:[%s9707_s1 + $0x170] sm:$0xff] }
 0x4a3   :  { %v3334_v4 = vadd.f32 %v3250_v26, %v3166_v41  ;;  %v3240_v41 = vld [vmem:[%s9707_s1 + $0x1a0] sm:$0xff] }
 0x4a4   :  { %v10089_v26 = vld [vmem:[#allocation50_spill] sm:$0xff] }
 0x4a5   :  { %1554 = vadd.xlane.f32.xlu2 %v1553_v3  ;;  %v3418_v51 = vmax.f32 %v3334_v4, 0.0  ;;  %v3154_v59 = vadd.f32 %v10089_v26, %v2818_v49  ;;  %v10090_v4 = vld [vmem:[#allocation22_spill] sm:$0xff]  ;;  %v10092_v49 = vld [vmem:[#allocation65_spill] sm:$0xff] }
 0x4a6   :  { %v2571_v3 = vpop.permute.xlu2 %2570  ;;  %v2814_v36 = vmul.f32 %v7952_v7, %v10092_v49  ;;  %v3236_v7 = vld [vmem:[%s9707_s1 + $0x180] sm:$0xff]  ;;  %v3148_v49 = vadd.f32 %v10032_v44, %v2812_v47  ;;  %v3362_v44 = vmax.f32 %v3278_v57, 0.0 }
 0x4a7   :  { %v2772_v42 = vmul.f32 %v2571_v3, %v10090_v4  ;;  %v2773_v14 = vmul.f32 %v2571_v3, %v10091_v2  ;;  %v3554_v22 = vpack.c.bf16 %v3418_v51, %v3416_v39  ;;  %v3324_v51 = vadd.f32 %v3240_v41, %v3156_v27  ;;  %v10095_v27 = vld [vmem:[#allocation61_spill] sm:$0xff] }
 0x4a8   :  { %v3279_v39 = vadd.f32 %v3195_v30, %v3111_v56  ;;  %v2808_v2 = vmul.f32 %v8003_v55, %v10094_v46  ;;  %v3322_v62 = vadd.f32 %v3238_v6, %v3154_v59  ;;  %v3232_v56 = vld [vmem:[%s9707_s1 + $0x160] sm:$0xff]  ;;  %v3150_v50 = vadd.f32 %v10028_v16, %v2814_v36  ;;  %v8261_v16 = vpop.permute.xlu1 %2981  ;;  %v3230_v36 = vld [vmem:[%s9707_s1 + $0x150] sm:$0xff] }
 0x4a9   :  { %v3108_v3 = vadd.f32 %v2907_v37, %v2772_v42  ;;  %v3109_v4 = vadd.f32 %v2907_v37, %v2773_v14  ;;  %4058 = vmatpush.bf16.msrb.mxu3 %v3554_v22  ;;  %v2810_v37 = vmul.f32 %v7954_v25, %v10095_v27  ;;  %v3408_v41 = vmax.f32 %v3324_v51, 0.0  ;;  %v10099_v46 = vld [vmem:[#allocation54_spill] sm:$0xff] }
 0x4aa   :  { %v3320_v5 = vadd.f32 %v3236_v7, %v3152_v28  ;;  %v3363_v30 = vmax.f32 %v3279_v39, 0.0  ;;  %v3316_v42 = vadd.f32 %v3232_v56, %v3148_v49  ;;  %v3406_v28 = vmax.f32 %v3322_v62, 0.0  ;;  %v2561_v49 = vpop.permute.xlu0 %2560 }
 0x4ab   :  { %v3277_v11 = vadd.f32 %v3193_v0, %v3109_v4  ;;  %v3276_v23 = vadd.f32 %v3192_v19, %v3108_v3  ;;  %v3144_v0 = vadd.f32 %v10031_v10, %v2808_v2  ;;  %v3550_v25 = vpack.c.bf16 %v3410_v20, %v3408_v41  ;;  %v10096_v10 = vld [vmem:[#allocation56_spill] sm:$0xff]  ;;  %v10097_v20 = vld [vmem:[#allocation58_spill] sm:$0xff] }
 0x4ac   :  { %v3404_v1 = vmax.f32 %v3320_v5, 0.0  ;;  %v3318_v6 = vadd.f32 %v3234_v33, %v3150_v50  ;;  %v2806_v53 = vmul.f32 %v7946_v58, %v10097_v20  ;;  %v3400_v51 = vmax.f32 %v3316_v42, 0.0  ;;  %v10098_v4 = vld [vmem:[#allocation34_spill] sm:$0xff]  ;;  %v10102_v42 = vld [vmem:[#allocation17_spill] sm:$0xff] }
 0x4ad   :  { %4059 = vmatpush.bf16.msrb.mxu3 %v3552_v18  ;;  %v3360_v55 = vmax.f32 %v3276_v23, 0.0  ;;  %v3361_v47 = vmax.f32 %v3277_v11, 0.0  ;;  %v3146_v18 = vadd.f32 %v10026_v48, %v2810_v37  ;;  %v3228_v23 = vld [vmem:[%s9707_s1 + $0x140] sm:$0xff]  ;;  %v2804_v11 = vmul.f32 %v10060_v21, %v10096_v10  ;;  %v10100_v37 = vld [vmem:[#allocation16_spill] sm:$0xff] }
 0x4ae   :  { %v8256_v59 = vpop.permute.xlu2 %2645  ;;  %v3548_v19 = vpack.c.bf16 %v3406_v28, %v3404_v1  ;;  %v3312_v57 = vadd.f32 %v3228_v23, %v3144_v0  ;;  %v3224_v21 = vld [vmem:[%s9707_s1 + $0x120] sm:$0xff]  ;;  %v3142_v3 = vadd.f32 %v8129_v9, %v2806_v53  ;;  %v2800_v7 = vmul.f32 %v8172_v54, %v10098_v4  ;;  %v10104_v10 = vld [vmem:[#allocation76_spill] sm:$0xff]  ;;  %v10107_v4 = vld [vmem:[#allocation51_spill] sm:$0xff] }
 0x4af   :  { %v3526_v14 = vpack.c.bf16 %v3362_v44, %v3360_v55  ;;  %v3527_v22 = vpack.c.bf16 %v3363_v30, %v3361_v47  ;;  %v3140_v48 = vadd.f32 %v8147_v52, %v2804_v11  ;;  %v3314_v39 = vadd.f32 %v3230_v36, %v3146_v18  ;;  %v3226_v52 = vld [vmem:[%s9707_s1 + $0x130] sm:$0xff]  ;;  %v3220_v5 = vld [vmem:[%s9707_s1 + $0x100] sm:$0xff] }
 0x4b0   :  { %v2802_v2 = vmul.f32 %v8256_v59, %v10099_v46  ;;  %v3402_v58 = vmax.f32 %v3318_v6, 0.0  ;;  %v3396_v9 = vmax.f32 %v3312_v57, 0.0  ;;  %v2831_v41 = vmul.f32 %v8182_v40, %v10100_v37  ;;  %v2897_v55 = vpop.permute.xlu1 %2896  ;;  %v10101_v0 = vld [vmem:[#allocation74_spill] sm:$0xff]  ;;  %v10103_v40 = vld [vmem:[#allocation21_spill] sm:$0xff] }
 0x4b1   :  { %3950 = vmatpush.bf16.msrb.mxu1 %v3526_v14  ;;  %4060 = vmatpush.bf16.msrb.mxu3 %v3550_v25  ;;  %v3308_v56 = vadd.f32 %v3224_v21, %v3140_v48  ;;  %v3310_v30 = vadd.f32 %v3226_v52, %v3142_v3  ;;  %v3398_v47 = vmax.f32 %v3314_v39, 0.0  ;;  %v2829_v33 = vmul.f32 %v8127_v34, %v10101_v0  ;;  %v3222_v25 = vld [vmem:[%s9707_s1 + $0x110] sm:$0xff]  ;;  %v3251_v34 = vld [vmem:[%s9707_s1 + $0x1f8] sm:$0xff]  ;;  %v3188_v36 = vld [vmem:[%s9707_s1] sm:$0xff] }
 0x4b2   :  { %4292 = vmatpush.bf16.msra.mxu0 %v3527_v22  ;;  %v3546_v27 = vpack.c.bf16 %v3402_v58, %v3400_v51  ;;  %v3138_v44 = vadd.f32 %v8261_v16, %v2802_v2  ;;  %v2768_v14 = vmul.f32 %v2561_v49, %v10102_v42  ;;  %v2769_v22 = vmul.f32 %v2561_v49, %v10103_v40  ;;  %v3249_v21 = vld [vmem:[%s9707_s1 + $0x1e8] sm:$0xff]  ;;  %v10106_v39 = vld [vmem:[#allocation18_spill] sm:$0xff]  ;;  %v10108_v58 = vld [vmem:[#allocation72_spill] sm:$0xff]  ;;  %v2902_v49 = vpop.permute.xlu0 %2901 }
 0x4b3   :  { %v3544_v18 = vpack.c.bf16 %v3398_v47, %v3396_v9  ;;  %v3392_v23 = vmax.f32 %v3308_v56, 0.0  ;;  %v2827_v11 = vmul.f32 %v8166_v32, %v10104_v10  ;;  %v3167_v1 = vadd.f32 %v10082_v35, %v2831_v41  ;;  %v3189_v35 = vld [vmem:[%s9707_s1 + $0x8] sm:$0xff]  ;;  %v3247_v9 = vld [vmem:[%s9707_s1 + $0x1d8] sm:$0xff] }
 0x4b4   :  { %v3104_v6 = vadd.f32 %v2897_v55, %v2768_v14  ;;  %v3105_v20 = vadd.f32 %v2897_v55, %v2769_v22  ;;  %v3394_v53 = vmax.f32 %v3310_v30, 0.0  ;;  %v3306_v48 = vadd.f32 %v3222_v25, %v3138_v44  ;;  %v3245_v47 = vld [vmem:[%s9707_s1 + $0x1c8] sm:$0xff]  ;;  %v10110_v14 = vld [vmem:[#allocation68_spill] sm:$0xff] }
 0x4b5   :  { %4061 = vmatpush.bf16.msrb.mxu3 %v3548_v19  ;;  %v10105_v19 = vld [vmem:[#allocation70_spill] sm:$0xff]  ;;  %v3165_v32 = vadd.f32 %v10073_v31, %v2829_v33  ;;  %v3163_v31 = vadd.f32 %v10075_v45, %v2827_v11  ;;  %v3335_v52 = vadd.f32 %v3251_v34, %v3167_v1  ;;  %v2819_v25 = vmul.f32 %v8112_v13, %v10110_v14  ;;  %v10111_v11 = vld [vmem:[#allocation64_spill] sm:$0xff] }
 0x4b6   :  { %v8286_v62 = vpop.permute.xlu2 %2976  ;;  %v2825_v51 = vmul.f32 %v8119_v15, %v10105_v19  ;;  %v3542_v46 = vpack.c.bf16 %v3394_v53, %v3392_v23  ;;  %v2823_v15 = vmul.f32 %v8121_v63, %v10108_v58  ;;  %v3272_v56 = vadd.f32 %v3188_v36, %v3104_v6 }
 0x4b7   :  { %v3136_v50 = vadd.f32 %v8286_v62, %v2800_v7  ;;  %v3273_v37 = vadd.f32 %v3189_v35, %v3105_v20  ;;  %v3390_v45 = vmax.f32 %v3306_v48, 0.0  ;;  %v3333_v44 = vadd.f32 %v3249_v21, %v3165_v32  ;;  %v5577_v32 = vld [vmem:[%s9708_s5 + $0x4] sm:$0xf] }
 0x4b8   :  { %v3161_v55 = vadd.f32 %v10078_v12, %v2825_v51  ;;  %v3159_v40 = vadd.f32 %v10084_v43, %v2823_v15  ;;  %v3331_v22 = vadd.f32 %v3247_v9, %v3163_v31  ;;  %v2817_v1 = vmul.f32 %v8154_v8, %v10111_v11  ;;  %v3241_v43 = vld [vmem:[%s9707_s1 + $0x1a8] sm:$0xff]  ;;  %v5182_v8 = vld [vmem:[%s9708_s5 + $0xc] sm:$0xf0] }
 0x4b9   :  { %4062 = vmatpush.bf16.msrb.mxu3 %v3546_v27  ;;  %v3304_v28 = vadd.f32 %v3220_v5, %v3136_v50  ;;  %v3191_v50 = vld [vmem:[%s9707_s1 + $0x18] sm:$0xff]  ;;  %v3190_v27 = vld [vmem:[%s9707_s1 + $0x10] sm:$0xff]  ;;  %v10109_v5 = vld [vmem:[#allocation66_spill] sm:$0xff]  ;;  %v3357_v12 = vmax.f32 %v3273_v37, 0.0  ;;  %v3417_v13 = vmax.f32 %v3333_v44, 0.0  ;;  %v3155_v53 = vadd.f32 %v10089_v26, %v2819_v25 }
 0x4ba   :  { %v2821_v30 = vmul.f32 %v8117_v24, %v10109_v5  ;;  %v3243_v24 = vld [vmem:[%s9707_s1 + $0x1b8] sm:$0xff]  ;;  %v3329_v34 = vadd.f32 %v3245_v47, %v3161_v55  ;;  %v3415_v51 = vmax.f32 %v3331_v22, 0.0  ;;  %v8362_v35 = vor.u32 %v5577_v32, %v5182_v8  ;;  %v5578_v31 = vld [vmem:[%s9708_s5 + $0x8] sm:$0xf0]  ;;  %v10115_v22 = vld [vmem:[#allocation20_spill] sm:$0xff] }
 0x4bb   :  { %v3388_v2 = vmax.f32 %v3304_v28, 0.0  ;;  %v3419_v28 = vmax.f32 %v3335_v52, 0.0  ;;  %v3327_v48 = vadd.f32 %v3243_v24, %v3159_v40  ;;  %v3153_v26 = vadd.f32 %v10093_v38, %v2817_v1  ;;  %v5180_v38 = vld [vmem:[%s9708_s5] sm:$0xf]  ;;  %v10113_v44 = vld [vmem:[#allocation55_spill] sm:$0xff]  ;;  %v3223_v24 = vld [vmem:[%s9707_s1 + $0x118] sm:$0xff] }
 0x4bc   :  { %v3157_v6 = vadd.f32 %v10087_v60, %v2821_v30  ;;  %v3239_v60 = vld [vmem:[%s9707_s1 + $0x198] sm:$0xff]  ;;  %v3413_v21 = vmax.f32 %v3329_v34, 0.0  ;;  %v10112_v30 = vld [vmem:[#allocation52_spill] sm:$0xff]  ;;  %v2803_v47 = vmul.f32 %v8256_v59, %v10113_v44  ;;  %v3221_v59 = vld [vmem:[%s9707_s1 + $0x108] sm:$0xff] }
 0x4bd   :  { %4063 = vmatpush.bf16.msrb.mxu3 %v3544_v18  ;;  %v3540_v33 = vpack.c.bf16 %v3390_v45, %v3388_v2  ;;  %v3356_v18 = vmax.f32 %v3272_v56, 0.0  ;;  %v3555_v19 = vpack.c.bf16 %v3419_v28, %v3417_v13  ;;  %v5181_v56 = vor.u32 %v5578_v31, %v5180_v38  ;;  %v5580_v25 = vld [vmem:[%s9708_s5 + $0x1c] sm:$0xf]  ;;  %v5581_v34 = vld [vmem:[%s9708_s5 + $0x20] sm:$0xf0]  ;;  %v10117_v13 = vld [vmem:[#allocation39_spill] sm:$0xff] }
 0x4be   :  { %v2566_v57 = vpop.permute.xlu2 %2565  ;;  %v2801_v55 = vmul.f32 %v8172_v54, %v10112_v30  ;;  %v5194_v54 = vld [vmem:[%s9708_s5 + $0x24] sm:$0xf0]  ;;  %v10119_v32 = vld [vmem:[#allocation28_spill] sm:$0xff] }
 0x4bf   :  { %v2770_v3 = vmul.f32 %v2566_v57, %v10106_v39  ;;  %v2771_v7 = vmul.f32 %v2566_v57, %v10107_v4  ;;  %v3325_v57 = vadd.f32 %v3241_v43, %v3157_v6  ;;  %v3237_v39 = vld [vmem:[%s9707_s1 + $0x188] sm:$0xff]  ;;  %v3553_v4 = vpack.c.bf16 %v3415_v51, %v3413_v21  ;;  %v10116_v6 = vld [vmem:[#allocation30_spill] sm:$0xff] }
 0x4c0   :  { %v3321_v58 = vadd.f32 %v3237_v39, %v3153_v26  ;;  %v3137_v14 = vadd.f32 %v8286_v62, %v2801_v55  ;;  %v3139_v62 = vadd.f32 %v8261_v16, %v2803_v47  ;;  %v8412_v28 = vor.u32 %v5580_v25, %v5194_v54  ;;  %v5192_v16 = vld [vmem:[%s9708_s5 + $0x18] sm:$0xf]  ;;  %v10122_v44 = vld [vmem:[#allocation43_spill] sm:$0xff] }
 0x4c1   :  { %v3106_v41 = vadd.f32 %v2902_v49, %v2770_v3  ;;  %v3107_v63 = vadd.f32 %v2902_v49, %v2771_v7  ;;  %4064 = vmatpush.bf16.msrb.mxu3 %v3542_v46  ;;  %v3323_v3 = vadd.f32 %v3239_v60, %v3155_v53  ;;  %v3411_v46 = vmax.f32 %v3327_v48, 0.0  ;;  %v2891_v25 = vld [vmem:[%s9705_s4 + $0x138] sm:$0xff] }
 0x4c2   :  { %v3409_v15 = vmax.f32 %v3325_v57, 0.0  ;;  %v3307_v1 = vadd.f32 %v3223_v24, %v3139_v62  ;;  %v5193_v48 = vor.u32 %v5581_v34, %v5192_v16  ;;  %v5589_v24 = vld [vmem:[%s9708_s5 + $0x64] sm:$0xf] }
 0x4c3   :  { %v3275_v0 = vadd.f32 %v3191_v50, %v3107_v63  ;;  %v3274_v42 = vadd.f32 %v3190_v27, %v3106_v41  ;;  %v3407_v27 = vmax.f32 %v3323_v3, 0.0  ;;  %v3405_v41 = vmax.f32 %v3321_v58, 0.0  ;;  %v10120_v3 = vld [vmem:[#allocation38_spill] sm:$0xff] }
 0x4c4   :  { %v3551_v50 = vpack.c.bf16 %v3411_v46, %v3409_v15  ;;  %v3391_v8 = vmax.f32 %v3307_v1, 0.0  ;;  %v5206_v58 = vld [vmem:[%s9708_s5 + $0x3c] sm:$0xf0] }
 0x4c5   :  { %4065 = vmatpush.bf16.msrb.mxu3 %v3540_v33  ;;  %v3358_v23 = vmax.f32 %v3274_v42, 0.0  ;;  %v3359_v10 = vmax.f32 %v3275_v0, 0.0  ;;  %v10114_v33 = vld [vmem:[#allocation47_spill] sm:$0xff]  ;;  %v2888_v34 = vld [vmem:[%s9705_s4 + $0x120] sm:$0xff] }
 0x4c7   :  { %v3524_v36 = vpack.c.bf16 %v3358_v23, %v3356_v18  ;;  %v3525_v20 = vpack.c.bf16 %v3359_v10, %v3357_v12  ;;  %v3305_v18 = vadd.f32 %v3221_v59, %v3137_v14 }
 0x4c8   :  { %4066 = vmatmul.bf16.vlgmr.msrb.gmra.mxu3 %v8362_v35 }
 0x4c9   :  { %3951 = vmatpush.bf16.msrb.mxu1 %v3524_v36  ;;  %4293 = vmatpush.bf16.msra.mxu0 %v3525_v20  ;;  %v10118_v36 = vld [vmem:[#allocation2_spill] sm:$0xff]  ;;  %v3389_v53 = vmax.f32 %v3305_v18, 0.0 }
 0x4cb   :  { %v3541_v26 = vpack.c.bf16 %v3391_v8, %v3389_v53 }
 0x4cc   :  { %3952 = vmatmul.bf16.vlgmr.msrb.gmra.mxu1 %v5181_v56  ;;  %4294 = vmatmul.bf16.vlgmr.msra.gmra.mxu0 %v5181_v56 }
 0x4cd   :  { %4400 = vmatpush.bf16.msra.mxu1 %v3555_v19  ;;  %v1579_v7 = vpop.xlane.xlu0 %1578 }
 0x4ce   :  { %v1630_v2 = vmul.f32 0.0051020407, %v1579_v7  ;;  %v10121_v7 = vld [vmem:[#allocation33_spill] sm:$0xff] }
 0x4d0   :  { %v8376_v52 = vsub.f32 %v10036_v29, %v1630_v2  ;;  %v8379_v49 = vsub.f32 %v8061_v61, %v1630_v2  ;;  %v3549_v29 = vpack.c.bf16 %v3407_v27, %v3405_v41  ;;  %v5583_v2 = vld [vmem:[%s9708_s5 + $0x34] sm:$0xf]  ;;  %v5204_v27 = vld [vmem:[%s9708_s5 + $0x30] sm:$0xf]  ;;  %v5586_v41 = vld [vmem:[%s9708_s5 + $0x4c] sm:$0xf] }
 0x4d1   :  { %4401 = vmatpush.bf16.msra.mxu1 %v3553_v4  ;;  %v8454_v31 = vor.u32 %v5583_v2, %v5206_v58  ;;  %v10128_v58 = vld [vmem:[#allocation40_spill] sm:$0xff] }
 0x4d2   :  { %v1794_v9 = vmul.f32 %v8376_v52, %v8376_v52  ;;  %v1795_v37 = vmul.f32 %v8379_v49, %v8379_v49 }
 0x4d4   :  { %v1954_v63 = vsel %vm1423_vm1, %v1795_v37, 0.0 }
 0x4d5   :  { %4402 = vmatpush.bf16.msra.mxu1 %v3551_v50  ;;  %v1591_v45 = vpop.xlane.xlu1 %1590  ;;  %v1955_v5 = vadd.f32 %v1954_v63, %v1794_v9  ;;  %v5584_v9 = vld [vmem:[%s9708_s5 + $0x38] sm:$0xf0]  ;;  %v5218_v63 = vld [vmem:[%s9708_s5 + $0x54] sm:$0xf0]  ;;  %v1563_v54 = vpop.xlane.xlu0 %1562 }
 0x4d6   :  { %v1633_v61 = vmul.f32 0.0051020407, %v1591_v45  ;;  %v5205_v37 = vor.u32 %v5584_v9, %v5204_v27  ;;  %v5216_v45 = vld [vmem:[%s9708_s5 + $0x48] sm:$0xf]  ;;  %v1626_v18 = vmul.f32 0.0051020407, %v1563_v54 }
 0x4d7   :  { %1956 = vadd.xlane.f32.xlu0 %v1955_v5  ;;  %v5587_v5 = vld [vmem:[%s9708_s5 + $0x50] sm:$0xf0]  ;;  %v10130_v27 = vld [vmem:[#allocation6_spill] sm:$0xff] }
 0x4d8   :  { %v8391_v0 = vsub.f32 %v10045_v17, %v1633_v61  ;;  %v8394_v42 = vsub.f32 %v10114_v33, %v1633_v61  ;;  %4071 = vmatmul.bf16.gmra.mxu3 %v8412_v28  ;;  %v5217_v61 = vor.u32 %v5587_v5, %v5216_v45  ;;  %v10123_v33 = vld [vmem:[#allocation32_spill] sm:$0xff] }
 0x4d9   :  { %4403 = vmatpush.bf16.msra.mxu1 %v3549_v29  ;;  %v8470_v29 = vor.u32 %v5586_v41, %v5218_v63  ;;  %v10131_v5 = vld [vmem:[#allocation36_spill] sm:$0xff] }
 0x4da   :  { %v1800_v17 = vmul.f32 %v8391_v0, %v8391_v0  ;;  %v1801_v40 = vmul.f32 %v8394_v42, %v8394_v42 }
 0x4dc   :  { %v1966_v12 = vsel %vm1423_vm1, %v1801_v40, 0.0  ;;  %4299 = vmatmul.bf16.gmra.mxu0 %v5193_v48  ;;  %3957 = vmatmul.bf16.gmra.mxu1 %v5193_v48 }
 0x4dd   :  { %4404 = vmatpush.bf16.msra.mxu1 %v10115_v22  ;;  %v1571_v23 = vpop.xlane.xlu1 %1570  ;;  %v1967_v10 = vadd.f32 %v1966_v12, %v1800_v17  ;;  %v5230_v12 = vld [vmem:[%s9708_s5 + $0x6c] sm:$0xf0] }
 0x4de   :  { %v1628_v11 = vmul.f32 0.0051020407, %v1571_v23 }
 0x4df   :  { %1968 = vadd.xlane.f32.xlu2 %v1967_v10  ;;  %v8499_v10 = vor.u32 %v5589_v24, %v5230_v12 }
 0x4e0   :  { %v8427_v43 = vsub.f32 %v10117_v13, %v1628_v11  ;;  %v8430_v20 = vsub.f32 %v10118_v36, %v1628_v11  ;;  %v10124_v11 = vld [vmem:[#allocation42_spill] sm:$0xff]  ;;  %v10126_v13 = vld [vmem:[#allocation31_spill] sm:$0xff] }
 0x4e1   :  { %4405 = vmatpush.bf16.msra.mxu1 %v10116_v6  ;;  %v10125_v6 = vld [vmem:[#allocation29_spill] sm:$0xff]  ;;  %v8512_v36 = vsub.f32 %v10126_v13, %v1626_v18 }
 0x4e2   :  { %v1790_v19 = vmul.f32 %v8427_v43, %v8427_v43  ;;  %v1791_v51 = vmul.f32 %v8430_v20, %v8430_v20 }
 0x4e3   :  { %v1787_v2 = vmul.f32 %v8512_v36, %v8512_v36 }
 0x4e4   :  { %v1946_v60 = vsel %vm1423_vm1, %v1791_v51, 0.0  ;;  %v5228_v51 = vld [vmem:[%s9708_s5 + $0x60] sm:$0xf] }
 0x4e5   :  { %4406 = vmatpush.bf16.msra.mxu1 %v10119_v32  ;;  %v1567_v57 = vpop.xlane.xlu1 %1566  ;;  %v1947_v21 = vadd.f32 %v1946_v60, %v1790_v19  ;;  %v1559_v19 = vpop.xlane.xlu0 %1558  ;;  %v5590_v32 = vld [vmem:[%s9708_s5 + $0x68] sm:$0xf0]  ;;  %v1938_v63 = vsel %vm1423_vm1, %v1787_v2, 0.0  ;;  %v5266_v2 = vld [vmem:[%s9708_s5 + $0xb4] sm:$0xf0] }
 0x4e6   :  { %v1627_v39 = vmul.f32 0.0051020407, %v1567_v57  ;;  %v5229_v60 = vor.u32 %v5590_v32, %v5228_v51  ;;  %v5595_v51 = vld [vmem:[%s9708_s5 + $0x94] sm:$0xf]  ;;  %v5254_v32 = vld [vmem:[%s9708_s5 + $0x9c] sm:$0xf0] }
 0x4e7   :  { %1948 = vadd.xlane.f32.xlu2 %v1947_v21 }
 0x4e8   :  { %v8439_v4 = vsub.f32 %v10120_v3, %v1627_v39  ;;  %v8442_v46 = vsub.f32 %v10121_v7, %v1627_v39  ;;  %4076 = vmatmul.bf16.gmra.mxu3 %v8454_v31  ;;  %v1625_v3 = vmul.f32 0.0051020407, %v1559_v19 }
 0x4e9   :  { %4407 = vmatpush.bf16.msra.mxu1 %v3541_v26  ;;  %v10127_v26 = vld [vmem:[#allocation37_spill] sm:$0xff] }
 0x4ea   :  { %v1788_v15 = vmul.f32 %v8439_v4, %v8439_v4  ;;  %v1789_v38 = vmul.f32 %v8442_v46, %v8442_v46  ;;  %v8526_v57 = vsub.f32 %v10127_v26, %v1626_v18  ;;  %v8539_v9 = vsub.f32 %v10130_v27, %v1625_v3  ;;  %v5596_v26 = vld [vmem:[%s9708_s5 + $0x98] sm:$0xf0]  ;;  %v5599_v27 = vld [vmem:[%s9708_s5 + $0xb0] sm:$0xf0] }
 0x4ec   :  { %v1942_v56 = vsel %vm1423_vm1, %v1789_v38, 0.0  ;;  %4304 = vmatmul.bf16.gmra.mxu0 %v5205_v37  ;;  %3962 = vmatmul.bf16.gmra.mxu1 %v5205_v37  ;;  %v10129_v38 = vld [vmem:[#allocation5_spill] sm:$0xff]  ;;  %v1785_v54 = vmul.f32 %v8539_v9, %v8539_v9 }
 0x4ed   :  { %v1943_v50 = vadd.f32 %v1942_v56, %v1788_v15 }
 0x4ef   :  { %1944 = vadd.xlane.f32.xlu2 %v1943_v50  ;;  %v1786_v50 = vmul.f32 %v8526_v57, %v8526_v57 }
 0x4f8   :  { %4081 = vmatmul.bf16.gmra.mxu3 %v8470_v29 }
 0x4fc   :  { %4309 = vmatmul.bf16.gmra.mxu0 %v5217_v61  ;;  %3967 = vmatmul.bf16.gmra.mxu1 %v5217_v61  ;;  %v8548_v61 = vsub.f32 %v10131_v5, %v1625_v3  ;;  %v2892_v3 = vld [vmem:[%s9705_s4 + $0x140] sm:$0xff] }
 0x4fe   :  { %v1784_v12 = vmul.f32 %v8548_v61, %v8548_v61 }
 0x500   :  { %v1587_v30 = vpop.xlane.xlu2 %1586 }
 0x501   :  { %v1632_v55 = vmul.f32 0.0051020407, %v1587_v30 }
 0x503   :  { %v8480_v47 = vsub.f32 %v10122_v44, %v1632_v55  ;;  %v8483_v14 = vsub.f32 %v10123_v33, %v1632_v55  ;;  %v1939_v44 = vadd.f32 %v1938_v63, %v1786_v50  ;;  %v5592_v33 = vld [vmem:[%s9708_s5 + $0x7c] sm:$0xf]  ;;  %v5264_v50 = vld [vmem:[%s9708_s5 + $0xa8] sm:$0xf]  ;;  %v5601_v63 = vld [vmem:[%s9708_s5 + $0xc4] sm:$0xf] }
 0x505   :  { %v1798_v59 = vmul.f32 %v8480_v47, %v8480_v47  ;;  %v1799_v17 = vmul.f32 %v8483_v14, %v8483_v14 }
 0x507   :  { %3091 = vperm.xlu2 %5642, %v2891_v25   ;;  %v1962_v40 = vsel %vm1423_vm1, %v1799_v17, 0.0  ;;  %v5242_v25 = vld [vmem:[%s9708_s5 + $0x84] sm:$0xf0] }
 0x508   :  { %v1583_v62 = vpop.xlane.xlu2 %1582  ;;  %v1963_v22 = vadd.f32 %v1962_v40, %v1798_v59  ;;  %4086 = vmatmul.bf16.gmra.mxu3 %v8499_v10  ;;  %v8558_v17 = vor.u32 %v5592_v33, %v5242_v25  ;;  %v10132_v40 = vld [vmem:[#allocation35_spill] sm:$0xff] }
 0x509   :  { %v1631_v23 = vmul.f32 0.0051020407, %v1583_v62 }
 0x50a   :  { %1964 = vadd.xlane.f32.xlu1 %v1963_v22  ;;  %v10133_v22 = vld [vmem:[#allocation53_spill] sm:$0xff] }
 0x50b   :  { %v8502_v1 = vsub.f32 %v10124_v11, %v1631_v23  ;;  %v8505_v16 = vsub.f32 %v10125_v6, %v1631_v23  ;;  %v1934_v11 = vsel %vm1423_vm1, %v1785_v54, 0.0  ;;  %v5240_v6 = vld [vmem:[%s9708_s5 + $0x78] sm:$0xf]  ;;  %v5276_v54 = vld [vmem:[%s9708_s5 + $0xc0] sm:$0xf] }
 0x50c   :  { %4314 = vmatmul.bf16.gmra.mxu0 %v5229_v60  ;;  %3972 = vmatmul.bf16.gmra.mxu1 %v5229_v60  ;;  %v1935_v19 = vadd.f32 %v1934_v11, %v1784_v12  ;;  %v5252_v60 = vld [vmem:[%s9708_s5 + $0x90] sm:$0xf] }
 0x50d   :  { %v1796_v53 = vmul.f32 %v8502_v1, %v8502_v1  ;;  %v1797_v48 = vmul.f32 %v8505_v16, %v8505_v16 }
 0x50f   :  { %3076 = vperm.xlu2 %5642, %v2888_v34   ;;  %v1958_v8 = vsel %vm1423_vm1, %v1797_v48, 0.0  ;;  %v5593_v34 = vld [vmem:[%s9708_s5 + $0x80] sm:$0xf0] }
 0x510   :  { %v1575_v21 = vpop.xlane.xlu2 %1574  ;;  %v1959_v39 = vadd.f32 %v1958_v8, %v1796_v53  ;;  %v5241_v53 = vor.u32 %v5593_v34, %v5240_v6  ;;  %v8587_v8 = vor.u32 %v5595_v51, %v5254_v32 }
 0x511   :  { %v1629_v7 = vmul.f32 0.0051020407, %v1575_v21  ;;  %v5253_v21 = vor.u32 %v5596_v26, %v5252_v60 }
 0x512   :  { %1960 = vadd.xlane.f32.xlu1 %v1959_v39  ;;  %v2893_v39 = vld [vmem:[%s9705_s4 + $0x148] sm:$0xff] }
 0x513   :  { %v8531_v15 = vsub.f32 %v10128_v58, %v1629_v7  ;;  %v8534_v56 = vsub.f32 %v10129_v38, %v1629_v7  ;;  %v5598_v7 = vld [vmem:[%s9708_s5 + $0xac] sm:$0xf]  ;;  %v2890_v38 = vld [vmem:[%s9705_s4 + $0x130] sm:$0xff] }
 0x514   :  { %v8608_v58 = vor.u32 %v5598_v7, %v5266_v2  ;;  %v5288_v7 = vld [vmem:[%s9708_s5 + $0xd8] sm:$0xf]  ;;  %v5605_v2 = vld [vmem:[%s9708_s5 + $0xe0] sm:$0xf0] }
 0x515   :  { %v1792_v37 = vmul.f32 %v8531_v15, %v8531_v15  ;;  %v1793_v41 = vmul.f32 %v8534_v56, %v8534_v56 }
 0x517   :  { %v1950_v45 = vsel %vm1423_vm1, %v1793_v41, 0.0  ;;  %v2889_v41 = vld [vmem:[%s9705_s4 + $0x128] sm:$0xff] }
 0x518   :  { %v1555_v30 = vpop.xlane.xlu2 %1554  ;;  %v1951_v55 = vadd.f32 %v1950_v45, %v1792_v37  ;;  %4091 = vmatmul.bf16.gmra.mxu3 %v8558_v17  ;;  %v5265_v37 = vor.u32 %v5599_v27, %v5264_v50  ;;  %v5278_v45 = vld [vmem:[%s9708_s5 + $0xcc] sm:$0xf0]  ;;  %v5289_v27 = vor.u32 %v5605_v2, %v5288_v7 }
 0x519   :  { %v1624_v59 = vmul.f32 0.0051020407, %v1555_v30  ;;  %v8629_v30 = vor.u32 %v5601_v63, %v5278_v45 }
 0x51a   :  { %1952 = vadd.xlane.f32.xlu0 %v1951_v55  ;;  %1940 = vadd.xlane.f32.xlu1 %v1939_v44 }
 0x51b   :  { %v8561_v62 = vsub.f32 %v10132_v40, %v1624_v59  ;;  %v8564_v24 = vsub.f32 %v10133_v22, %v1624_v59  ;;  %v5602_v59 = vld [vmem:[%s9708_s5 + $0xc8] sm:$0xf0] }
 0x51c   :  { %3977 = vmatmul.bf16.gmra.mxu1 %v5241_v53  ;;  %4319 = vmatmul.bf16.gmra.mxu0 %v5241_v53  ;;  %v5277_v40 = vor.u32 %v5602_v59, %v5276_v54  ;;  %v5604_v53 = vld [vmem:[%s9708_s5 + $0xdc] sm:$0xf]  ;;  %v5302_v54 = vld [vmem:[%s9708_s5 + $0xfc] sm:$0xf0] }
 0x51d   :  { %v1782_v18 = vmul.f32 %v8561_v62, %v8561_v62  ;;  %v1783_v23 = vmul.f32 %v8564_v24, %v8564_v24 }
 0x51f   :  { %v1930_v13 = vsel %vm1423_vm1, %v1783_v23, 0.0 }
 0x520   :  { %v1931_v48 = vadd.f32 %v1930_v13, %v1782_v18 }
 0x522   :  { %1932 = vadd.xlane.f32.xlu0 %v1931_v48  ;;  %1936 = vadd.xlane.f32.xlu1 %v1935_v19  ;;  %v5290_v48 = vld [vmem:[%s9708_s5 + $0xe4] sm:$0xf0] }
 0x523   :  { %v8650_v32 = vor.u32 %v5604_v53, %v5290_v48  ;;  %v5608_v53 = vld [vmem:[%s9708_s5 + $0xf8] sm:$0xf0] }
 0x528   :  { %4096 = vmatmul.bf16.gmra.mxu3 %v8587_v8 }
 0x52c   :  { %3982 = vmatmul.bf16.gmra.mxu1 %v5253_v21  ;;  %4324 = vmatmul.bf16.gmra.mxu0 %v5253_v21 }
 0x536   :  { %3101 = vperm.xlu0 %5641, %v2893_v39  }
 0x538   :  { %4101 = vmatmul.bf16.gmra.mxu3 %v8608_v58 }
 0x53b   :  { %3096 = vperm.xlu1 %5643, %v2892_v3   ;;  %v2512_v3 = vld [vmem:[%s9706_s3 + $0x130] sm:$0xff] }
 0x53c   :  { %3987 = vmatmul.bf16.gmra.mxu1 %v5265_v37  ;;  %4329 = vmatmul.bf16.gmra.mxu0 %v5265_v37 }
 0x53e   :  { %3086 = vperm.xlu0 %5641, %v2890_v38  }
 0x543   :  { %3081 = vperm.xlu1 %5643, %v2889_v41  }
 0x548   :  { %4106 = vmatmul.bf16.gmra.mxu3 %v8629_v30 }
 0x549   :  { %v3953_v33 = vpop.f32.mrf.mxu1 }
 0x54a   :  { %v1957_v5 = vpop.xlane.xlu0 %1956 }
 0x54b   :  { %v2008_v55 = vmul.f32 0.0051020407, %v1957_v5  ;;  %v4067_v25 = vpop.f32.mrf.mxu3 }
 0x54c   :  { %3992 = vmatmul.bf16.gmra.mxu1 %v5277_v40  ;;  %4334 = vmatmul.bf16.gmra.mxu0 %v5277_v40  ;;  %v8640_v34 = vadd.f32 %v4067_v25, %v3953_v33  ;;  %v5607_v25 = vld [vmem:[%s9708_s5 + $0xf4] sm:$0xf] }
 0x54d   :  { %v2050_v44 = vadd.f32 1e-05, %v2008_v55 }
 0x54f   :  { %5708 = vrsqrt.f32 %v2050_v44  ;;  %vm2440_vm15 = vweird.f32 %v2050_v44 }
 0x551   :  { %v3955_v23 = vpop.f32.mrf.mxu1 }
 0x552   :  { %v8638_v22 = vpop.xlane.xlu2 %1968 }
 0x553   :  { %v4069_v11 = vpop.f32.mrf.mxu3 }
 0x554   :  { %v8642_v13 = vadd.f32 %v4069_v11, %v3955_v23  ;;  %v2510_v11 = vld [vmem:[%s9706_s3 + $0x120] sm:$0xff] }
 0x555   :  { %v5709_v12 = vpop.eup %5708 }
 0x556   :  { %v2435_v18 = vmul.f32 %v5709_v12, %v2050_v44  ;;  %vm2441_vm14 = vweird.f32 %v5709_v12 }
 0x557   :  { %vm2442_vm2 = vmor %vm2440_vm15, %vm2441_vm14 }
 0x558   :  { %v2436_v6 = vmul.f32 %v5709_v12, %v2435_v18  ;;  %4111 = vmatmul.bf16.gmra.mxu3 %v8650_v32 }
 0x559   :  { %v3958_v41 = vpop.f32.mrf.mxu1 }
 0x55a   :  { %v2437_v19 = vmul.f32 0.5, %v2436_v6  ;;  %v1949_v51 = vpop.xlane.xlu2 %1948  ;;  %v5300_v6 = vld [vmem:[%s9708_s5 + $0xf0] sm:$0xf] }
 0x55b   :  { %v2006_v60 = vmul.f32 0.0051020407, %v1949_v51  ;;  %v4072_v50 = vpop.f32.mrf.mxu3  ;;  %v5301_v51 = vor.u32 %v5608_v53, %v5300_v6 }
 0x55c   :  { %v2438_v26 = vsub.f32 1.5, %v2437_v19  ;;  %3997 = vmatmul.bf16.gmra.mxu1 %v5289_v27  ;;  %4339 = vmatmul.bf16.gmra.mxu0 %v5289_v27  ;;  %v8662_v55 = vadd.f32 %v4072_v50, %v3958_v41  ;;  %v5610_v50 = vld [vmem:[%s9708_s5 + $0x10c] sm:$0xf]  ;;  %v5314_v27 = vld [vmem:[%s9708_s5 + $0x114] sm:$0xf0] }
 0x55d   :  { %v2048_v21 = vadd.f32 1e-05, %v2006_v60  ;;  %v8696_v41 = vor.u32 %v5610_v50, %v5314_v27 }
 0x55e   :  { %v2439_v39 = vmul.f32 %v5709_v12, %v2438_v26 }
 0x55f   :  { %5710 = vrsqrt.f32 %v2048_v21  ;;  %vm2420_vm4 = vweird.f32 %v2048_v21 }
 0x560   :  { %v2443_v38 = vsel %vm2442_vm2, %v5709_v12, %v2439_v39  ;;  %v8672_v12 = vor.u32 %v5607_v25, %v5302_v54 }
 0x561   :  { %v2554_v37 = vmul.f32 %v2512_v3, %v2443_v38  ;;  %v3960_v33 = vpop.f32.mrf.mxu1 }
 0x562   :  { %v1945_v60 = vpop.xlane.xlu2 %1944 }
 0x563   :  { %2750 = vperm.xlu2 %5642, %v2554_v37   ;;  %v4074_v44 = vpop.f32.mrf.mxu3 }
 0x564   :  { %v8670_v40 = vadd.f32 %v4074_v44, %v3960_v33  ;;  %v5611_v44 = vld [vmem:[%s9708_s5 + $0x110] sm:$0xf0] }
 0x565   :  { %v5711_v63 = vpop.eup %5710 }
 0x566   :  { %v2415_v45 = vmul.f32 %v5711_v63, %v2048_v21  ;;  %10134 = vst [vmem:[#allocation3_spill] sm:$0xff] %v8670_v40  ;;  %vm2421_vm3 = vweird.f32 %v5711_v63  ;;  %v2005_v21 = vmul.f32 0.0051020407, %v1945_v60 }
 0x567   :  { %vm2422_vm5 = vmor %vm2420_vm4, %vm2421_vm3 }
 0x568   :  { %v2416_v5 = vmul.f32 %v5711_v63, %v2415_v45  ;;  %4116 = vmatmul.bf16.gmra.mxu3 %v8672_v12  ;;  %v8684_v3 = vadd.f32 1e-05, %v2005_v21 }
 0x569   :  { %v3963_v39 = vpop.f32.mrf.mxu1 }
 0x56a   :  { %v2417_v59 = vmul.f32 0.5, %v2416_v5  ;;  %5712 = vrsqrt.f32 %v8684_v3  ;;  %v5312_v5 = vld [vmem:[%s9708_s5 + $0x108] sm:$0xf]  ;;  %vm2410_vm10 = vweird.f32 %v8684_v3 }
 0x56b   :  { %v4077_v19 = vpop.f32.mrf.mxu3  ;;  %v5313_v25 = vor.u32 %v5611_v44, %v5312_v5 }
 0x56c   :  { %v2418_v18 = vsub.f32 1.5, %v2417_v59  ;;  %4002 = vmatmul.bf16.gmra.mxu1 %v5301_v51  ;;  %4344 = vmatmul.bf16.gmra.mxu0 %v5301_v51  ;;  %v8686_v7 = vadd.f32 %v4077_v19, %v3963_v39 }
 0x56e   :  { %v2419_v23 = vmul.f32 %v5711_v63, %v2418_v18  ;;  %10135 = vst [vmem:[#allocation15_spill] sm:$0xff] %v8686_v7 }
 0x570   :  { %v2423_v48 = vsel %vm2422_vm5, %v5711_v63, %v2419_v23  ;;  %v8706_v18 = vpop.eup %5712  ;;  %v2011_v23 = vmul.f32 0.0051020407, %v8638_v22  ;;  %v5613_v22 = vld [vmem:[%s9708_s5 + $0x124] sm:$0xf] }
 0x571   :  { %v2552_v26 = vmul.f32 %v2510_v11, %v2423_v48  ;;  %v3965_v38 = vpop.f32.mrf.mxu1  ;;  %v2405_v11 = vmul.f32 %v8706_v18, %v8684_v3  ;;  %vm2411_vm9 = vweird.f32 %v8706_v18 }
 0x572   :  { %v8711_v6 = vadd.f32 1e-05, %v2011_v23  ;;  %v5324_v23 = vld [vmem:[%s9708_s5 + $0x120] sm:$0xf]  ;;  %vm8757_vm11 = vmor %vm2410_vm10, %vm2411_vm9 }
 0x573   :  { %2740 = vperm.xlu1 %5643, %v2552_v26   ;;  %v4079_v2 = vpop.f32.mrf.mxu3  ;;  %v2406_v26 = vmul.f32 %v8706_v18, %v2405_v11 }
 0x574   :  { %v8694_v37 = vadd.f32 %v4079_v2, %v3965_v38  ;;  %v5326_v2 = vld [vmem:[%s9708_s5 + $0x12c] sm:$0xf0]  ;;  %vm2470_vm5 = vweird.f32 %v8711_v6 }
 0x575   :  { %v8727_v27 = vor.u32 %v5613_v22, %v5326_v2 }
 0x576   :  { %10136 = vst [vmem:[#allocation14_spill] sm:$0xff] %v8694_v37 }
 0x577   :  { %10139 = vst [vmem:[#allocation11_spill] sm:$0xff] %v8727_v27 }
 0x578   :  { %4121 = vmatmul.bf16.gmra.mxu3 %v8696_v41 }
 0x579   :  { %v3968_v59 = vpop.f32.mrf.mxu1 }
 0x57b   :  { %v4082_v33 = vpop.f32.mrf.mxu3 }
 0x57c   :  { %4007 = vmatmul.bf16.gmra.mxu1 %v5313_v25  ;;  %4349 = vmatmul.bf16.gmra.mxu0 %v5313_v25  ;;  %v8713_v19 = vadd.f32 %v4082_v33, %v3968_v59 }
 0x57d   :  { %v1965_v63 = vpop.xlane.xlu1 %1964 }
 0x57e   :  { %v2010_v45 = vmul.f32 0.0051020407, %v1965_v63  ;;  %10137 = vst [vmem:[#allocation25_spill] sm:$0xff] %v8713_v19 }
 0x580   :  { %v2052_v54 = vadd.f32 1e-05, %v2010_v45  ;;  %v2407_v45 = vmul.f32 0.5, %v2406_v26 }
 0x581   :  { %v3970_v21 = vpop.f32.mrf.mxu1 }
 0x582   :  { %5714 = vrsqrt.f32 %v2052_v54  ;;  %vm2460_vm7 = vweird.f32 %v2052_v54 }
 0x583   :  { %v4084_v51 = vpop.f32.mrf.mxu3  ;;  %5716 = vrsqrt.f32 %v8711_v6 }
 0x584   :  { %v8725_v50 = vadd.f32 %v4084_v51, %v3970_v21  ;;  %v5614_v51 = vld [vmem:[%s9708_s5 + $0x128] sm:$0xf0]  ;;  %v2408_v21 = vsub.f32 1.5, %v2407_v45 }
 0x585   :  { %v1961_v53 = vpop.xlane.xlu1 %1960 }
 0x586   :  { %v2009_v48 = vmul.f32 0.0051020407, %v1961_v53  ;;  %10138 = vst [vmem:[#allocation9_spill] sm:$0xff] %v8725_v50 }
 0x588   :  { %v5715_v60 = vpop.eup %5714  ;;  %v8716_v39 = vadd.f32 1e-05, %v2009_v48  ;;  %4126 = vmatmul.bf16.gmra.mxu3 %v8727_v27 }
 0x589   :  { %v2455_v38 = vmul.f32 %v5715_v60, %v2052_v54  ;;  %v8734_v11 = vpop.eup %5716  ;;  %vm2461_vm6 = vweird.f32 %v5715_v60 }
 0x58a   :  { %5718 = vrsqrt.f32 %v8716_v39  ;;  %vm2462_vm8 = vmor %vm2460_vm7, %vm2461_vm6  ;;  %v2465_v45 = vmul.f32 %v8734_v11, %v8711_v6  ;;  %vm2450_vm13 = vweird.f32 %v8716_v39  ;;  %vm2471_vm4 = vweird.f32 %v8734_v11  ;;  %v5619_v6 = vld [vmem:[%s9708_s5 + $0x154] sm:$0xf] }
 0x58b   :  { %v2456_v63 = vmul.f32 %v5715_v60, %v2455_v38  ;;  %v4087_v48 = vpop.f32.mrf.mxu3  ;;  %v3973_v38 = vpop.f32.mrf.mxu1  ;;  %vm8819_vm6 = vmor %vm2470_vm5, %vm2471_vm4 }
 0x58d   :  { %v2457_v5 = vmul.f32 0.5, %v2456_v63  ;;  %v1953_v44 = vpop.xlane.xlu0 %1952  ;;  %v1941_v33 = vpop.xlane.xlu1 %1940  ;;  %v8743_v63 = vor.u32 %v5614_v51, %v5324_v23  ;;  %v2409_v23 = vmul.f32 %v8706_v18, %v2408_v21  ;;  %v8761_v21 = vadd.f32 %v4087_v48, %v3973_v38  ;;  %v5338_v38 = vld [vmem:[%s9708_s5 + $0x144] sm:$0xf0] }
 0x58e   :  { %v2007_v25 = vmul.f32 0.0051020407, %v1953_v44  ;;  %v2004_v59 = vmul.f32 0.0051020407, %v1941_v33 }
 0x58f   :  { %v2458_v53 = vsub.f32 1.5, %v2457_v5  ;;  %v2514_v5 = vld [vmem:[%s9706_s3 + $0x140] sm:$0xff]  ;;  %4012 = vmatmul.bf16.gmra.mxu1 %v8743_v63  ;;  %10142 = vst [vmem:[#allocation78_spill] sm:$0xff] %v8761_v21  ;;  %v2413_v3 = vsel %vm8757_vm11, %v8706_v18, %v2409_v23  ;;  %v5616_v18 = vld [vmem:[%s9708_s5 + $0x13c] sm:$0xf] }
 0x590   :  { %v5719_v26 = vpop.eup %5718  ;;  %v8739_v22 = vadd.f32 1e-05, %v2007_v25  ;;  %v8741_v2 = vadd.f32 1e-05, %v2004_v59  ;;  %v5336_v21 = vld [vmem:[%s9708_s5 + $0x138] sm:$0xf] }
 0x591   :  { %v2459_v44 = vmul.f32 %v5715_v60, %v2458_v53  ;;  %v2445_v33 = vmul.f32 %v5719_v26, %v8716_v39  ;;  %vm2451_vm12 = vweird.f32 %v5719_v26 }
 0x592   :  { %5720 = vrsqrt.f32 %v8739_v22  ;;  %vm2452_vm14 = vmor %vm2450_vm13, %vm2451_vm12  ;;  %vm2430_vm2 = vweird.f32 %v8739_v22 }
 0x593   :  { %v2446_v25 = vmul.f32 %v5719_v26, %v2445_v33  ;;  %v2463_v59 = vsel %vm2462_vm8, %v5715_v60, %v2459_v44  ;;  %5722 = vrsqrt.f32 %v8741_v2  ;;  %v4089_v44 = vpop.f32.mrf.mxu3 }
 0x594   :  { %v2556_v54 = vmul.f32 %v2514_v5, %v2463_v59  ;;  %v2466_v5 = vmul.f32 %v8734_v11, %v2465_v45 }
 0x595   :  { %v2447_v53 = vmul.f32 0.5, %v2446_v25  ;;  %v1933_v51 = vpop.xlane.xlu0 %1932  ;;  %v1937_v50 = vpop.xlane.xlu1 %1936 }
 0x596   :  { %v2002_v19 = vmul.f32 0.0051020407, %v1933_v51  ;;  %v2003_v37 = vmul.f32 0.0051020407, %v1937_v50  ;;  %2760 = vperm.xlu2 %5642, %v2556_v54   ;;  %v2509_v50 = vld [vmem:[%s9706_s3 + $0x118] sm:$0xff]  ;;  %v3975_v54 = vpop.f32.mrf.mxu1  ;;  %v2467_v51 = vmul.f32 0.5, %v2466_v5 }
 0x597   :  { %v2448_v60 = vsub.f32 1.5, %v2447_v53  ;;  %v2551_v33 = vmul.f32 %v2509_v50, %v2413_v3 }
 0x598   :  { %v5721_v7 = vpop.eup %5720  ;;  %v8764_v25 = vadd.f32 1e-05, %v2002_v19  ;;  %v8766_v59 = vadd.f32 1e-05, %v2003_v37  ;;  %v2513_v19 = vld [vmem:[%s9706_s3 + $0x138] sm:$0xff]  ;;  %v8779_v37 = vadd.f32 %v4089_v44, %v3975_v54  ;;  %v8792_v44 = vor.u32 %v5616_v18, %v5338_v38 }
 0x599   :  { %v2449_v53 = vmul.f32 %v5719_v26, %v2448_v60  ;;  %v2425_v48 = vmul.f32 %v5721_v7, %v8739_v22  ;;  %v8787_v45 = vpop.eup %5722  ;;  %vm2431_vm15 = vweird.f32 %v5721_v7 }
 0x59a   :  { %10143 = vst [vmem:[#allocation41_spill] sm:$0xff] %v8779_v37  ;;  %5724 = vrsqrt.f32 %v8764_v25  ;;  %v2395_v37 = vmul.f32 %v8787_v45, %v8741_v2  ;;  %4131 = vmatmul.bf16.gmra.mxu3 %v8792_v44  ;;  %vm2432_vm3 = vmor %vm2430_vm2, %vm2431_vm15  ;;  %vm2380_vm9 = vweird.f32 %v8764_v25  ;;  %vm2390_vm11 = vweird.f32 %v8766_v59 }
 0x59b   :  { %v2426_v39 = vmul.f32 %v5721_v7, %v2425_v48  ;;  %5726 = vrsqrt.f32 %v8766_v59  ;;  %v2453_v23 = vsel %vm2452_vm14, %v5719_v26, %v2449_v53  ;;  %10144 = vst [vmem:[#allocation79_spill] sm:$0xff] %v8792_v44  ;;  %v5617_v48 = vld [vmem:[%s9708_s5 + $0x140] sm:$0xf0]  ;;  %v4092_v5 = vpop.f32.mrf.mxu3  ;;  %v2468_v53 = vsub.f32 1.5, %v2467_v51  ;;  %v2886_v51 = vld [vmem:[%s9705_s4 + $0x110] sm:$0xff] }
 0x59c   :  { %v2555_v60 = vmul.f32 %v2513_v19, %v2453_v23  ;;  %v8803_v3 = vor.u32 %v5617_v48, %v5336_v21  ;;  %vm2401_vm13 = vweird.f32 %v8787_v45  ;;  %vm2400_vm14 = vweird.f32 %v8741_v2 }
 0x59d   :  { %v2427_v54 = vmul.f32 0.5, %v2426_v39  ;;  %v2396_v39 = vmul.f32 %v8787_v45, %v2395_v37  ;;  %v2469_v22 = vmul.f32 %v8734_v11, %v2468_v53  ;;  %vm2402_vm15 = vmor %vm2400_vm14, %vm2401_vm13 }
 0x59e   :  { %2735 = vperm.xlu2 %5642, %v2551_v33   ;;  %2755 = vperm.xlu1 %5643, %v2555_v60   ;;  %v3978_v19 = vpop.f32.mrf.mxu1  ;;  %v2511_v33 = vld [vmem:[%s9706_s3 + $0x128] sm:$0xff] }
 0x59f   :  { %v2428_v26 = vsub.f32 1.5, %v2427_v54  ;;  %4017 = vmatmul.bf16.gmra.mxu1 %v8803_v3 }
 0x5a0   :  { %v5725_v50 = vpop.eup %5724 }
 0x5a1   :  { %v5727_v18 = vpop.eup %5726  ;;  %v2429_v38 = vmul.f32 %v5721_v7, %v2428_v26  ;;  %v2375_v23 = vmul.f32 %v5725_v50, %v8764_v25  ;;  %v2397_v26 = vmul.f32 0.5, %v2396_v39  ;;  %vm2381_vm7 = vweird.f32 %v5725_v50 }
 0x5a2   :  { %v2385_v60 = vmul.f32 %v5727_v18, %v8766_v59  ;;  %vm2391_vm8 = vweird.f32 %v5727_v18  ;;  %v2473_v39 = vsel %vm8819_vm6, %v8734_v11, %v2469_v22  ;;  %v2506_v11 = vld [vmem:[%s9706_s3 + $0x100] sm:$0xff]  ;;  %vm2382_vm10 = vmor %vm2380_vm9, %vm2381_vm7  ;;  %v5620_v59 = vld [vmem:[%s9708_s5 + $0x158] sm:$0xf0] }
 0x5a3   :  { %v2376_v21 = vmul.f32 %v5725_v50, %v2375_v23  ;;  %v2433_v54 = vsel %vm2432_vm3, %v5721_v7, %v2429_v38  ;;  %v8823_v23 = vadd.f32 %v4092_v5, %v3978_v19  ;;  %v4094_v53 = vpop.f32.mrf.mxu3  ;;  %vm2392_vm12 = vmor %vm2390_vm11, %vm2391_vm8 }
 0x5a4   :  { %v2386_v37 = vmul.f32 %v5727_v18, %v2385_v60  ;;  %v2553_v48 = vmul.f32 %v2511_v33, %v2433_v54  ;;  %v5350_v60 = vld [vmem:[%s9708_s5 + $0x15c] sm:$0xf0]  ;;  %v2507_v54 = vld [vmem:[%s9706_s3 + $0x108] sm:$0xff] }
 0x5a5   :  { %v2377_v44 = vmul.f32 0.5, %v2376_v21  ;;  %10147 = vst [vmem:[#allocation19_spill] sm:$0xff] %v8823_v23 }
 0x5a6   :  { %v2387_v27 = vmul.f32 0.5, %v2386_v37  ;;  %2745 = vperm.xlu0 %5641, %v2553_v48   ;;  %3066 = vperm.xlu1 %5643, %v2886_v51   ;;  %v3980_v33 = vpop.f32.mrf.mxu1  ;;  %v8849_v51 = vor.u32 %v5619_v6, %v5350_v60 }
 0x5a7   :  { %v2378_v38 = vsub.f32 1.5, %v2377_v44  ;;  %v2398_v44 = vsub.f32 1.5, %v2397_v26  ;;  %v8841_v5 = vadd.f32 %v4094_v53, %v3980_v33  ;;  %v2885_v33 = vld [vmem:[%s9705_s4 + $0x108] sm:$0xff] }
 0x5a8   :  { %v2388_v40 = vsub.f32 1.5, %v2387_v27  ;;  %v2515_v27 = vld [vmem:[%s9706_s3 + $0x148] sm:$0xff]  ;;  %10149 = vst [vmem:[#allocation83_spill] sm:$0xff] %v8849_v51 }
 0x5a9   :  { %v2379_v21 = vmul.f32 %v5725_v50, %v2378_v38  ;;  %10148 = vst [vmem:[#allocation13_spill] sm:$0xff] %v8841_v5  ;;  %v2557_v22 = vmul.f32 %v2515_v27, %v2473_v39  ;;  %v2399_v26 = vmul.f32 %v8787_v45, %v2398_v44  ;;  %v2508_v39 = vld [vmem:[%s9706_s3 + $0x110] sm:$0xff] }
 0x5aa   :  { %v2389_v19 = vmul.f32 %v5727_v18, %v2388_v40  ;;  %v5348_v40 = vld [vmem:[%s9708_s5 + $0x150] sm:$0xf]  ;;  %4136 = vmatmul.bf16.gmra.mxu3 %v8849_v51 }
 0x5ab   :  { %v2383_v25 = vsel %vm2382_vm10, %v5725_v50, %v2379_v21  ;;  %v4097_v50 = vpop.f32.mrf.mxu3  ;;  %v2403_v53 = vsel %vm2402_vm15, %v8787_v45, %v2399_v26  ;;  %v5622_v45 = vld [vmem:[%s9708_s5 + $0x16c] sm:$0xf]  ;;  %v5362_v21 = vld [vmem:[%s9708_s5 + $0x174] sm:$0xf0]  ;;  %v2884_v26 = vld [vmem:[%s9705_s4 + $0x100] sm:$0xff] }
 0x5ac   :  { %v2548_v37 = vmul.f32 %v2506_v11, %v2383_v25  ;;  %v2393_v48 = vsel %vm2392_vm12, %v5727_v18, %v2389_v19  ;;  %v8861_v18 = vor.u32 %v5620_v59, %v5348_v40  ;;  %v2550_v2 = vmul.f32 %v2508_v39, %v2403_v53  ;;  %v2887_v11 = vld [vmem:[%s9705_s4 + $0x118] sm:$0xff]  ;;  %v5623_v25 = vld [vmem:[%s9708_s5 + $0x170] sm:$0xf0] }
 0x5ad   :  { %v2549_v7 = vmul.f32 %v2507_v54, %v2393_v48  ;;  %v8884_v19 = vor.u32 %v5622_v45, %v5362_v21  ;;  %v5360_v54 = vld [vmem:[%s9708_s5 + $0x168] sm:$0xf]  ;;  %v3262_v51 = vld [vmem:[%s9707_s1 + $0x250] sm:$0xff] }
 0x5ae   :  { %2765 = vperm.xlu0 %5641, %v2557_v22   ;;  %2720 = vperm.xlu2 %5642, %v2548_v37   ;;  %v3983_v38 = vpop.f32.mrf.mxu1  ;;  %v8893_v37 = vor.u32 %v5623_v25, %v5360_v54  ;;  %v5628_v25 = vld [vmem:[%s9708_s5 + $0x19c] sm:$0xf] }
 0x5af   :  { %2725 = vperm.xlu1 %5643, %v2549_v7   ;;  %4022 = vmatmul.bf16.gmra.mxu1 %v8861_v18  ;;  %v8871_v6 = vadd.f32 %v4097_v50, %v3983_v38  ;;  %10152 = vst [vmem:[#allocation12_spill] sm:$0xff] %v8884_v19  ;;  %v5625_v50 = vld [vmem:[%s9708_s5 + $0x184] sm:$0xf]  ;;  %v5374_v38 = vld [vmem:[%s9708_s5 + $0x18c] sm:$0xf0] }
 0x5b0   :  { %v8909_v39 = vor.u32 %v5625_v50, %v5374_v38 }
 0x5b1   :  { %10150 = vst [vmem:[#allocation84_spill] sm:$0xff] %v8871_v6 }
 0x5b2   :  { %10155 = vst [vmem:[#allocation81_spill] sm:$0xff] %v8909_v39 }
 0x5b3   :  { %v4099_v60 = vpop.f32.mrf.mxu3 }
 0x5b6   :  { %3061 = vperm.xlu2 %5642, %v2885_v33   ;;  %2730 = vperm.xlu0 %5641, %v2550_v2   ;;  %v3985_v44 = vpop.f32.mrf.mxu1  ;;  %v5372_v33 = vld [vmem:[%s9708_s5 + $0x180] sm:$0xf]  ;;  %v5626_v2 = vld [vmem:[%s9708_s5 + $0x188] sm:$0xf0] }
 0x5b7   :  { %v8879_v27 = vadd.f32 %v4099_v60, %v3985_v44  ;;  %v8918_v44 = vor.u32 %v5626_v2, %v5372_v33 }
 0x5b9   :  { %10151 = vst [vmem:[#allocation44_spill] sm:$0xff] %v8879_v27 }
 0x5ba   :  { %4141 = vmatmul.bf16.gmra.mxu3 %v8884_v19  ;;  %10156 = vst [vmem:[#allocation82_spill] sm:$0xff] %v8918_v44 }
 0x5bb   :  { %v4102_v22 = vpop.f32.mrf.mxu3 }
 0x5be   :  { %3071 = vperm.xlu0 %5641, %v2887_v11   ;;  %v3988_v48 = vpop.f32.mrf.mxu1 }
 0x5bf   :  { %4027 = vmatmul.bf16.gmra.mxu1 %v8893_v37  ;;  %v8899_v7 = vadd.f32 %v4102_v22, %v3988_v48  ;;  %v5386_v22 = vld [vmem:[%s9708_s5 + $0x1a4] sm:$0xf0] }
 0x5c1   :  { %10153 = vst [vmem:[#allocation85_spill] sm:$0xff] %v8899_v7  ;;  %v5637_v7 = vld [vmem:[%s9708_s5 + $0x1e4] sm:$0xf] }
 0x5c3   :  { %v4104_v40 = vpop.f32.mrf.mxu3 }
 0x5c6   :  { %3056 = vperm.xlu0 %5641, %v2884_v26   ;;  %v3990_v59 = vpop.f32.mrf.mxu1  ;;  %v8931_v26 = vor.u32 %v5628_v25, %v5386_v22  ;;  %v5396_v22 = vld [vmem:[%s9708_s5 + $0x1b0] sm:$0xf] }
 0x5c7   :  { %v8907_v53 = vadd.f32 %v4104_v40, %v3990_v59  ;;  %v5384_v40 = vld [vmem:[%s9708_s5 + $0x198] sm:$0xf]  ;;  %v5629_v59 = vld [vmem:[%s9708_s5 + $0x1a0] sm:$0xf0] }
 0x5c8   :  { %10159 = vst [vmem:[#allocation10_spill] sm:$0xff] %v8931_v26  ;;  %v8940_v38 = vor.u32 %v5629_v59, %v5384_v40  ;;  %v5632_v40 = vld [vmem:[%s9708_s5 + $0x1b8] sm:$0xf0] }
 0x5c9   :  { %10154 = vst [vmem:[#allocation80_spill] sm:$0xff] %v8907_v53 }
 0x5ca   :  { %4146 = vmatmul.bf16.gmra.mxu3 %v8909_v39  ;;  %10160 = vst [vmem:[#allocation86_spill] sm:$0xff] %v8940_v38 }
 0x5cb   :  { %v4107_v60 = vpop.f32.mrf.mxu3 }
 0x5ce   :  { %v3993_v45 = vpop.f32.mrf.mxu1 }
 0x5cf   :  { %4032 = vmatmul.bf16.gmra.mxu1 %v8918_v44  ;;  %v8921_v21 = vadd.f32 %v4107_v60, %v3993_v45 }
 0x5d1   :  { %10157 = vst [vmem:[#allocation59_spill] sm:$0xff] %v8921_v21 }
 0x5d3   :  { %v4109_v11 = vpop.f32.mrf.mxu3 }
 0x5d6   :  { %v3995_v54 = vpop.f32.mrf.mxu1 }
 0x5d7   :  { %v8929_v48 = vadd.f32 %v4109_v11, %v3995_v54  ;;  %v5631_v11 = vld [vmem:[%s9708_s5 + $0x1b4] sm:$0xf]  ;;  %v5398_v54 = vld [vmem:[%s9708_s5 + $0x1bc] sm:$0xf0] }
 0x5d8   :  { %v8955_v25 = vor.u32 %v5631_v11, %v5398_v54 }
 0x5d9   :  { %10158 = vst [vmem:[#allocation57_spill] sm:$0xff] %v8929_v48 }
 0x5da   :  { %4151 = vmatmul.bf16.gmra.mxu3 %v8931_v26  ;;  %10164 = vst [vmem:[#allocation77_spill] sm:$0xff] %v8955_v25 }
 0x5db   :  { %v4112_v50 = vpop.f32.mrf.mxu3 }
 0x5de   :  { %v3998_v33 = vpop.f32.mrf.mxu1 }
 0x5df   :  { %4037 = vmatmul.bf16.gmra.mxu1 %v8940_v38  ;;  %v8943_v2 = vadd.f32 %v4112_v50, %v3998_v33  ;;  %v8964_v50 = vor.u32 %v5632_v40, %v5396_v22  ;;  %v3092_v22 = vpop.permute.xlu2 %3091  ;;  %v5408_v40 = vld [vmem:[%s9708_s5 + $0x1c8] sm:$0xf]  ;;  %v3263_v38 = vld [vmem:[%s9707_s1 + $0x258] sm:$0xff] }
 0x5e1   :  { %10161 = vst [vmem:[#allocation87_spill] sm:$0xff] %v8943_v2  ;;  %v5410_v2 = vld [vmem:[%s9708_s5 + $0x1d4] sm:$0xf0] }
 0x5e2   :  { %10165 = vst [vmem:[#allocation71_spill] sm:$0xff] %v8964_v50 }
 0x5e3   :  { %v8945_v60 = vpop.f32.mrf.mxu3 }
 0x5e4   :  { %10162 = vst [vmem:[#allocation88_spill] sm:$0xff] %v8945_v60 }
 0x5e6   :  { %v8947_v45 = vpop.f32.mrf.mxu1 }
 0x5e7   :  { %10163 = vst [vmem:[#allocation75_spill] sm:$0xff] %v8947_v45  ;;  %v5634_v45 = vld [vmem:[%s9708_s5 + $0x1cc] sm:$0xf] }
 0x5e8   :  { %v8979_v48 = vor.u32 %v5634_v45, %v5410_v2  ;;  %v3102_v2 = vpop.permute.xlu0 %3101  ;;  %v8991_v45 = vpop.permute.xlu2 %3076 }
 0x5ea   :  { %4156 = vmatmul.bf16.gmra.mxu3 %v8955_v25  ;;  %10169 = vst [vmem:[#allocation27_spill] sm:$0xff] %v8979_v48 }
 0x5eb   :  { %v4117_v59 = vpop.f32.mrf.mxu3 }
 0x5ee   :  { %v4003_v33 = vpop.f32.mrf.mxu1 }
 0x5ef   :  { %4042 = vmatmul.bf16.gmra.mxu1 %v8964_v50  ;;  %v8967_v60 = vadd.f32 %v4117_v59, %v4003_v33  ;;  %v5635_v59 = vld [vmem:[%s9708_s5 + $0x1d0] sm:$0xf0]  ;;  %v3097_v33 = vpop.permute.xlu1 %3096 }
 0x5f0   :  { %v3087_v26 = vpop.permute.xlu0 %3086 }
 0x5f1   :  { %10166 = vst [vmem:[#allocation45_spill] sm:$0xff] %v8967_v60 }
 0x5f3   :  { %v8969_v11 = vpop.f32.mrf.mxu3 }
 0x5f4   :  { %10167 = vst [vmem:[#allocation73_spill] sm:$0xff] %v8969_v11 }
 0x5f6   :  { %v8971_v54 = vpop.f32.mrf.mxu1 }
 0x5f7   :  { %10168 = vst [vmem:[#allocation4_spill] sm:$0xff] %v8971_v54  ;;  %v8988_v54 = vor.u32 %v5635_v59, %v5408_v40  ;;  %v5422_v40 = vld [vmem:[%s9708_s5 + $0x1ec] sm:$0xf0] }
 0x5f8   :  { %v9005_v59 = vor.u32 %v5637_v7, %v5422_v40 }
 0x5f9   :  { %10170 = vst [vmem:[#allocation67_spill] sm:$0xff] %v8988_v54 }
 0x5fa   :  { %4161 = vmatmul.bf16.gmra.mxu3 %v8979_v48  ;;  %v3082_v48 = vpop.permute.xlu1 %3081  ;;  %10174 = vst [vmem:[#allocation46_spill] sm:$0xff] %v9005_v59 }
 0x5fb   :  { %v4122_v11 = vpop.f32.mrf.mxu3 }
 0x5fe   :  { %v4008_v60 = vpop.f32.mrf.mxu1 }
 0x5ff   :  { %4047 = vmatmul.bf16.gmra.mxu1 %v8988_v54  ;;  %v8993_v21 = vadd.f32 %v4122_v11, %v4008_v60  ;;  %v5420_v60 = vld [vmem:[%s9708_s5 + $0x1e0] sm:$0xf]  ;;  %v5638_v11 = vld [vmem:[%s9708_s5 + $0x1e8] sm:$0xf0] }
 0x601   :  { %10171 = vst [vmem:[#allocation48_spill] sm:$0xff] %v8993_v21  ;;  %v9014_v21 = vor.u32 %v5638_v11, %v5420_v60 }
 0x602   :  { %v2741_v27 = vpop.permute.xlu1 %2740 }
 0x603   :  { %v8995_v25 = vpop.f32.mrf.mxu3  ;;  %10175 = vst [vmem:[#allocation69_spill] sm:$0xff] %v9014_v21 }
 0x604   :  { %10172 = vst [vmem:[#allocation24_spill] sm:$0xff] %v8995_v25  ;;  %v2751_v25 = vpop.permute.xlu2 %2750 }
 0x605   :  { %v2844_v50 = vmul.f32 %v2751_v25, %v8376_v52 }
 0x606   :  { %v8997_v53 = vpop.f32.mrf.mxu1 }
 0x607   :  { %10173 = vst [vmem:[#allocation23_spill] sm:$0xff] %v8997_v53  ;;  %v3180_v52 = vadd.f32 %v3087_v26, %v2844_v50  ;;  %v2841_v50 = vmul.f32 %v2741_v27, %v8430_v20 }
 0x60a   :  { %4166 = vmatmul.bf16.gmra.mxu3 %v9005_v59 }
 0x60b   :  { %v4127_v53 = vpop.f32.mrf.mxu3 }
 0x60c   :  { %v2761_v7 = vpop.permute.xlu2 %2760 }
 0x60d   :  { %v2848_v19 = vmul.f32 %v2761_v7, %v8480_v47  ;;  %v2849_v59 = vmul.f32 %v2761_v7, %v8483_v14  ;;  %v3269_v47 = vld [vmem:[%s9707_s1 + $0x288] sm:$0xff] }
 0x60e   :  { %v4013_v6 = vpop.f32.mrf.mxu1 }
 0x60f   :  { %4052 = vmatmul.bf16.gmra.mxu1 %v9014_v21  ;;  %v9017_v40 = vadd.f32 %v4127_v53, %v4013_v6  ;;  %v2845_v21 = vmul.f32 %v2751_v25, %v8379_v49  ;;  %v3184_v6 = vadd.f32 %v3097_v33, %v2848_v19  ;;  %v3268_v53 = vld [vmem:[%s9707_s1 + $0x280] sm:$0xff]  ;;  %v3266_v49 = vld [vmem:[%s9707_s1 + $0x270] sm:$0xff]  ;;  %v3267_v19 = vld [vmem:[%s9707_s1 + $0x278] sm:$0xff] }
 0x610   :  { %v2756_v23 = vpop.permute.xlu1 %2755 }
 0x611   :  { %10176 = vst [vmem:[#allocation7_spill] sm:$0xff] %v9017_v40  ;;  %v2846_v60 = vmul.f32 %v2756_v23, %v8502_v1  ;;  %v2847_v11 = vmul.f32 %v2756_v23, %v8505_v16 }
 0x613   :  { %v9019_v5 = vpop.f32.mrf.mxu3  ;;  %v3183_v14 = vadd.f32 %v3092_v22, %v2847_v11  ;;  %v3265_v11 = vld [vmem:[%s9707_s1 + $0x268] sm:$0xff] }
 0x614   :  { %10177 = vst [vmem:[#allocation63_spill] sm:$0xff] %v9019_v5  ;;  %v3185_v5 = vadd.f32 %v3097_v33, %v2849_v59  ;;  %v9037_v7 = vpop.permute.xlu2 %2735  ;;  %v3352_v59 = vadd.f32 %v3268_v53, %v3184_v6 }
 0x616   :  { %v9021_v54 = vpop.f32.mrf.mxu1 }
 0x617   :  { %10178 = vst [vmem:[#allocation49_spill] sm:$0xff] %v9021_v54  ;;  %v3182_v54 = vadd.f32 %v3092_v22, %v2846_v60  ;;  %v3270_v60 = vld [vmem:[%s9707_s1 + $0x290] sm:$0xff] }
 0x618   :  { %v2746_v39 = vpop.permute.xlu0 %2745 }
 0x619   :  { %v2842_v1 = vmul.f32 %v2746_v39, %v8531_v15  ;;  %v2843_v16 = vmul.f32 %v2746_v39, %v8534_v56  ;;  %v3264_v15 = vld [vmem:[%s9707_s1 + $0x260] sm:$0xff]  ;;  %v3181_v56 = vadd.f32 %v3087_v26, %v2845_v21  ;;  %v2840_v39 = vmul.f32 %v2741_v27, %v8427_v43  ;;  %v3067_v21 = vpop.permute.xlu1 %3066 }
 0x61a   :  { %v3350_v20 = vadd.f32 %v3266_v49, %v3182_v54  ;;  %v3351_v27 = vadd.f32 %v3267_v19, %v3183_v14  ;;  %v3348_v40 = vadd.f32 %v3264_v15, %v3180_v52  ;;  %v3436_v54 = vmax.f32 %v3352_v59, 0.0  ;;  %v3261_v14 = vld [vmem:[%s9707_s1 + $0x248] sm:$0xff] }
 0x61b   :  { %v3178_v6 = vadd.f32 %v3082_v48, %v2842_v1  ;;  %v3179_v53 = vadd.f32 %v3082_v48, %v2843_v16  ;;  %v3260_v48 = vld [vmem:[%s9707_s1 + $0x240] sm:$0xff] }
 0x61c   :  { %v3434_v15 = vmax.f32 %v3350_v20, 0.0 }
 0x61d   :  { %v3346_v19 = vadd.f32 %v3262_v51, %v3178_v6  ;;  %v3432_v51 = vmax.f32 %v3348_v40, 0.0  ;;  %v3257_v6 = vld [vmem:[%s9707_s1 + $0x228] sm:$0xff]  ;;  %v2838_v40 = vmul.f32 %v9037_v7, %v8439_v4 }
 0x61e   :  { %v4018_v33 = vpop.f32.mrf.mxu1 }
 0x61f   :  { %4408 = vmatmul.bf16.vlgmr.msra.gmra.mxu1 %v8362_v35  ;;  %v3177_v35 = vadd.f32 %v8991_v45, %v2841_v50 }
 0x620   :  { %v2766_v23 = vpop.permute.xlu0 %2765 }
 0x621   :  { %v2850_v25 = vmul.f32 %v2766_v23, %v8391_v0  ;;  %v2851_v22 = vmul.f32 %v2766_v23, %v8394_v42  ;;  %v3271_v0 = vld [vmem:[%s9707_s1 + $0x298] sm:$0xff]  ;;  %v4132_v42 = vpop.f32.mrf.mxu3  ;;  %v3353_v23 = vadd.f32 %v3269_v47, %v3185_v5  ;;  %v3349_v47 = vadd.f32 %v3265_v11, %v3181_v56 }
 0x622   :  { %v9076_v49 = vadd.f32 %v4132_v42, %v4018_v33  ;;  %v3435_v56 = vmax.f32 %v3351_v27, 0.0  ;;  %v3430_v33 = vmax.f32 %v3346_v19, 0.0 }
 0x623   :  { %v3186_v26 = vadd.f32 %v3102_v2, %v2850_v25  ;;  %v3187_v43 = vadd.f32 %v3102_v2, %v2851_v22  ;;  %v3176_v2 = vadd.f32 %v8991_v45, %v2840_v39  ;;  %v3437_v1 = vmax.f32 %v3353_v23, 0.0  ;;  %v2721_v45 = vpop.permute.xlu2 %2720 }
 0x624   :  { %v3347_v25 = vadd.f32 %v3263_v38, %v3179_v53  ;;  %v3345_v23 = vadd.f32 %v3261_v14, %v3177_v35  ;;  %v3433_v38 = vmax.f32 %v3349_v47, 0.0  ;;  %v2839_v47 = vmul.f32 %v9037_v7, %v8442_v46  ;;  %v3258_v35 = vld [vmem:[%s9707_s1 + $0x230] sm:$0xff] }
 0x625   :  { %v3354_v44 = vadd.f32 %v3270_v60, %v3186_v26  ;;  %v3355_v5 = vadd.f32 %v3271_v0, %v3187_v43  ;;  %v3344_v11 = vadd.f32 %v3260_v48, %v3176_v2  ;;  %v2726_v26 = vpop.permute.xlu1 %2725 }
 0x626   :  { %v9080_v0 = vpop.f32.mrf.mxu1  ;;  %v3431_v42 = vmax.f32 %v3347_v25, 0.0  ;;  %v3563_v27 = vpack.c.bf16 %v3435_v56, %v3433_v38  ;;  %v2835_v2 = vmul.f32 %v2726_v26, %v8539_v9  ;;  %v3254_v56 = vld [vmem:[%s9707_s1 + $0x210] sm:$0xff] }
 0x627   :  { %v3438_v16 = vmax.f32 %v3354_v44, 0.0  ;;  %v3439_v52 = vmax.f32 %v3355_v5, 0.0  ;;  %v3428_v53 = vmax.f32 %v3344_v11, 0.0  ;;  %v3429_v5 = vmax.f32 %v3345_v23, 0.0  ;;  %v3255_v23 = vld [vmem:[%s9707_s1 + $0x218] sm:$0xff] }
 0x628   :  { %v2731_v22 = vpop.permute.xlu0 %2730  ;;  %v2832_v11 = vmul.f32 %v2721_v45, %v8561_v62 }
 0x629   :  { %v2836_v39 = vmul.f32 %v2731_v22, %v8526_v57  ;;  %v2837_v50 = vmul.f32 %v2731_v22, %v8512_v36  ;;  %v3564_v59 = vpack.c.bf16 %v3438_v16, %v3436_v54  ;;  %v3565_v60 = vpack.c.bf16 %v3439_v52, %v3437_v1  ;;  %v9082_v44 = vpop.f32.mrf.mxu3  ;;  %v3256_v36 = vld [vmem:[%s9707_s1 + $0x220] sm:$0xff]  ;;  %v3259_v54 = vld [vmem:[%s9707_s1 + $0x238] sm:$0xff] }
 0x62a   :  { %v3562_v57 = vpack.c.bf16 %v3434_v15, %v3432_v51  ;;  %v3560_v14 = vpack.c.bf16 %v3430_v33, %v3428_v53  ;;  %v3561_v4 = vpack.c.bf16 %v3431_v42, %v3429_v5  ;;  %v2833_v51 = vmul.f32 %v2721_v45, %v8564_v24  ;;  %v5188_v53 = vld [vmem:[%s9708_s5 + $0x8] sm:$0xf] }
 0x62b   :  { %4175 = vmatpush.bf16.msra.mxu2 %v3564_v59  ;;  %4517 = vmatpush.bf16.msra.mxu3 %v3565_v60  ;;  %v3172_v43 = vadd.f32 %v3067_v21, %v2836_v39  ;;  %v3173_v20 = vadd.f32 %v3067_v21, %v2837_v50  ;;  %v2834_v21 = vmul.f32 %v2726_v26, %v8548_v61  ;;  %v3062_v61 = vpop.permute.xlu2 %3061  ;;  %v3252_v26 = vld [vmem:[%s9707_s1 + $0x200] sm:$0xff] }
 0x62c   :  { %v3171_v15 = vadd.f32 %v3062_v61, %v2835_v2  ;;  %v5579_v2 = vld [vmem:[%s9708_s5 + $0x10] sm:$0xf0] }
 0x62d   :  { %v3340_v1 = vadd.f32 %v3256_v36, %v3172_v43  ;;  %v3341_v16 = vadd.f32 %v3257_v6, %v3173_v20  ;;  %v3170_v22 = vadd.f32 %v3062_v61, %v2834_v21  ;;  %v3253_v43 = vld [vmem:[%s9707_s1 + $0x208] sm:$0xff] }
 0x62e   :  { %v4023_v52 = vpop.f32.mrf.mxu1  ;;  %v3339_v20 = vadd.f32 %v3255_v23, %v3171_v15  ;;  %v5212_v15 = vld [vmem:[%s9708_s5 + $0x38] sm:$0xf]  ;;  %v5224_v23 = vld [vmem:[%s9708_s5 + $0x50] sm:$0xf] }
 0x62f   :  { %4176 = vmatpush.bf16.msra.mxu2 %v3562_v57  ;;  %4518 = vmatpush.bf16.msra.mxu3 %v3563_v27  ;;  %v3424_v59 = vmax.f32 %v3340_v1, 0.0  ;;  %v3425_v60 = vmax.f32 %v3341_v16, 0.0 }
 0x630   :  { %v3072_v48 = vpop.permute.xlu0 %3071  ;;  %4413 = vmatmul.bf16.gmra.mxu1 %v8412_v28  ;;  %v3338_v28 = vadd.f32 %v3254_v56, %v3170_v22  ;;  %v5585_v56 = vld [vmem:[%s9708_s5 + $0x40] sm:$0xf0] }
 0x631   :  { %v3174_v46 = vadd.f32 %v3072_v48, %v2838_v40  ;;  %v3175_v7 = vadd.f32 %v3072_v48, %v2839_v47  ;;  %v4137_v19 = vpop.f32.mrf.mxu3  ;;  %v3423_v40 = vmax.f32 %v3339_v20, 0.0  ;;  %v5189_v48 = vor.u32 %v5579_v2, %v5188_v53  ;;  %v5591_v20 = vld [vmem:[%s9708_s5 + $0x70] sm:$0xf0] }
 0x632   :  { %v9111_v42 = vadd.f32 %v4137_v19, %v4023_v52  ;;  %v3422_v5 = vmax.f32 %v3338_v28, 0.0  ;;  %v5582_v52 = vld [vmem:[%s9708_s5 + $0x28] sm:$0xf0] }
 0x633   :  { %v3342_v25 = vadd.f32 %v3258_v35, %v3174_v46  ;;  %v3343_v9 = vadd.f32 %v3259_v54, %v3175_v7  ;;  %4177 = vmatpush.bf16.msra.mxu2 %v3560_v14  ;;  %4519 = vmatpush.bf16.msra.mxu3 %v3561_v4  ;;  %v5200_v7 = vld [vmem:[%s9708_s5 + $0x20] sm:$0xf] }
 0x634   :  { %v5201_v19 = vor.u32 %v5582_v52, %v5200_v7 }
 0x635   :  { %v3426_v39 = vmax.f32 %v3342_v25, 0.0  ;;  %v3427_v50 = vmax.f32 %v3343_v9, 0.0 }
 0x636   :  { %v9119_v24 = vpop.f32.mrf.mxu1 }
 0x637   :  { %v3558_v38 = vpack.c.bf16 %v3426_v39, %v3424_v59  ;;  %v3559_v33 = vpack.c.bf16 %v3427_v50, %v3425_v60  ;;  %v5213_v39 = vor.u32 %v5585_v56, %v5212_v15 }
 0x638   :  { %v3057_v62 = vpop.permute.xlu0 %3056 }
 0x639   :  { %v3168_v57 = vadd.f32 %v3057_v62, %v2832_v11  ;;  %v3169_v27 = vadd.f32 %v3057_v62, %v2833_v51  ;;  %4178 = vmatpush.bf16.msra.mxu2 %v3558_v38  ;;  %4520 = vmatpush.bf16.msra.mxu3 %v3559_v33  ;;  %v9121_v45 = vpop.f32.mrf.mxu3  ;;  %v5588_v51 = vld [vmem:[%s9708_s5 + $0x58] sm:$0xf0]  ;;  %v5236_v62 = vld [vmem:[%s9708_s5 + $0x68] sm:$0xf] }
 0x63a   :  { %v5225_v38 = vor.u32 %v5588_v51, %v5224_v23 }
 0x63b   :  { %v3336_v36 = vadd.f32 %v3252_v26, %v3168_v57  ;;  %v3337_v6 = vadd.f32 %v3253_v43, %v3169_v27  ;;  %v5237_v57 = vor.u32 %v5591_v20, %v5236_v62 }
 0x63d   :  { %v3420_v47 = vmax.f32 %v3336_v36, 0.0  ;;  %v3421_v21 = vmax.f32 %v3337_v6, 0.0 }
 0x63e   :  { %v4028_v14 = vpop.f32.mrf.mxu1 }
 0x63f   :  { %v3556_v35 = vpack.c.bf16 %v3422_v5, %v3420_v47  ;;  %v3557_v54 = vpack.c.bf16 %v3423_v40, %v3421_v21  ;;  %v5248_v5 = vld [vmem:[%s9708_s5 + $0x80] sm:$0xf]  ;;  %v5594_v40 = vld [vmem:[%s9708_s5 + $0x88] sm:$0xf0] }
 0x640   :  { %4418 = vmatmul.bf16.gmra.mxu1 %v8454_v31  ;;  %v5249_v47 = vor.u32 %v5594_v40, %v5248_v5 }
 0x641   :  { %4179 = vmatpush.bf16.msra.mxu2 %v3556_v35  ;;  %4521 = vmatpush.bf16.msra.mxu3 %v3557_v54  ;;  %v4142_v4 = vpop.f32.mrf.mxu3  ;;  %v5260_v54 = vld [vmem:[%s9708_s5 + $0x98] sm:$0xf] }
 0x642   :  { %v9132_v1 = vadd.f32 %v4142_v4, %v4028_v14  ;;  %v4295_v14 = vpop.f32.mrf.mxu0 }
 0x644   :  { %5430 = vmatmul.msk.bf16.vlgmr.msra.gmra.mxu2 %vm675_vm0, %v5189_v48  ;;  %5451 = vmatmul.msk.bf16.vlgmr.msra.gmra.mxu3 %vm675_vm0, %v5189_v48  ;;  %v5597_v48 = vld [vmem:[%s9708_s5 + $0xa0] sm:$0xf0] }
 0x645   :  { %v5261_v4 = vor.u32 %v5597_v48, %v5260_v54 }
 0x646   :  { %v9134_v16 = vpop.f32.mrf.mxu1 }
 0x649   :  { %v9136_v46 = vpop.f32.mrf.mxu3 }
 0x64e   :  { %v4033_v61 = vpop.f32.mrf.mxu1 }
 0x650   :  { %4423 = vmatmul.bf16.gmra.mxu1 %v8470_v29 }
 0x651   :  { %v4147_v25 = vpop.f32.mrf.mxu3 }
 0x652   :  { %v9147_v31 = vadd.f32 %v4147_v25, %v4033_v61  ;;  %v5600_v61 = vld [vmem:[%s9708_s5 + $0xb8] sm:$0xf0] }
 0x654   :  { %5431 = vmatmul.msk.bf16.gmra.mxu2 %vm675_vm0, %v5201_v19  ;;  %5452 = vmatmul.msk.bf16.gmra.mxu3 %vm675_vm0, %v5201_v19  ;;  %v5272_v19 = vld [vmem:[%s9708_s5 + $0xb0] sm:$0xf] }
 0x655   :  { %v5273_v15 = vor.u32 %v5600_v61, %v5272_v19 }
 0x656   :  { %v9149_v9 = vpop.f32.mrf.mxu1 }
 0x659   :  { %v9151_v22 = vpop.f32.mrf.mxu3 }
 0x65e   :  { %v4038_v50 = vpop.f32.mrf.mxu1 }
 0x660   :  { %4428 = vmatmul.bf16.gmra.mxu1 %v8499_v10 }
 0x661   :  { %v4152_v59 = vpop.f32.mrf.mxu3 }
 0x662   :  { %v9162_v29 = vadd.f32 %v4152_v59, %v4038_v50  ;;  %v5603_v50 = vld [vmem:[%s9708_s5 + $0xd0] sm:$0xf0] }
 0x664   :  { %5432 = vmatmul.msk.bf16.gmra.mxu2 %vm675_vm0, %v5213_v39  ;;  %5453 = vmatmul.msk.bf16.gmra.mxu3 %vm675_vm0, %v5213_v39  ;;  %v5284_v39 = vld [vmem:[%s9708_s5 + $0xc8] sm:$0xf] }
 0x665   :  { %v5285_v51 = vor.u32 %v5603_v50, %v5284_v39 }
 0x666   :  { %v9164_v60 = vpop.f32.mrf.mxu1 }
 0x669   :  { %v9166_v11 = vpop.f32.mrf.mxu3 }
 0x66e   :  { %v4043_v33 = vpop.f32.mrf.mxu1 }
 0x670   :  { %4433 = vmatmul.bf16.gmra.mxu1 %v8558_v17 }
 0x671   :  { %v4157_v28 = vpop.f32.mrf.mxu3 }
 0x672   :  { %v9177_v10 = vadd.f32 %v4157_v28, %v4043_v33 }
 0x674   :  { %5433 = vmatmul.msk.bf16.gmra.mxu2 %vm675_vm0, %v5225_v38  ;;  %5454 = vmatmul.msk.bf16.gmra.mxu3 %vm675_vm0, %v5225_v38 }
 0x676   :  { %v9179_v26 = vpop.f32.mrf.mxu1 }
 0x679   :  { %v9181_v43 = vpop.f32.mrf.mxu3 }
 0x67e   :  { %v4048_v27 = vpop.f32.mrf.mxu1 }
 0x680   :  { %4438 = vmatmul.bf16.gmra.mxu1 %v8587_v8 }
 0x681   :  { %v4162_v36 = vpop.f32.mrf.mxu3 }
 0x682   :  { %v9192_v17 = vadd.f32 %v4162_v36, %v4048_v27 }
 0x684   :  { %5434 = vmatmul.msk.bf16.gmra.mxu2 %vm675_vm0, %v5237_v57  ;;  %5455 = vmatmul.msk.bf16.gmra.mxu3 %vm675_vm0, %v5237_v57 }
 0x686   :  { %v9194_v6 = vpop.f32.mrf.mxu1 }
 0x689   :  { %v9196_v53 = vpop.f32.mrf.mxu3 }
 0x68e   :  { %v4053_v21 = vpop.f32.mrf.mxu1 }
 0x690   :  { %4443 = vmatmul.bf16.gmra.mxu1 %v8608_v58  ;;  %v4297_v58 = vpop.f32.mrf.mxu0  ;;  %4354 = vmatmul.bf16.gmra.mxu0 %v8743_v63 }
 0x691   :  { %v4167_v8 = vpop.f32.mrf.mxu3 }
 0x692   :  { %v9207_v2 = vadd.f32 %v4167_v8, %v4053_v21 }
 0x694   :  { %5435 = vmatmul.msk.bf16.gmra.mxu2 %vm675_vm0, %v5249_v47  ;;  %5456 = vmatmul.msk.bf16.gmra.mxu3 %vm675_vm0, %v5249_v47 }
 0x696   :  { %v9209_v35 = vpop.f32.mrf.mxu1 }
 0x698   :  { %v4300_v25 = vpop.f32.mrf.mxu0 }
 0x699   :  { %v9237_v23 = vpop.f32.mrf.mxu3 }
 0x69e   :  { %v4409_v7 = vpop.f32.mrf.mxu1 }
 0x6a0   :  { %4448 = vmatmul.bf16.gmra.mxu1 %v8629_v30  ;;  %v4302_v30 = vpop.f32.mrf.mxu0  ;;  %4359 = vmatmul.bf16.gmra.mxu0 %v8803_v3 }
 0x6a4   :  { %5436 = vmatmul.msk.bf16.gmra.mxu2 %vm675_vm0, %v5261_v4  ;;  %5457 = vmatmul.msk.bf16.gmra.mxu3 %vm675_vm0, %v5261_v4 }
 0x6a6   :  { %v4411_v52 = vpop.f32.mrf.mxu1 }
 0x6a8   :  { %v4305_v59 = vpop.f32.mrf.mxu0 }
 0x6ae   :  { %v4414_v56 = vpop.f32.mrf.mxu1 }
 0x6af   :  { %v4415_v54 = vadd.f32 %v4414_v56, %v4300_v25  ;;  %v10179_v25 = vld [vmem:[#allocation3_spill] sm:$0xff] }
 0x6b0   :  { %4453 = vmatmul.bf16.gmra.mxu1 %v8650_v32  ;;  %v4410_v32 = vadd.f32 %v4409_v7, %v4295_v14  ;;  %v4307_v3 = vpop.f32.mrf.mxu0  ;;  %4364 = vmatmul.bf16.gmra.mxu0 %v8861_v18  ;;  %v5606_v18 = vld [vmem:[%s9708_s5 + $0xe8] sm:$0xf0] }
 0x6b4   :  { %5437 = vmatmul.msk.bf16.gmra.mxu2 %vm675_vm0, %v5273_v15  ;;  %5458 = vmatmul.msk.bf16.gmra.mxu3 %vm675_vm0, %v5273_v15 }
 0x6b6   :  { %v4416_v63 = vpop.f32.mrf.mxu1 }
 0x6b8   :  { %v4310_v27 = vpop.f32.mrf.mxu0 }
 0x6be   :  { %v4419_v38 = vpop.f32.mrf.mxu1 }
 0x6c0   :  { %4458 = vmatmul.bf16.gmra.mxu1 %v8672_v12  ;;  %v5296_v12 = vld [vmem:[%s9708_s5 + $0xe0] sm:$0xf] }
 0x6c1   :  { %v5297_v47 = vor.u32 %v5606_v18, %v5296_v12 }
 0x6c4   :  { %5438 = vmatmul.msk.bf16.gmra.mxu2 %vm675_vm0, %v5285_v51  ;;  %5459 = vmatmul.msk.bf16.gmra.mxu3 %vm675_vm0, %v5285_v51 }
 0x6c6   :  { %v4421_v57 = vpop.f32.mrf.mxu1 }
 0x6c7   :  { %v4181_v33 = vpop.f32.mrf.mxu2  ;;  %v4523_v28 = vpop.f32.mrf.mxu3 }
 0x6c8   :  { %v4182_v62 = vadd.f32 %v4181_v33, %v8640_v34  ;;  %v4524_v20 = vadd.f32 %v4523_v28, %v4410_v32  ;;  %v4412_v34 = vadd.f32 %v4411_v52, %v4297_v58  ;;  %v10181_v32 = vld [vmem:[#allocation82_spill] sm:$0xff] }
 0x6ca   :  { %4628 = vst [vmem:[%s9709_s6] sm:$0xff] %v4182_v62  ;;  %v10182_v62 = vld [vmem:[#allocation15_spill] sm:$0xff] }
 0x6cb   :  { %4629 = vst.msk [vmem:[%s9709_s6 + $0x8] sm:$0xff] %vm1423_vm1, %v4524_v20 }
 0x6ce   :  { %v4424_v8 = vpop.f32.mrf.mxu1 }
 0x6cf   :  { %v4183_v36 = vpop.f32.mrf.mxu2  ;;  %v4525_v5 = vpop.f32.mrf.mxu3 }
 0x6d0   :  { %v4184_v40 = vadd.f32 %v4183_v36, %v8642_v13  ;;  %v4526_v21 = vadd.f32 %v4525_v5, %v4412_v34  ;;  %4463 = vmatmul.bf16.gmra.mxu1 %v8696_v41  ;;  %v4312_v13 = vpop.f32.mrf.mxu0  ;;  %4369 = vmatmul.bf16.gmra.mxu0 %v8893_v37  ;;  %v5308_v41 = vld [vmem:[%s9708_s5 + $0xf8] sm:$0xf]  ;;  %v5609_v37 = vld [vmem:[%s9708_s5 + $0x100] sm:$0xf0]  ;;  %v4422_v34 = vadd.f32 %v4421_v57, %v4307_v3  ;;  %v10184_v57 = vld [vmem:[#allocation79_spill] sm:$0xff] }
 0x6d1   :  { %v5309_v56 = vor.u32 %v5609_v37, %v5308_v41  ;;  %v4425_v3 = vadd.f32 %v4424_v8, %v4310_v27  ;;  %v5332_v27 = vld [vmem:[%s9708_s5 + $0x128] sm:$0xf]  ;;  %v5615_v8 = vld [vmem:[%s9708_s5 + $0x130] sm:$0xf0] }
 0x6d2   :  { %4630 = vst [vmem:[%s9709_s6 + $0x10] sm:$0xff] %v4184_v40 }
 0x6d3   :  { %4631 = vst.msk [vmem:[%s9709_s6 + $0x18] sm:$0xff] %vm1423_vm1, %v4526_v21 }
 0x6d4   :  { %5439 = vmatmul.msk.bf16.gmra.mxu2 %vm675_vm0, %v5297_v47  ;;  %5460 = vmatmul.msk.bf16.gmra.mxu3 %vm675_vm0, %v5297_v47  ;;  %v10183_v47 = vld [vmem:[#allocation14_spill] sm:$0xff] }
 0x6d6   :  { %v4426_v58 = vpop.f32.mrf.mxu1 }
 0x6d7   :  { %v4186_v48 = vpop.f32.mrf.mxu2  ;;  %v4528_v14 = vpop.f32.mrf.mxu3 }
 0x6d8   :  { %v4187_v4 = vadd.f32 %v4186_v48, %v8662_v55  ;;  %v4529_v7 = vadd.f32 %v4528_v14, %v4415_v54  ;;  %v4417_v55 = vadd.f32 %v4416_v63, %v4302_v30  ;;  %v4315_v52 = vpop.f32.mrf.mxu0  ;;  %v4420_v30 = vadd.f32 %v4419_v38, %v4305_v59  ;;  %v10180_v63 = vld [vmem:[#allocation11_spill] sm:$0xff]  ;;  %v5320_v59 = vld [vmem:[%s9708_s5 + $0x110] sm:$0xf]  ;;  %v5612_v38 = vld [vmem:[%s9708_s5 + $0x118] sm:$0xf0] }
 0x6d9   :  { %v5321_v54 = vor.u32 %v5612_v38, %v5320_v59 }
 0x6da   :  { %4632 = vst [vmem:[%s9709_s6 + $0x20] sm:$0xff] %v4187_v4 }
 0x6db   :  { %4633 = vst.msk [vmem:[%s9709_s6 + $0x28] sm:$0xff] %vm1423_vm1, %v4529_v7  ;;  %v10185_v7 = vld [vmem:[#allocation86_spill] sm:$0xff] }
 0x6de   :  { %v4429_v50 = vpop.f32.mrf.mxu1 }
 0x6df   :  { %v4188_v19 = vpop.f32.mrf.mxu2  ;;  %v4530_v61 = vpop.f32.mrf.mxu3 }
 0x6e0   :  { %v4189_v15 = vadd.f32 %v4188_v19, %v10179_v25  ;;  %v4531_v39 = vadd.f32 %v4530_v61, %v4417_v55  ;;  %4468 = vmatmul.bf16.gmra.mxu1 %v10180_v63  ;;  %v4317_v51 = vpop.f32.mrf.mxu0  ;;  %4374 = vmatmul.bf16.gmra.mxu0 %v10181_v32  ;;  %v10186_v55 = vld [vmem:[#allocation25_spill] sm:$0xff] }
 0x6e1   :  { %v10187_v63 = vld [vmem:[#allocation9_spill] sm:$0xff] }
 0x6e2   :  { %4634 = vst [vmem:[%s9709_s6 + $0x30] sm:$0xff] %v4189_v15  ;;  %v4427_v15 = vadd.f32 %v4426_v58, %v4312_v13  ;;  %v4430_v13 = vadd.f32 %v4429_v50, %v4315_v52  ;;  %v10188_v58 = vld [vmem:[#allocation83_spill] sm:$0xff]  ;;  %v5344_v52 = vld [vmem:[%s9708_s5 + $0x140] sm:$0xf] }
 0x6e3   :  { %4635 = vst.msk [vmem:[%s9709_s6 + $0x38] sm:$0xff] %vm1423_vm1, %v4531_v39  ;;  %v5618_v50 = vld [vmem:[%s9708_s5 + $0x148] sm:$0xf0] }
 0x6e4   :  { %5440 = vmatmul.msk.bf16.gmra.mxu2 %vm675_vm0, %v5309_v56  ;;  %5461 = vmatmul.msk.bf16.gmra.mxu3 %vm675_vm0, %v5309_v56 }
 0x6e6   :  { %v4431_v18 = vpop.f32.mrf.mxu1 }
 0x6e7   :  { %v4191_v33 = vpop.f32.mrf.mxu2  ;;  %v4533_v28 = vpop.f32.mrf.mxu3 }
 0x6e8   :  { %v4192_v20 = vadd.f32 %v4191_v33, %v10182_v62  ;;  %v4534_v12 = vadd.f32 %v4533_v28, %v4420_v30  ;;  %v4320_v36 = vpop.f32.mrf.mxu0  ;;  %v5333_v33 = vor.u32 %v5615_v8, %v5332_v27 }
 0x6ea   :  { %4636 = vst [vmem:[%s9709_s6 + $0x40] sm:$0xff] %v4192_v20 }
 0x6eb   :  { %4637 = vst.msk [vmem:[%s9709_s6 + $0x48] sm:$0xff] %vm1423_vm1, %v4534_v12  ;;  %v10189_v12 = vld [vmem:[#allocation71_spill] sm:$0xff] }
 0x6ee   :  { %v4434_v14 = vpop.f32.mrf.mxu1 }
 0x6ef   :  { %v4193_v5 = vpop.f32.mrf.mxu2  ;;  %v4535_v40 = vpop.f32.mrf.mxu3 }
 0x6f0   :  { %v4194_v21 = vadd.f32 %v4193_v5, %v10183_v47  ;;  %v4536_v48 = vadd.f32 %v4535_v40, %v4422_v34  ;;  %4473 = vmatmul.bf16.gmra.mxu1 %v10184_v57  ;;  %v4322_v4 = vpop.f32.mrf.mxu0  ;;  %4379 = vmatmul.bf16.gmra.mxu0 %v10185_v7  ;;  %v10190_v34 = vld [vmem:[#allocation78_spill] sm:$0xff]  ;;  %v10191_v57 = vld [vmem:[#allocation41_spill] sm:$0xff] }
 0x6f2   :  { %4638 = vst [vmem:[%s9709_s6 + $0x50] sm:$0xff] %v4194_v21  ;;  %v4432_v21 = vadd.f32 %v4431_v18, %v4317_v51  ;;  %v4435_v51 = vadd.f32 %v4434_v14, %v4320_v36  ;;  %v10192_v18 = vld [vmem:[#allocation12_spill] sm:$0xff]  ;;  %v5356_v36 = vld [vmem:[%s9708_s5 + $0x158] sm:$0xf]  ;;  %v5621_v14 = vld [vmem:[%s9708_s5 + $0x160] sm:$0xf0] }
 0x6f3   :  { %4639 = vst.msk [vmem:[%s9709_s6 + $0x58] sm:$0xff] %vm1423_vm1, %v4536_v48 }
 0x6f4   :  { %5441 = vmatmul.msk.bf16.gmra.mxu2 %vm675_vm0, %v5321_v54  ;;  %5462 = vmatmul.msk.bf16.gmra.mxu3 %vm675_vm0, %v5321_v54 }
 0x6f6   :  { %v4436_v25 = vpop.f32.mrf.mxu1 }
 0x6f7   :  { %v4196_v41 = vpop.f32.mrf.mxu2  ;;  %v4538_v37 = vpop.f32.mrf.mxu3 }
 0x6f8   :  { %v4197_v19 = vadd.f32 %v4196_v41, %v10186_v55  ;;  %v4539_v61 = vadd.f32 %v4538_v37, %v4425_v3  ;;  %v4325_v56 = vpop.f32.mrf.mxu0  ;;  %v5345_v41 = vor.u32 %v5618_v50, %v5344_v52 }
 0x6fa   :  { %4640 = vst [vmem:[%s9709_s6 + $0x60] sm:$0xff] %v4197_v19 }
 0x6fb   :  { %4641 = vst.msk [vmem:[%s9709_s6 + $0x68] sm:$0xff] %vm1423_vm1, %v4539_v61  ;;  %v10193_v61 = vld [vmem:[#allocation67_spill] sm:$0xff] }
 0x6fe   :  { %v4439_v62 = vpop.f32.mrf.mxu1 }
 0x6ff   :  { %v4198_v39 = vpop.f32.mrf.mxu2  ;;  %v4540_v30 = vpop.f32.mrf.mxu3 }
 0x700   :  { %v4199_v32 = vadd.f32 %v4198_v39, %v10187_v63  ;;  %v4541_v28 = vadd.f32 %v4540_v30, %v4427_v15  ;;  %4478 = vmatmul.bf16.gmra.mxu1 %v10188_v58  ;;  %v4327_v20 = vpop.f32.mrf.mxu0  ;;  %4384 = vmatmul.bf16.gmra.mxu0 %v10189_v12  ;;  %v10194_v15 = vld [vmem:[#allocation19_spill] sm:$0xff]  ;;  %v10195_v58 = vld [vmem:[#allocation13_spill] sm:$0xff] }
 0x702   :  { %4642 = vst [vmem:[%s9709_s6 + $0x70] sm:$0xff] %v4199_v32  ;;  %v4437_v32 = vadd.f32 %v4436_v25, %v4322_v4  ;;  %v4440_v4 = vadd.f32 %v4439_v62, %v4325_v56  ;;  %v10196_v25 = vld [vmem:[#allocation81_spill] sm:$0xff]  ;;  %v5368_v56 = vld [vmem:[%s9708_s5 + $0x170] sm:$0xf] }
 0x703   :  { %4643 = vst.msk [vmem:[%s9709_s6 + $0x78] sm:$0xff] %vm1423_vm1, %v4541_v28  ;;  %v5624_v62 = vld [vmem:[%s9708_s5 + $0x178] sm:$0xf0] }
 0x704   :  { %5442 = vmatmul.msk.bf16.gmra.mxu2 %vm675_vm0, %v5333_v33  ;;  %5463 = vmatmul.msk.bf16.gmra.mxu3 %vm675_vm0, %v5333_v33 }
 0x706   :  { %v4441_v47 = vpop.f32.mrf.mxu1 }
 0x707   :  { %v4201_v59 = vpop.f32.mrf.mxu2  ;;  %v4543_v38 = vpop.f32.mrf.mxu3 }
 0x708   :  { %v4202_v5 = vadd.f32 %v4201_v59, %v10190_v34  ;;  %v4544_v40 = vadd.f32 %v4543_v38, %v4430_v13  ;;  %v4330_v54 = vpop.f32.mrf.mxu0  ;;  %v5357_v59 = vor.u32 %v5621_v14, %v5356_v36  ;;  %v10201_v14 = vld [vmem:[#allocation85_spill] sm:$0xff] }
 0x70a   :  { %4644 = vst [vmem:[%s9709_s6 + $0x80] sm:$0xff] %v4202_v5 }
 0x70b   :  { %4645 = vst.msk [vmem:[%s9709_s6 + $0x88] sm:$0xff] %vm1423_vm1, %v4544_v40  ;;  %v10197_v40 = vld [vmem:[#allocation69_spill] sm:$0xff] }
 0x70e   :  { %v4444_v55 = vpop.f32.mrf.mxu1 }
 0x70f   :  { %v4203_v48 = vpop.f32.mrf.mxu2  ;;  %v4545_v3 = vpop.f32.mrf.mxu3 }
 0x710   :  { %v4204_v7 = vadd.f32 %v4203_v48, %v10191_v57  ;;  %v4546_v37 = vadd.f32 %v4545_v3, %v4432_v21  ;;  %4483 = vmatmul.bf16.gmra.mxu1 %v10192_v18  ;;  %v4332_v19 = vpop.f32.mrf.mxu0  ;;  %4389 = vmatmul.bf16.gmra.mxu0 %v10193_v61  ;;  %v10198_v21 = vld [vmem:[#allocation84_spill] sm:$0xff] }
 0x711   :  { %v10199_v18 = vld [vmem:[#allocation44_spill] sm:$0xff] }
 0x712   :  { %4646 = vst [vmem:[%s9709_s6 + $0x90] sm:$0xff] %v4204_v7  ;;  %v4442_v7 = vadd.f32 %v4441_v47, %v4327_v20  ;;  %v4445_v20 = vadd.f32 %v4444_v55, %v4330_v54  ;;  %v10200_v47 = vld [vmem:[#allocation10_spill] sm:$0xff]  ;;  %v5380_v54 = vld [vmem:[%s9708_s5 + $0x188] sm:$0xf]  ;;  %v5627_v55 = vld [vmem:[%s9708_s5 + $0x190] sm:$0xf0] }
 0x713   :  { %4647 = vst.msk [vmem:[%s9709_s6 + $0x98] sm:$0xff] %vm1423_vm1, %v4546_v37 }
 0x714   :  { %5443 = vmatmul.msk.bf16.gmra.mxu2 %vm675_vm0, %v5345_v41  ;;  %5464 = vmatmul.msk.bf16.gmra.mxu3 %vm675_vm0, %v5345_v41 }
 0x716   :  { %v4446_v63 = vpop.f32.mrf.mxu1 }
 0x717   :  { %v4206_v27 = vpop.f32.mrf.mxu2  ;;  %v4548_v8 = vpop.f32.mrf.mxu3 }
 0x718   :  { %v4207_v39 = vadd.f32 %v4206_v27, %v10194_v15  ;;  %v4549_v30 = vadd.f32 %v4548_v8, %v4435_v51  ;;  %v4335_v33 = vpop.f32.mrf.mxu0  ;;  %v5369_v27 = vor.u32 %v5624_v62, %v5368_v56  ;;  %v10204_v56 = vld [vmem:[#allocation59_spill] sm:$0xff] }
 0x71a   :  { %4648 = vst [vmem:[%s9709_s6 + $0xa0] sm:$0xff] %v4207_v39 }
 0x71b   :  { %4649 = vst.msk [vmem:[%s9709_s6 + $0xa8] sm:$0xff] %vm1423_vm1, %v4549_v30 }
 0x71e   :  { %v4449_v34 = vpop.f32.mrf.mxu1 }
 0x71f   :  { %v4208_v28 = vpop.f32.mrf.mxu2  ;;  %v4550_v13 = vpop.f32.mrf.mxu3 }
 0x720   :  { %v4209_v12 = vadd.f32 %v4208_v28, %v10195_v58  ;;  %v4551_v38 = vadd.f32 %v4550_v13, %v4437_v32  ;;  %4488 = vmatmul.bf16.gmra.mxu1 %v10196_v25  ;;  %v4337_v5 = vpop.f32.mrf.mxu0  ;;  %4394 = vmatmul.bf16.gmra.mxu0 %v10197_v40  ;;  %v4447_v58 = vadd.f32 %v4446_v63, %v4332_v19  ;;  %v10203_v63 = vld [vmem:[#allocation77_spill] sm:$0xff] }
 0x721   :  { %v5381_v40 = vor.u32 %v5627_v55, %v5380_v54  ;;  %v4450_v19 = vadd.f32 %v4449_v34, %v4335_v33  ;;  %v5392_v33 = vld [vmem:[%s9708_s5 + $0x1a0] sm:$0xf]  ;;  %v5630_v34 = vld [vmem:[%s9708_s5 + $0x1a8] sm:$0xf0] }
 0x722   :  { %4650 = vst [vmem:[%s9709_s6 + $0xb0] sm:$0xff] %v4209_v12  ;;  %v10207_v54 = vld [vmem:[#allocation87_spill] sm:$0xff] }
 0x723   :  { %4651 = vst.msk [vmem:[%s9709_s6 + $0xb8] sm:$0xff] %vm1423_vm1, %v4551_v38 }
 0x724   :  { %5444 = vmatmul.msk.bf16.gmra.mxu2 %vm675_vm0, %v5357_v59  ;;  %5465 = vmatmul.msk.bf16.gmra.mxu3 %vm675_vm0, %v5357_v59 }
 0x726   :  { %v4451_v57 = vpop.f32.mrf.mxu1 }
 0x727   :  { %v4211_v52 = vpop.f32.mrf.mxu2  ;;  %v4553_v50 = vpop.f32.mrf.mxu3 }
 0x728   :  { %v4212_v48 = vadd.f32 %v4211_v52, %v10198_v21  ;;  %v4554_v3 = vadd.f32 %v4553_v50, %v4440_v4  ;;  %v4340_v41 = vpop.f32.mrf.mxu0  ;;  %v10202_v4 = vld [vmem:[#allocation80_spill] sm:$0xff] }
 0x72a   :  { %4652 = vst [vmem:[%s9709_s6 + $0xc0] sm:$0xff] %v4212_v48 }
 0x72b   :  { %4653 = vst.msk [vmem:[%s9709_s6 + $0xc8] sm:$0xff] %vm1423_vm1, %v4554_v3 }
 0x72e   :  { %v4454_v15 = vpop.f32.mrf.mxu1 }
 0x72f   :  { %v4213_v37 = vpop.f32.mrf.mxu2  ;;  %v4555_v51 = vpop.f32.mrf.mxu3 }
 0x730   :  { %v4214_v61 = vadd.f32 %v4213_v37, %v10199_v18  ;;  %v4556_v8 = vadd.f32 %v4555_v51, %v4442_v7  ;;  %4493 = vmatmul.bf16.gmra.mxu1 %v10200_v47  ;;  %v4342_v39 = vpop.f32.mrf.mxu0  ;;  %v4452_v51 = vadd.f32 %v4451_v57, %v4337_v5  ;;  %v5393_v47 = vor.u32 %v5630_v34, %v5392_v33  ;;  %v10206_v57 = vld [vmem:[#allocation27_spill] sm:$0xff]  ;;  %v10211_v34 = vld [vmem:[#allocation45_spill] sm:$0xff] }
 0x731   :  { %v4455_v5 = vadd.f32 %v4454_v15, %v4340_v41  ;;  %v5404_v41 = vld [vmem:[%s9708_s5 + $0x1b8] sm:$0xf]  ;;  %v5633_v15 = vld [vmem:[%s9708_s5 + $0x1c0] sm:$0xf0] }
 0x732   :  { %4654 = vst [vmem:[%s9709_s6 + $0xd0] sm:$0xff] %v4214_v61 }
 0x733   :  { %4655 = vst.msk [vmem:[%s9709_s6 + $0xd8] sm:$0xff] %vm1423_vm1, %v4556_v8  ;;  %v10205_v8 = vld [vmem:[#allocation57_spill] sm:$0xff] }
 0x734   :  { %5445 = vmatmul.msk.bf16.gmra.mxu2 %vm675_vm0, %v5369_v27  ;;  %5466 = vmatmul.msk.bf16.gmra.mxu3 %vm675_vm0, %v5369_v27 }
 0x736   :  { %v4456_v13 = vpop.f32.mrf.mxu1 }
 0x737   :  { %v4216_v30 = vpop.f32.mrf.mxu2  ;;  %v4558_v36 = vpop.f32.mrf.mxu3 }
 0x738   :  { %v4217_v32 = vadd.f32 %v4216_v30, %v10201_v14  ;;  %v4559_v28 = vadd.f32 %v4558_v36, %v4445_v20  ;;  %v4345_v12 = vpop.f32.mrf.mxu0 }
 0x73a   :  { %4656 = vst [vmem:[%s9709_s6 + $0xe0] sm:$0xff] %v4217_v32 }
 0x73b   :  { %4657 = vst.msk [vmem:[%s9709_s6 + $0xe8] sm:$0xff] %vm1423_vm1, %v4559_v28 }
 0x73e   :  { %v4459_v50 = vpop.f32.mrf.mxu1 }
 0x73f   :  { %v4218_v59 = vpop.f32.mrf.mxu2  ;;  %v4560_v38 = vpop.f32.mrf.mxu3 }
 0x740   :  { %v4219_v25 = vadd.f32 %v4218_v59, %v10202_v4  ;;  %v4561_v52 = vadd.f32 %v4560_v38, %v4447_v58  ;;  %4498 = vmatmul.bf16.gmra.mxu1 %v10203_v63  ;;  %v4347_v21 = vpop.f32.mrf.mxu0  ;;  %v10208_v38 = vld [vmem:[#allocation75_spill] sm:$0xff]  ;;  %v10209_v4 = vld [vmem:[#allocation88_spill] sm:$0xff] }
 0x742   :  { %4658 = vst [vmem:[%s9709_s6 + $0xf0] sm:$0xff] %v4219_v25  ;;  %v4115_v25 = vadd.f32 %v10209_v4, %v10208_v38  ;;  %v10214_v38 = vld [vmem:[#allocation48_spill] sm:$0xff] }
 0x743   :  { %4659 = vst.msk [vmem:[%s9709_s6 + $0xf8] sm:$0xff] %vm1423_vm1, %v4561_v52 }
 0x744   :  { %5446 = vmatmul.msk.bf16.gmra.mxu2 %vm675_vm0, %v5381_v40  ;;  %5467 = vmatmul.msk.bf16.gmra.mxu3 %vm675_vm0, %v5381_v40  ;;  %v4457_v40 = vadd.f32 %v4456_v13, %v4342_v39  ;;  %v4460_v39 = vadd.f32 %v4459_v50, %v4345_v12  ;;  %v10210_v13 = vld [vmem:[#allocation46_spill] sm:$0xff]  ;;  %v5416_v12 = vld [vmem:[%s9708_s5 + $0x1d0] sm:$0xf]  ;;  %v5636_v50 = vld [vmem:[%s9708_s5 + $0x1d8] sm:$0xf0] }
 0x746   :  { %v4461_v37 = vpop.f32.mrf.mxu1 }
 0x747   :  { %v4221_v48 = vpop.f32.mrf.mxu2  ;;  %v4563_v3 = vpop.f32.mrf.mxu3 }
 0x748   :  { %v4222_v62 = vadd.f32 %v4221_v48, %v10204_v56  ;;  %v4564_v7 = vadd.f32 %v4563_v3, %v4450_v19  ;;  %v4350_v18 = vpop.f32.mrf.mxu0  ;;  %v5405_v48 = vor.u32 %v5633_v15, %v5404_v41 }
 0x74a   :  { %4660 = vst [vmem:[%s9709_s6 + $0x100] sm:$0xff] %v4222_v62 }
 0x74b   :  { %4661 = vst.msk [vmem:[%s9709_s6 + $0x108] sm:$0xff] %vm1423_vm1, %v4564_v7 }
 0x74e   :  { %v4464_v36 = vpop.f32.mrf.mxu1 }
 0x74f   :  { %v4223_v61 = vpop.f32.mrf.mxu2  ;;  %v4565_v27 = vpop.f32.mrf.mxu3 }
 0x750   :  { %v4224_v20 = vadd.f32 %v4223_v61, %v10205_v8  ;;  %v4566_v30 = vadd.f32 %v4565_v27, %v4452_v51  ;;  %4503 = vmatmul.bf16.gmra.mxu1 %v10206_v57  ;;  %v4352_v14 = vpop.f32.mrf.mxu0 }
 0x752   :  { %4662 = vst [vmem:[%s9709_s6 + $0x110] sm:$0xff] %v4224_v20  ;;  %v10212_v20 = vld [vmem:[#allocation4_spill] sm:$0xff] }
 0x753   :  { %4663 = vst.msk [vmem:[%s9709_s6 + $0x118] sm:$0xff] %vm1423_vm1, %v4566_v30 }
 0x754   :  { %5447 = vmatmul.msk.bf16.gmra.mxu2 %vm675_vm0, %v5393_v47  ;;  %5468 = vmatmul.msk.bf16.gmra.mxu3 %vm675_vm0, %v5393_v47  ;;  %v10213_v47 = vld [vmem:[#allocation73_spill] sm:$0xff] }
 0x755   :  { %v4120_v30 = vadd.f32 %v10213_v47, %v10212_v20 }
 0x756   :  { %v4466_v59 = vpop.f32.mrf.mxu1 }
 0x757   :  { %v4226_v32 = vpop.f32.mrf.mxu2  ;;  %v4568_v28 = vpop.f32.mrf.mxu3 }
 0x758   :  { %v4227_v55 = vadd.f32 %v4226_v32, %v10207_v54  ;;  %v4569_v58 = vadd.f32 %v4568_v28, %v4455_v5  ;;  %v4355_v56 = vpop.f32.mrf.mxu0  ;;  %v4462_v5 = vadd.f32 %v4461_v37, %v4347_v21  ;;  %v5417_v54 = vor.u32 %v5636_v50, %v5416_v12 }
 0x75a   :  { %4664 = vst [vmem:[%s9709_s6 + $0x120] sm:$0xff] %v4227_v55 }
 0x75b   :  { %4665 = vst.msk [vmem:[%s9709_s6 + $0x128] sm:$0xff] %vm1423_vm1, %v4569_v58  ;;  %v4465_v58 = vadd.f32 %v4464_v36, %v4350_v18  ;;  %v5428_v18 = vld [vmem:[%s9708_s5 + $0x1e8] sm:$0xf]  ;;  %v5639_v36 = vld [vmem:[%s9708_s5 + $0x1f0] sm:$0xf0] }
 0x75e   :  { %v4469_v62 = vpop.f32.mrf.mxu1 }
 0x75f   :  { %v4228_v52 = vpop.f32.mrf.mxu2  ;;  %v4570_v19 = vpop.f32.mrf.mxu3 }
 0x760   :  { %v4229_v63 = vadd.f32 %v4228_v52, %v4115_v25  ;;  %v4571_v3 = vadd.f32 %v4570_v19, %v4457_v40  ;;  %4508 = vmatmul.bf16.gmra.mxu1 %v10210_v13  ;;  %v4357_v27 = vpop.f32.mrf.mxu0  ;;  %v10215_v40 = vld [vmem:[#allocation23_spill] sm:$0xff]  ;;  %v10216_v52 = vld [vmem:[#allocation24_spill] sm:$0xff] }
 0x761   :  { %v4125_v19 = vadd.f32 %v10216_v52, %v10215_v40 }
 0x762   :  { %4666 = vst [vmem:[%s9709_s6 + $0x130] sm:$0xff] %v4229_v63  ;;  %v4467_v63 = vadd.f32 %v4466_v59, %v4352_v14  ;;  %v4470_v14 = vadd.f32 %v4469_v62, %v4355_v56 }
 0x763   :  { %4667 = vst.msk [vmem:[%s9709_s6 + $0x138] sm:$0xff] %vm1423_vm1, %v4571_v3 }
 0x764   :  { %5448 = vmatmul.msk.bf16.gmra.mxu2 %vm675_vm0, %v5405_v48  ;;  %5469 = vmatmul.msk.bf16.gmra.mxu3 %vm675_vm0, %v5405_v48 }
 0x766   :  { %v4471_v8 = vpop.f32.mrf.mxu1 }
 0x767   :  { %v4231_v7 = vpop.f32.mrf.mxu2  ;;  %v4573_v33 = vpop.f32.mrf.mxu3  ;;  %v4472_v56 = vadd.f32 %v4471_v8, %v4357_v27 }
 0x768   :  { %v4232_v51 = vadd.f32 %v4231_v7, %v10211_v34  ;;  %v4574_v61 = vadd.f32 %v4573_v33, %v4460_v39  ;;  %v4360_v21 = vpop.f32.mrf.mxu0  ;;  %v5429_v33 = vor.u32 %v5639_v36, %v5428_v18  ;;  %v4135_v18 = vadd.f32 %v9082_v44, %v9080_v0 }
 0x76a   :  { %4668 = vst [vmem:[%s9709_s6 + $0x140] sm:$0xff] %v4232_v51 }
 0x76b   :  { %4669 = vst.msk [vmem:[%s9709_s6 + $0x148] sm:$0xff] %vm1423_vm1, %v4574_v61  ;;  %v10217_v61 = vld [vmem:[#allocation7_spill] sm:$0xff] }
 0x76e   :  { %v4474_v37 = vpop.f32.mrf.mxu1 }
 0x76f   :  { %v4233_v57 = vpop.f32.mrf.mxu2  ;;  %v4575_v32 = vpop.f32.mrf.mxu3 }
 0x770   :  { %v4234_v28 = vadd.f32 %v4233_v57, %v4120_v30  ;;  %v4576_v55 = vadd.f32 %v4575_v32, %v4462_v5  ;;  %v4362_v48 = vpop.f32.mrf.mxu0  ;;  %v10218_v30 = vld [vmem:[#allocation49_spill] sm:$0xff]  ;;  %v10219_v5 = vld [vmem:[#allocation63_spill] sm:$0xff] }
 0x771   :  { %v4130_v57 = vadd.f32 %v10219_v5, %v10218_v30 }
 0x772   :  { %4670 = vst [vmem:[%s9709_s6 + $0x150] sm:$0xff] %v4234_v28 }
 0x773   :  { %4671 = vst.msk [vmem:[%s9709_s6 + $0x158] sm:$0xff] %vm1423_vm1, %v4576_v55 }
 0x774   :  { %5449 = vmatmul.msk.bf16.gmra.mxu2 %vm675_vm0, %v5417_v54  ;;  %5470 = vmatmul.msk.bf16.gmra.mxu3 %vm675_vm0, %v5417_v54 }
 0x776   :  { %v4476_v3 = vpop.f32.mrf.mxu1 }
 0x777   :  { %v4236_v41 = vpop.f32.mrf.mxu2  ;;  %v4578_v15 = vpop.f32.mrf.mxu3 }
 0x778   :  { %v4237_v4 = vadd.f32 %v4236_v41, %v10214_v38  ;;  %v4579_v25 = vadd.f32 %v4578_v15, %v4465_v58  ;;  %v4365_v20 = vpop.f32.mrf.mxu0  ;;  %v4475_v41 = vadd.f32 %v4474_v37, %v4360_v21  ;;  %v4477_v21 = vadd.f32 %v4476_v3, %v4362_v48 }
 0x779   :  { %v4140_v48 = vadd.f32 %v9121_v45, %v9119_v24 }
 0x77a   :  { %4672 = vst [vmem:[%s9709_s6 + $0x160] sm:$0xff] %v4237_v4 }
 0x77b   :  { %4673 = vst.msk [vmem:[%s9709_s6 + $0x168] sm:$0xff] %vm1423_vm1, %v4579_v25 }
 0x77e   :  { %v4479_v47 = vpop.f32.mrf.mxu1 }
 0x77f   :  { %v4238_v39 = vpop.f32.mrf.mxu2  ;;  %v4580_v13 = vpop.f32.mrf.mxu3  ;;  %v4480_v52 = vadd.f32 %v4479_v47, %v4365_v20  ;;  %v4145_v47 = vadd.f32 %v9136_v46, %v9134_v16 }
 0x780   :  { %v4239_v7 = vadd.f32 %v4238_v39, %v4125_v19  ;;  %v4581_v34 = vadd.f32 %v4580_v13, %v4467_v63  ;;  %v4367_v55 = vpop.f32.mrf.mxu0 }
 0x782   :  { %4674 = vst [vmem:[%s9709_s6 + $0x170] sm:$0xff] %v4239_v7 }
 0x783   :  { %4675 = vst.msk [vmem:[%s9709_s6 + $0x178] sm:$0xff] %vm1423_vm1, %v4581_v34 }
 0x784   :  { %5450 = vmatmul.msk.bf16.gmra.mxu2 %vm675_vm0, %v5429_v33  ;;  %5471 = vmatmul.msk.bf16.gmra.mxu3 %vm675_vm0, %v5429_v33 }
 0x786   :  { %v4481_v58 = vpop.f32.mrf.mxu1 }
 0x787   :  { %v4241_v59 = vpop.f32.mrf.mxu2  ;;  %v4583_v51 = vpop.f32.mrf.mxu3  ;;  %v4482_v3 = vadd.f32 %v4481_v58, %v4367_v55  ;;  %v4150_v58 = vadd.f32 %v9151_v22, %v9149_v9 }
 0x788   :  { %v4242_v12 = vadd.f32 %v4241_v59, %v10217_v61  ;;  %v4584_v50 = vadd.f32 %v4583_v51, %v4470_v14  ;;  %v4370_v4 = vpop.f32.mrf.mxu0 }
 0x78a   :  { %4676 = vst [vmem:[%s9709_s6 + $0x180] sm:$0xff] %v4242_v12 }
 0x78b   :  { %4677 = vst.msk [vmem:[%s9709_s6 + $0x188] sm:$0xff] %vm1423_vm1, %v4584_v50 }
 0x78e   :  { %v4484_v25 = vpop.f32.mrf.mxu1 }
 0x78f   :  { %v4243_v62 = vpop.f32.mrf.mxu2  ;;  %v4585_v32 = vpop.f32.mrf.mxu3  ;;  %v4485_v51 = vadd.f32 %v4484_v25, %v4370_v4 }
 0x790   :  { %v4244_v28 = vadd.f32 %v4243_v62, %v4130_v57  ;;  %v4586_v54 = vadd.f32 %v4585_v32, %v4472_v56  ;;  %v4372_v19 = vpop.f32.mrf.mxu0 }
 0x792   :  { %4678 = vst [vmem:[%s9709_s6 + $0x190] sm:$0xff] %v4244_v28 }
 0x793   :  { %4679 = vst.msk [vmem:[%s9709_s6 + $0x198] sm:$0xff] %vm1423_vm1, %v4586_v54 }
 0x796   :  { %v4486_v63 = vpop.f32.mrf.mxu1 }
 0x797   :  { %v4246_v15 = vpop.f32.mrf.mxu2  ;;  %v4588_v38 = vpop.f32.mrf.mxu3  ;;  %v4487_v30 = vadd.f32 %v4486_v63, %v4372_v19 }
 0x798   :  { %v4247_v27 = vadd.f32 %v4246_v15, %v9076_v49  ;;  %v4589_v8 = vadd.f32 %v4588_v38, %v4475_v41  ;;  %v4375_v59 = vpop.f32.mrf.mxu0 }
 0x79a   :  { %4680 = vst [vmem:[%s9709_s6 + $0x1a0] sm:$0xff] %v4247_v27 }
 0x79b   :  { %4681 = vst.msk [vmem:[%s9709_s6 + $0x1a8] sm:$0xff] %vm1423_vm1, %v4589_v8 }
 0x79f   :  { %v4248_v37 = vpop.f32.mrf.mxu2  ;;  %v4590_v36 = vpop.f32.mrf.mxu3 }
 0x7a0   :  { %v4249_v40 = vadd.f32 %v4248_v37, %v4135_v18  ;;  %v4591_v49 = vadd.f32 %v4590_v36, %v4477_v21  ;;  %v4377_v50 = vpop.f32.mrf.mxu0 }
 0x7a2   :  { %4682 = vst [vmem:[%s9709_s6 + $0x1b0] sm:$0xff] %v4249_v40  ;;  %v4155_v40 = vadd.f32 %v9166_v11, %v9164_v60 }
 0x7a3   :  { %4683 = vst.msk [vmem:[%s9709_s6 + $0x1b8] sm:$0xff] %vm1423_vm1, %v4591_v49 }
 0x7a7   :  { %v4251_v39 = vpop.f32.mrf.mxu2  ;;  %v4593_v13 = vpop.f32.mrf.mxu3 }
 0x7a8   :  { %v4252_v0 = vadd.f32 %v4251_v39, %v9111_v42  ;;  %v4594_v44 = vadd.f32 %v4593_v13, %v4480_v52  ;;  %v4489_v42 = vpop.f32.mrf.mxu1  ;;  %v4380_v32 = vpop.f32.mrf.mxu0 }
 0x7a9   :  { %v4490_v62 = vadd.f32 %v4489_v42, %v4375_v59 }
 0x7aa   :  { %4684 = vst [vmem:[%s9709_s6 + $0x1c0] sm:$0xff] %v4252_v0 }
 0x7ab   :  { %4685 = vst.msk [vmem:[%s9709_s6 + $0x1c8] sm:$0xff] %vm1423_vm1, %v4594_v44 }
 0x7af   :  { %v4253_v7 = vpop.f32.mrf.mxu2  ;;  %v4595_v33 = vpop.f32.mrf.mxu3 }
 0x7b0   :  { %v4254_v34 = vadd.f32 %v4253_v7, %v4140_v48  ;;  %v4596_v14 = vadd.f32 %v4595_v33, %v4482_v3  ;;  %v4491_v20 = vpop.f32.mrf.mxu1  ;;  %v4382_v15 = vpop.f32.mrf.mxu0  ;;  %v4160_v33 = vadd.f32 %v9181_v43, %v9179_v26 }
 0x7b1   :  { %v4492_v41 = vadd.f32 %v4491_v20, %v4377_v50  ;;  %v4165_v50 = vadd.f32 %v9196_v53, %v9194_v6 }
 0x7b2   :  { %4686 = vst [vmem:[%s9709_s6 + $0x1d0] sm:$0xff] %v4254_v34 }
 0x7b3   :  { %4687 = vst.msk [vmem:[%s9709_s6 + $0x1d8] sm:$0xff] %vm1423_vm1, %v4596_v14 }
 0x7b7   :  { %v4256_v61 = vpop.f32.mrf.mxu2  ;;  %v4598_v12 = vpop.f32.mrf.mxu3 }
 0x7b8   :  { %v4257_v24 = vadd.f32 %v4256_v61, %v9132_v1  ;;  %v4599_v45 = vadd.f32 %v4598_v12, %v4485_v51  ;;  %v4494_v28 = vpop.f32.mrf.mxu1  ;;  %v4385_v37 = vpop.f32.mrf.mxu0 }
 0x7b9   :  { %v4495_v25 = vadd.f32 %v4494_v28, %v4380_v32 }
 0x7ba   :  { %4688 = vst [vmem:[%s9709_s6 + $0x1e0] sm:$0xff] %v4257_v24 }
 0x7bb   :  { %4689 = vst.msk [vmem:[%s9709_s6 + $0x1e8] sm:$0xff] %vm1423_vm1, %v4599_v45 }
 0x7bf   :  { %v4258_v5 = vpop.f32.mrf.mxu2  ;;  %v4600_v57 = vpop.f32.mrf.mxu3 }
 0x7c0   :  { %v4259_v56 = vadd.f32 %v4258_v5, %v4145_v47  ;;  %v4601_v1 = vadd.f32 %v4600_v57, %v4487_v30  ;;  %v4496_v38 = vpop.f32.mrf.mxu1  ;;  %v4387_v39 = vpop.f32.mrf.mxu0 }
 0x7c1   :  { %v4497_v49 = vadd.f32 %v4496_v38, %v4382_v15 }
 0x7c2   :  { %4690 = vst [vmem:[%s9709_s6 + $0x1f0] sm:$0xff] %v4259_v56 }
 0x7c3   :  { %4691 = vst.msk [vmem:[%s9709_s6 + $0x1f8] sm:$0xff] %vm1423_vm1, %v4601_v1 }
 0x7c7   :  { %v4261_v54 = vpop.f32.mrf.mxu2  ;;  %v4603_v55 = vpop.f32.mrf.mxu3 }
 0x7c8   :  { %v4262_v16 = vadd.f32 %v4261_v54, %v9147_v31  ;;  %v4604_v46 = vadd.f32 %v4603_v55, %v4490_v62  ;;  %v4499_v36 = vpop.f32.mrf.mxu1  ;;  %v4390_v3 = vpop.f32.mrf.mxu0  ;;  %v4170_v55 = vadd.f32 %v9237_v23, %v9209_v35 }
 0x7c9   :  { %v4500_v0 = vadd.f32 %v4499_v36, %v4385_v37 }
 0x7ca   :  { %4692 = vst [vmem:[%s9709_s6 + $0x200] sm:$0xff] %v4262_v16 }
 0x7cb   :  { %4693 = vst.msk [vmem:[%s9709_s6 + $0x208] sm:$0xff] %vm1423_vm1, %v4604_v46 }
 0x7cf   :  { %v4263_v27 = vpop.f32.mrf.mxu2  ;;  %v4605_v8 = vpop.f32.mrf.mxu3 }
 0x7d0   :  { %v4264_v4 = vadd.f32 %v4263_v27, %v4150_v58  ;;  %v4606_v31 = vadd.f32 %v4605_v8, %v4492_v41  ;;  %v4501_v13 = vpop.f32.mrf.mxu1  ;;  %v4392_v61 = vpop.f32.mrf.mxu0 }
 0x7d1   :  { %v4502_v34 = vadd.f32 %v4501_v13, %v4387_v39 }
 0x7d2   :  { %4694 = vst [vmem:[%s9709_s6 + $0x210] sm:$0xff] %v4264_v4 }
 0x7d3   :  { %4695 = vst.msk [vmem:[%s9709_s6 + $0x218] sm:$0xff] %vm1423_vm1, %v4606_v31 }
 0x7d7   :  { %v4266_v18 = vpop.f32.mrf.mxu2  ;;  %v4608_v21 = vpop.f32.mrf.mxu3 }
 0x7d8   :  { %v4267_v9 = vadd.f32 %v4266_v18, %v9162_v29  ;;  %v4609_v22 = vadd.f32 %v4608_v21, %v4495_v25  ;;  %v4504_v7 = vpop.f32.mrf.mxu1  ;;  %v4395_v56 = vpop.f32.mrf.mxu0 }
 0x7d9   :  { %v4505_v51 = vadd.f32 %v4504_v7, %v4390_v3 }
 0x7da   :  { %4696 = vst [vmem:[%s9709_s6 + $0x220] sm:$0xff] %v4267_v9 }
 0x7db   :  { %4697 = vst.msk [vmem:[%s9709_s6 + $0x228] sm:$0xff] %vm1423_vm1, %v4609_v22 }
 0x7df   :  { %v4268_v52 = vpop.f32.mrf.mxu2  ;;  %v4610_v19 = vpop.f32.mrf.mxu3 }
 0x7e0   :  { %v4269_v63 = vadd.f32 %v4268_v52, %v4155_v40  ;;  %v4611_v29 = vadd.f32 %v4610_v19, %v4497_v49  ;;  %v4506_v12 = vpop.f32.mrf.mxu1  ;;  %v4397_v28 = vpop.f32.mrf.mxu0 }
 0x7e1   :  { %v4507_v20 = vadd.f32 %v4506_v12, %v4392_v61 }
 0x7e2   :  { %4698 = vst [vmem:[%s9709_s6 + $0x230] sm:$0xff] %v4269_v63 }
 0x7e3   :  { %4699 = vst.msk [vmem:[%s9709_s6 + $0x238] sm:$0xff] %vm1423_vm1, %v4611_v29 }
 0x7e7   :  { %v4271_v44 = vpop.f32.mrf.mxu2  ;;  %v4613_v48 = vpop.f32.mrf.mxu3 }
 0x7e8   :  { %v4272_v60 = vadd.f32 %v4271_v44, %v9177_v10  ;;  %v4614_v11 = vadd.f32 %v4613_v48, %v4500_v0 }
 0x7ea   :  { %4700 = vst [vmem:[%s9709_s6 + $0x240] sm:$0xff] %v4272_v60 }
 0x7eb   :  { %4701 = vst.msk [vmem:[%s9709_s6 + $0x248] sm:$0xff] %vm1423_vm1, %v4614_v11 }
 0x7ef   :  { %v4273_v14 = vpop.f32.mrf.mxu2  ;;  %v4615_v59 = vpop.f32.mrf.mxu3 }
 0x7f0   :  { %v4274_v42 = vadd.f32 %v4273_v14, %v4160_v33  ;;  %v4616_v10 = vadd.f32 %v4615_v59, %v4502_v34 }
 0x7f2   :  { %4702 = vst [vmem:[%s9709_s6 + $0x250] sm:$0xff] %v4274_v42 }
 0x7f3   :  { %4703 = vst.msk [vmem:[%s9709_s6 + $0x258] sm:$0xff] %vm1423_vm1, %v4616_v10 }
 0x7f7   :  { %v4276_v24 = vpop.f32.mrf.mxu2  ;;  %v4618_v45 = vpop.f32.mrf.mxu3 }
 0x7f8   :  { %v4277_v26 = vadd.f32 %v4276_v24, %v9192_v17  ;;  %v4619_v43 = vadd.f32 %v4618_v45, %v4505_v51  ;;  %v4509_v17 = vpop.f32.mrf.mxu1 }
 0x7f9   :  { %v4510_v1 = vadd.f32 %v4509_v17, %v4395_v56 }
 0x7fa   :  { %4704 = vst [vmem:[%s9709_s6 + $0x260] sm:$0xff] %v4277_v26 }
 0x7fb   :  { %4705 = vst.msk [vmem:[%s9709_s6 + $0x268] sm:$0xff] %vm1423_vm1, %v4619_v43 }
 0x7ff   :  { %v4278_v47 = vpop.f32.mrf.mxu2  ;;  %v4620_v30 = vpop.f32.mrf.mxu3 }
 0x800   :  { %v4279_v5 = vadd.f32 %v4278_v47, %v4165_v50  ;;  %v4621_v57 = vadd.f32 %v4620_v30, %v4507_v20  ;;  %v4511_v54 = vpop.f32.mrf.mxu1 }
 0x801   :  { %v4512_v16 = vadd.f32 %v4511_v54, %v4397_v28 }
 0x802   :  { %4706 = vst [vmem:[%s9709_s6 + $0x270] sm:$0xff] %v4279_v5 }
 0x803   :  { %4707 = vst.msk [vmem:[%s9709_s6 + $0x278] sm:$0xff] %vm1423_vm1, %v4621_v57 }
 0x807   :  { %v4281_v62 = vpop.f32.mrf.mxu2  ;;  %v4623_v32 = vpop.f32.mrf.mxu3 }
 0x808   :  { %v4282_v6 = vadd.f32 %v4281_v62, %v9207_v2  ;;  %v4624_v53 = vadd.f32 %v4623_v32, %v4510_v1 }
 0x80a   :  { %4708 = vst [vmem:[%s9709_s6 + $0x280] sm:$0xff] %v4282_v6 }
 0x80b   :  { %4709 = vst.msk [vmem:[%s9709_s6 + $0x288] sm:$0xff] %vm1423_vm1, %v4624_v53 }
 0x80f   :  { %v4283_v46 = vpop.f32.mrf.mxu2  ;;  %v4625_v58 = vpop.f32.mrf.mxu3 }
 0x810   :  { %v4284_v41 = vadd.f32 %v4283_v46, %v4170_v55  ;;  %v4626_v2 = vadd.f32 %v4625_v58, %v4512_v16 }
 0x812   :  { %4710 = vst [vmem:[%s9709_s6 + $0x290] sm:$0xff] %v4284_v41 }
 0x813   :  { %4711 = vst.msk [vmem:[%s9709_s6 + $0x298] sm:$0xff] %vm1423_vm1, %v4626_v2 }

</bundles_post_ra>
